<compile_context>
chip_gen: v6e
topology: v6e:2x2x1
jax: 0.10.0
libtpu: 0.0.40
codegen_flags: <defaults>
</compile_context>

<pallas_src>
import functools

import jax
import jax.numpy as jnp
from jax import lax
from jax.experimental import pallas as pl
from jax.experimental.pallas import tpu as pltpu


# ----------------------------- cfg (synthetic) -------------------------------
NUM_CLASSES = 16
BACKGROUND_LABEL = 0
NEGPOS_RATIO = 3
MATCHED_THRESHOLD = 0.5
VARIANCE = (0.1, 0.2)

_OUT_LANES = 128   # output row per image: lanes 0/1/2 = loss_l / loss_c / num_pos


# -------------------- glue: SSD matching / encoding (plain JAX) --------------
def point_form(priors):
    # (cx, cy, w, h) -> (xmin, ymin, xmax, ymax)
    return jnp.concatenate(
        [priors[:, :2] - priors[:, 2:] / 2.0,
         priors[:, :2] + priors[:, 2:] / 2.0], axis=1)


def jaccard(box_a, box_b):
    max_xy = jnp.minimum(box_a[:, None, 2:], box_b[None, :, 2:])
    min_xy = jnp.maximum(box_a[:, None, :2], box_b[None, :, :2])
    inter_wh = jnp.clip(max_xy - min_xy, 0.0)
    inter = inter_wh[..., 0] * inter_wh[..., 1]
    area_a = ((box_a[:, 2] - box_a[:, 0]) * (box_a[:, 3] - box_a[:, 1]))[:, None]
    area_b = ((box_b[:, 2] - box_b[:, 0]) * (box_b[:, 3] - box_b[:, 1]))[None, :]
    return inter / (area_a + area_b - inter)


def encode(matched, priors, variances):
    g_cxcy = (matched[:, :2] + matched[:, 2:]) / 2.0 - priors[:, :2]
    g_cxcy = g_cxcy / (variances[0] * priors[:, 2:])
    g_wh = (matched[:, 2:] - matched[:, :2]) / priors[:, 2:]
    g_wh = jnp.log(g_wh) / variances[1]
    return jnp.concatenate([g_cxcy, g_wh], axis=1)


def match(threshold, truths, priors, variances, labels):
    """Single-image SSD matching; labels are expected >=1 (0 = background)."""
    overlaps = jaccard(truths, point_form(priors))       # [num_obj, P]
    best_prior_idx = jnp.argmax(overlaps, axis=1)        # [num_obj]
    best_truth_overlap = jnp.max(overlaps, axis=0)       # [P]
    best_truth_idx = jnp.argmax(overlaps, axis=0)        # [P]
    # make sure every gt box keeps its best prior
    # TODO(synk): torch's in-place loop makes the *last* duplicate index win;
    # JAX scatter duplicate order is unspecified (irrelevant for distinct bests).
    best_truth_overlap = best_truth_overlap.at[best_prior_idx].set(2.0)
    num_obj = truths.shape[0]
    best_truth_idx = best_truth_idx.at[best_prior_idx].set(jnp.arange(num_obj))
    matches = truths[best_truth_idx]                     # [P, 4]
    conf = labels[best_truth_idx].astype(jnp.int32)      # [P]
    conf = jnp.where(best_truth_overlap < threshold, 0, conf)
    loc = encode(matches, priors, variances)             # [P, 4]
    return loc, conf


# ------------------------------ Pallas kernel --------------------------------
def _multibox_loss_kernel(loc8_ref, conf_ref, conf_t_ref, out_ref, *, negpos_ratio):
    """One grid step == one batch block of Bt images.

    Layouts (lanes = priors, sublanes = images, leading axes un-tiled):
      loc8_ref   : (8, Bt, P)  rows 0..3 = loc predictions, rows 4..7 = encoded GT
      conf_ref   : (C, Bt, P)  class-major logits (f32 or bf16)
      conf_t_ref : (Bt, P)     int32 matched labels (0 = background)
      out_ref    : (Bt, 128)   lanes 0/1/2 = loss_l, loss_c, num_pos
    """
    C = conf_ref.shape[0]
    Bt, P = conf_t_ref.shape

    conf_t = conf_t_ref[...]                              # (Bt, P) int32
    pos = conf_t > 0
    posf = pos.astype(jnp.float32)
    num_pos = jnp.sum(posf, axis=1, keepdims=True)        # (Bt, 1)

    # ---- localisation: smooth-L1 over positive priors (coords on leading axis) --
    sl1 = jnp.zeros_like(posf)
    for c in range(4):
        ad = jnp.abs(loc8_ref[c] - loc8_ref[c + 4])       # (Bt, P)
        sl1 = sl1 + jnp.where(ad < 1.0, 0.5 * ad * ad, ad - 0.5)
    loss_l = jnp.sum(sl1 * posf, axis=1, keepdims=True)   # (Bt, 1)

    # ---- per-prior softmax CE; class-major conf => full-vreg elementwise passes --
    m = conf_ref[0].astype(jnp.float32)                   # running max over classes
    for c in range(1, C):
        m = jnp.maximum(m, conf_ref[c].astype(jnp.float32))
    se = jnp.zeros_like(m)                                # sum of exp
    gt = jnp.zeros_like(m)                                # gathered gt-class logit
    for c in range(C):
        cc = conf_ref[c].astype(jnp.float32)
        se = se + jnp.exp(cc - m)
        gt = gt + jnp.where(conf_t == c, cc, 0.0)
    lc = jnp.log(se) + m - gt                             # (Bt, P) CE per prior

    # ---- hard negative mining (O(P), no PxP temporaries) ----
    # torch zeroes positives, sorts descending, keeps num_neg = min(3*num_pos, P-1).
    # The selected *sum* is tie-order independent, so find the num_neg-th largest
    # mined loss by an MSB-first radix-4 select over the f32 bit pattern (signed
    # int compare is monotone because lc_neg >= 0), then close the sum analytically:
    #   topk_sum = sum(x[x > t]) + t * (k - count(x > t)).
    lc_neg = jnp.where(pos, 0.0, jnp.maximum(lc, 0.0))    # (Bt, P), >= 0
    k = jnp.minimum(jnp.float32(negpos_ratio) * num_pos,
                    jnp.float32(P - 1))                   # (Bt, 1)
    bits = pltpu.bitcast(lc_neg, jnp.int32)               # (Bt, P)

    # Lane counts go through the otherwise-idle MXU (mask @ ones.T) to keep the
    # VALU/XLU slots free in the serial radix chain.  Counts and k are exact
    # integers in f32 (P << 2^24).
    ones8 = jnp.ones((8, P), jnp.float32)

    def lane_count(mask):
        cnt = lax.dot_general(mask.astype(jnp.float32), ones8,
                              (((1,), (1,)), ((), ())),
                              preferred_element_type=jnp.float32)   # (Bt, 8)
        return cnt[:, :1]                                           # (Bt, 1)

    t_bits = jnp.zeros((Bt, 1), jnp.int32)
    for b in range(29, 0, -2):            # bit pairs (30,29), (28,27), ..., (2,1)
        c1 = t_bits | (1 << b)
        c2 = t_bits | (2 << b)
        c3 = t_bits | (3 << b)
        n1 = lane_count(bits >= c1)
        n2 = lane_count(bits >= c2)
        n3 = lane_count(bits >= c3)
        t_bits = jnp.where(n3 >= k, c3,
                 jnp.where(n2 >= k, c2,
                 jnp.where(n1 >= k, c1, t_bits)))
    c0 = t_bits | 1                       # final single bit 0
    t_bits = jnp.where(lane_count(bits >= c0) >= k, c0, t_bits)
    t_val = pltpu.bitcast(t_bits, jnp.float32)            # (Bt, 1) k-th largest

    gt_mask = (lc_neg > t_val).astype(jnp.float32)        # (Bt, P)
    cnt_gt = jnp.sum(gt_mask, axis=1, keepdims=True)
    sum_gt = jnp.sum(lc_neg * gt_mask, axis=1, keepdims=True)
    neg_sum = jnp.where(k > 0.0, sum_gt + t_val * (k - cnt_gt), 0.0)

    pos_sum = jnp.sum(lc * posf, axis=1, keepdims=True)   # positives always kept
    loss_c = pos_sum + neg_sum                            # (Bt, 1)

    # ---- one unmasked sublane/lane-dense store ----
    lane = lax.broadcasted_iota(jnp.int32, (Bt, _OUT_LANES), 1)
    out_ref[...] = (jnp.where(lane == 0, loss_l, 0.0)
                    + jnp.where(lane == 1, loss_c, 0.0)
                    + jnp.where(lane == 2, num_pos, 0.0))


# --------------------------- VMEM-aware batch blocking -----------------------
def _vmem_budget_bytes():
    """(sizing budget, physical capacity): budget = half VMEM, capped at 64 MiB."""
    try:
        cap = int(pltpu.get_tpu_info().vmem_capacity_bytes)
    except Exception:
        cap = 64 << 20
    return max(16 << 20, min(cap // 2, 64 << 20)), cap


def _plan_batch_block(B, P, C, conf_itemsize, budget):
    """Pick (padded batch, images per block): Bt is a multiple of 8 (or == B for
    tiny batches), sized to the VMEM budget, preferring >= 2 grid blocks so both
    TensorCores of a dual-TC chip (v7x) get work."""
    p_pad = -(-P // 128) * 128
    per_image_in = p_pad * (8 * 4 + C * conf_itemsize + 4)   # loc8 + conf + conf_t
    per_image_tmp = p_pad * 4 * 16                           # (Bt,P) f32 temporaries
    fixed = 8 * p_pad * 4 + (1 << 16)                        # ones RHS + slack

    def fits(bt):
        return bt * (2 * per_image_in + per_image_tmp) + fixed <= 0.8 * budget

    if B <= 8:
        return B, B
    B_pad = -(-B // 8) * 8
    cands = [bt for bt in range(8, B_pad + 1, 8)
             if B_pad % bt == 0 and fits(bt)] or [8]
    bt = max(cands)
    if B_pad // bt < 2:                   # keep both v7x TensorCores busy
        two = [c for c in cands if B_pad // c >= 2]
        if two:
            bt = max(two)
    return B_pad, bt


# ------------------------------ module wrapper -------------------------------
class MultiBoxLossPallas:
    def __init__(self, num_classes, priors, threshold=MATCHED_THRESHOLD,
                 variance=VARIANCE, negpos_ratio=NEGPOS_RATIO,
                 conf_dtype=jnp.float32):
        # conf_dtype: streaming dtype of the (largest) conf tensor.  Use
        # jnp.bfloat16 on v6e/v7x to halve its DMA/VMEM; in-kernel math is f32.
        self.num_classes = num_classes
        self.priors = priors                      # [P, 4] center-form
        self.threshold = threshold
        self.variance = variance
        self.negpos_ratio = negpos_ratio
        self.conf_dtype = conf_dtype

    def __call__(self, predictions, targets, conf_is_class_major=False):
        loc_data, conf_data = predictions         # [B,P,4], [B,P,C] (or [C,B,P])
        B, P, _ = loc_data.shape
        C = self.num_classes
        priors = self.priors

        # TODO(synk): torch accepts variable-length per-image target lists; here
        # targets is a fixed [B, num_objs, 5] array (padding rows would need
        # masking inside match()).
        def match_one(t):
            return match(self.threshold, t[:, :4], priors, self.variance, t[:, 4])

        loc_t, conf_t = jax.vmap(match_one)(targets)            # [B,P,4], [B,P]

        # Layout plumbing: coords/classes on the un-tiled leading axis, batch on
        # sublanes, priors on lanes.
        loc8 = jnp.concatenate([jnp.transpose(loc_data, (2, 0, 1)),
                                jnp.transpose(loc_t, (2, 0, 1))], axis=0)  # [8,B,P]
        if conf_is_class_major:
            conf_cbp = conf_data.astype(self.conf_dtype)        # already [C,B,P]
        else:
            # TODO(synk): produce conf class-major upstream (fuse into the conf
            # head) to avoid this extra HBM round trip of the biggest tensor.
            conf_cbp = jnp.transpose(conf_data, (2, 0, 1)).astype(self.conf_dtype)
        conf_t_i = conf_t.astype(jnp.int32)                     # [B,P]

        budget, cap = _vmem_budget_bytes()
        conf_bytes = jnp.dtype(self.conf_dtype).itemsize
        B_pad, bt = _plan_batch_block(B, P, C, conf_bytes, budget)
        if B_pad != B:   # zero-padded images contribute exactly 0 to every sum
            pad = B_pad - B
            loc8 = jnp.pad(loc8, ((0, 0), (0, pad), (0, 0)))
            conf_cbp = jnp.pad(conf_cbp, ((0, 0), (0, pad), (0, 0)))
            conf_t_i = jnp.pad(conf_t_i, ((0, pad), (0, 0)))

        grid = (B_pad // bt,)
        ce = pl.CostEstimate(
            flops=int(B_pad * P * (6 * C + 16 * 10 + 64)),
            transcendentals=int(B_pad * P * (C + 1)),
            bytes_accessed=int(B_pad * P * (8 * 4 + 4 + C * conf_bytes)
                               + B_pad * _OUT_LANES * 4),
        )

        partials = pl.pallas_call(
            functools.partial(_multibox_loss_kernel,
                              negpos_ratio=self.negpos_ratio),
            out_shape=jax.ShapeDtypeStruct((B_pad, _OUT_LANES), jnp.float32),
            grid=grid,
            in_specs=[
                pl.BlockSpec((8, bt, P), lambda s: (0, s, 0)),
                pl.BlockSpec((C, bt, P), lambda s: (0, s, 0)),
                pl.BlockSpec((bt, P), lambda s: (s, 0)),
            ],
            out_specs=pl.BlockSpec((bt, _OUT_LANES), lambda s: (s, 0)),
            compiler_params=pltpu.CompilerParams(
                dimension_semantics=("parallel",),
                vmem_limit_bytes=int(min(cap * 3 // 4, 96 << 20)),
            ),
            cost_estimate=ce,
        )(loc8, conf_cbp, conf_t_i)

        totals = jnp.sum(partials, axis=0)                      # (128,)
        # TODO(synk): torch divides by N even when N == 0 (inf/nan); clamp to 1.
        n = jnp.maximum(totals[2], 1.0)                         # N = total positives
        loss_l = totals[0] / n
        loss_c = totals[1] / n
        return loss_l, loss_c


# --------------------------------- example ----------------------------------
def make_priors(grid=16, size=0.2):
    xs = (jnp.arange(grid, dtype=jnp.float32) + 0.5) / grid
    cy, cx = jnp.meshgrid(xs, xs, indexing="ij")
    cxcy = jnp.stack([cx.ravel(), cy.ravel()], axis=-1)
    wh = jnp.full_like(cxcy, size)
    return jnp.concatenate([cxcy, wh], axis=-1)    # [grid*grid, 4] center-form


if __name__ == "__main__":
    B, num_objs = 8, 3
    C = NUM_CLASSES
    priors = make_priors(16, 0.2)                  # P = 256 priors
    P = priors.shape[0]

    key = jax.random.PRNGKey(0)
    k1, k2, k3, k4, k5 = jax.random.split(key, 5)
    xy = jax.random.uniform(k1, (B, num_objs, 2), minval=0.05, maxval=0.55)
    wh = jax.random.uniform(k2, (B, num_objs, 2), minval=0.15, maxval=0.35)
    boxes = jnp.concatenate([xy, xy + wh], axis=-1)          # point-form gt
    labels = jax.random.randint(k3, (B, num_objs, 1), 1, C).astype(jnp.float32)
    targets = jnp.concatenate([boxes, labels], axis=-1)      # [B, num_objs, 5]

    loc_data = 0.1 * jax.random.normal(k4, (B, P, 4), dtype=jnp.float32)
    conf_data = jax.random.normal(k5, (B, P, C), dtype=jnp.float32)

    criterion = MultiBoxLossPallas(C, priors)
    loss_l, loss_c = criterion((loc_data, conf_data), targets)
    jax.block_until_ready((loss_l, loss_c))
    print("KERNEL_OK")
</pallas_src>

<mosaic_0001>
module attributes {stable_mosaic.version = 11 : i64} {
  func.func @_multibox_loss_kernel(%arg0: i32, %arg1: memref<8x8x256xf32, #tpu.memory_space<vmem>>, %arg2: memref<16x8x256xf32, #tpu.memory_space<vmem>>, %arg3: memref<8x256xi32, #tpu.memory_space<vmem>>, %arg4: memref<8x128xf32, #tpu.memory_space<vmem>>) attributes {dimension_semantics = [#tpu.dimension_semantics<parallel>], iteration_bounds = array<i64: 1>, scalar_prefetch = 0 : i64, scratch_operands = 0 : i64, tpu.core_type = #tpu.core_type<tc>, window_params = [{transform_indices = @transform_0, window_bounds = array<i64: 8, 8, 256>}, {transform_indices = @transform_1, window_bounds = array<i64: 16, 8, 256>}, {transform_indices = @transform_2, window_bounds = array<i64: 8, 256>}, {transform_indices = @transform_3, window_bounds = array<i64: 8, 128>}]} {
    %c0 = arith.constant 0 : index
    %c0_0 = arith.constant 0 : index
    %0 = vector.load %arg3[%c0, %c0_0] : memref<8x256xi32, #tpu.memory_space<vmem>>, vector<8x256xi32>
    %c0_i32 = arith.constant 0 : i32
    %1 = vector.broadcast %c0_i32 : i32 to vector<8x256xi32>
    %2 = arith.cmpi sgt, %0, %1 : vector<8x256xi32>
    %3 = arith.extui %2 : vector<8x256xi1> to vector<8x256xi32>
    %4 = arith.sitofp %3 : vector<8x256xi32> to vector<8x256xf32>
    %cst = arith.constant dense<0.000000e+00> : vector<8xf32>
    %5 = vector.multi_reduction <add>, %4, %cst [1] : vector<8x256xf32> to vector<8xf32>
    %6 = vector.shape_cast %5 : vector<8xf32> to vector<8x1xf32>
    %cst_1 = arith.constant 0.000000e+00 : f32
    %7 = vector.broadcast %cst_1 : f32 to vector<8x256xf32>
    %c0_2 = arith.constant 0 : index
    %c0_3 = arith.constant 0 : index
    %c0_4 = arith.constant 0 : index
    %8 = vector.load %arg1[%c0_2, %c0_3, %c0_4] : memref<8x8x256xf32, #tpu.memory_space<vmem>>, vector<1x8x256xf32>
    %9 = vector.shape_cast %8 : vector<1x8x256xf32> to vector<8x256xf32>
    %c4 = arith.constant 4 : index
    %c0_5 = arith.constant 0 : index
    %c0_6 = arith.constant 0 : index
    %10 = vector.load %arg1[%c4, %c0_5, %c0_6] : memref<8x8x256xf32, #tpu.memory_space<vmem>>, vector<1x8x256xf32>
    %11 = vector.shape_cast %10 : vector<1x8x256xf32> to vector<8x256xf32>
    %12 = arith.subf %9, %11 : vector<8x256xf32>
    %13 = math.absf %12 : vector<8x256xf32>
    %cst_7 = arith.constant 1.000000e+00 : f32
    %14 = vector.broadcast %cst_7 : f32 to vector<8x256xf32>
    %15 = arith.cmpf olt, %13, %14 : vector<8x256xf32>
    %cst_8 = arith.constant 5.000000e-01 : f32
    %16 = vector.broadcast %cst_8 : f32 to vector<8x256xf32>
    %17 = arith.mulf %16, %13 : vector<8x256xf32>
    %18 = arith.mulf %17, %13 : vector<8x256xf32>
    %cst_9 = arith.constant 5.000000e-01 : f32
    %19 = vector.broadcast %cst_9 : f32 to vector<8x256xf32>
    %20 = arith.subf %13, %19 : vector<8x256xf32>
    %21 = arith.select %15, %18, %20 : vector<8x256xi1>, vector<8x256xf32>
    %22 = arith.addf %7, %21 : vector<8x256xf32>
    %c1 = arith.constant 1 : index
    %c0_10 = arith.constant 0 : index
    %c0_11 = arith.constant 0 : index
    %23 = vector.load %arg1[%c1, %c0_10, %c0_11] : memref<8x8x256xf32, #tpu.memory_space<vmem>>, vector<1x8x256xf32>
    %24 = vector.shape_cast %23 : vector<1x8x256xf32> to vector<8x256xf32>
    %c5 = arith.constant 5 : index
    %c0_12 = arith.constant 0 : index
    %c0_13 = arith.constant 0 : index
    %25 = vector.load %arg1[%c5, %c0_12, %c0_13] : memref<8x8x256xf32, #tpu.memory_space<vmem>>, vector<1x8x256xf32>
    %26 = vector.shape_cast %25 : vector<1x8x256xf32> to vector<8x256xf32>
    %27 = arith.subf %24, %26 : vector<8x256xf32>
    %28 = math.absf %27 : vector<8x256xf32>
    %cst_14 = arith.constant 1.000000e+00 : f32
    %29 = vector.broadcast %cst_14 : f32 to vector<8x256xf32>
    %30 = arith.cmpf olt, %28, %29 : vector<8x256xf32>
    %cst_15 = arith.constant 5.000000e-01 : f32
    %31 = vector.broadcast %cst_15 : f32 to vector<8x256xf32>
    %32 = arith.mulf %31, %28 : vector<8x256xf32>
    %33 = arith.mulf %32, %28 : vector<8x256xf32>
    %cst_16 = arith.constant 5.000000e-01 : f32
    %34 = vector.broadcast %cst_16 : f32 to vector<8x256xf32>
    %35 = arith.subf %28, %34 : vector<8x256xf32>
    %36 = arith.select %30, %33, %35 : vector<8x256xi1>, vector<8x256xf32>
    %37 = arith.addf %22, %36 : vector<8x256xf32>
    %c2 = arith.constant 2 : index
    %c0_17 = arith.constant 0 : index
    %c0_18 = arith.constant 0 : index
    %38 = vector.load %arg1[%c2, %c0_17, %c0_18] : memref<8x8x256xf32, #tpu.memory_space<vmem>>, vector<1x8x256xf32>
    %39 = vector.shape_cast %38 : vector<1x8x256xf32> to vector<8x256xf32>
    %c6 = arith.constant 6 : index
    %c0_19 = arith.constant 0 : index
    %c0_20 = arith.constant 0 : index
    %40 = vector.load %arg1[%c6, %c0_19, %c0_20] : memref<8x8x256xf32, #tpu.memory_space<vmem>>, vector<1x8x256xf32>
    %41 = vector.shape_cast %40 : vector<1x8x256xf32> to vector<8x256xf32>
    %42 = arith.subf %39, %41 : vector<8x256xf32>
    %43 = math.absf %42 : vector<8x256xf32>
    %cst_21 = arith.constant 1.000000e+00 : f32
    %44 = vector.broadcast %cst_21 : f32 to vector<8x256xf32>
    %45 = arith.cmpf olt, %43, %44 : vector<8x256xf32>
    %cst_22 = arith.constant 5.000000e-01 : f32
    %46 = vector.broadcast %cst_22 : f32 to vector<8x256xf32>
    %47 = arith.mulf %46, %43 : vector<8x256xf32>
    %48 = arith.mulf %47, %43 : vector<8x256xf32>
    %cst_23 = arith.constant 5.000000e-01 : f32
    %49 = vector.broadcast %cst_23 : f32 to vector<8x256xf32>
    %50 = arith.subf %43, %49 : vector<8x256xf32>
    %51 = arith.select %45, %48, %50 : vector<8x256xi1>, vector<8x256xf32>
    %52 = arith.addf %37, %51 : vector<8x256xf32>
    %c3 = arith.constant 3 : index
    %c0_24 = arith.constant 0 : index
    %c0_25 = arith.constant 0 : index
    %53 = vector.load %arg1[%c3, %c0_24, %c0_25] : memref<8x8x256xf32, #tpu.memory_space<vmem>>, vector<1x8x256xf32>
    %54 = vector.shape_cast %53 : vector<1x8x256xf32> to vector<8x256xf32>
    %c7 = arith.constant 7 : index
    %c0_26 = arith.constant 0 : index
    %c0_27 = arith.constant 0 : index
    %55 = vector.load %arg1[%c7, %c0_26, %c0_27] : memref<8x8x256xf32, #tpu.memory_space<vmem>>, vector<1x8x256xf32>
    %56 = vector.shape_cast %55 : vector<1x8x256xf32> to vector<8x256xf32>
    %57 = arith.subf %54, %56 : vector<8x256xf32>
    %58 = math.absf %57 : vector<8x256xf32>
    %cst_28 = arith.constant 1.000000e+00 : f32
    %59 = vector.broadcast %cst_28 : f32 to vector<8x256xf32>
    %60 = arith.cmpf olt, %58, %59 : vector<8x256xf32>
    %cst_29 = arith.constant 5.000000e-01 : f32
    %61 = vector.broadcast %cst_29 : f32 to vector<8x256xf32>
    %62 = arith.mulf %61, %58 : vector<8x256xf32>
    %63 = arith.mulf %62, %58 : vector<8x256xf32>
    %cst_30 = arith.constant 5.000000e-01 : f32
    %64 = vector.broadcast %cst_30 : f32 to vector<8x256xf32>
    %65 = arith.subf %58, %64 : vector<8x256xf32>
    %66 = arith.select %60, %63, %65 : vector<8x256xi1>, vector<8x256xf32>
    %67 = arith.addf %52, %66 : vector<8x256xf32>
    %68 = arith.mulf %67, %4 : vector<8x256xf32>
    %cst_31 = arith.constant dense<0.000000e+00> : vector<8xf32>
    %69 = vector.multi_reduction <add>, %68, %cst_31 [1] : vector<8x256xf32> to vector<8xf32>
    %70 = vector.shape_cast %69 : vector<8xf32> to vector<8x1xf32>
    %c0_32 = arith.constant 0 : index
    %c0_33 = arith.constant 0 : index
    %c0_34 = arith.constant 0 : index
    %71 = vector.load %arg2[%c0_32, %c0_33, %c0_34] : memref<16x8x256xf32, #tpu.memory_space<vmem>>, vector<1x8x256xf32>
    %72 = vector.shape_cast %71 : vector<1x8x256xf32> to vector<8x256xf32>
    %c1_35 = arith.constant 1 : index
    %c0_36 = arith.constant 0 : index
    %c0_37 = arith.constant 0 : index
    %73 = vector.load %arg2[%c1_35, %c0_36, %c0_37] : memref<16x8x256xf32, #tpu.memory_space<vmem>>, vector<1x8x256xf32>
    %74 = vector.shape_cast %73 : vector<1x8x256xf32> to vector<8x256xf32>
    %75 = arith.maximumf %72, %74 : vector<8x256xf32>
    %c2_38 = arith.constant 2 : index
    %c0_39 = arith.constant 0 : index
    %c0_40 = arith.constant 0 : index
    %76 = vector.load %arg2[%c2_38, %c0_39, %c0_40] : memref<16x8x256xf32, #tpu.memory_space<vmem>>, vector<1x8x256xf32>
    %77 = vector.shape_cast %76 : vector<1x8x256xf32> to vector<8x256xf32>
    %78 = arith.maximumf %75, %77 : vector<8x256xf32>
    %c3_41 = arith.constant 3 : index
    %c0_42 = arith.constant 0 : index
    %c0_43 = arith.constant 0 : index
    %79 = vector.load %arg2[%c3_41, %c0_42, %c0_43] : memref<16x8x256xf32, #tpu.memory_space<vmem>>, vector<1x8x256xf32>
    %80 = vector.shape_cast %79 : vector<1x8x256xf32> to vector<8x256xf32>
    %81 = arith.maximumf %78, %80 : vector<8x256xf32>
    %c4_44 = arith.constant 4 : index
    %c0_45 = arith.constant 0 : index
    %c0_46 = arith.constant 0 : index
    %82 = vector.load %arg2[%c4_44, %c0_45, %c0_46] : memref<16x8x256xf32, #tpu.memory_space<vmem>>, vector<1x8x256xf32>
    %83 = vector.shape_cast %82 : vector<1x8x256xf32> to vector<8x256xf32>
    %84 = arith.maximumf %81, %83 : vector<8x256xf32>
    %c5_47 = arith.constant 5 : index
    %c0_48 = arith.constant 0 : index
    %c0_49 = arith.constant 0 : index
    %85 = vector.load %arg2[%c5_47, %c0_48, %c0_49] : memref<16x8x256xf32, #tpu.memory_space<vmem>>, vector<1x8x256xf32>
    %86 = vector.shape_cast %85 : vector<1x8x256xf32> to vector<8x256xf32>
    %87 = arith.maximumf %84, %86 : vector<8x256xf32>
    %c6_50 = arith.constant 6 : index
    %c0_51 = arith.constant 0 : index
    %c0_52 = arith.constant 0 : index
    %88 = vector.load %arg2[%c6_50, %c0_51, %c0_52] : memref<16x8x256xf32, #tpu.memory_space<vmem>>, vector<1x8x256xf32>
    %89 = vector.shape_cast %88 : vector<1x8x256xf32> to vector<8x256xf32>
    %90 = arith.maximumf %87, %89 : vector<8x256xf32>
    %c7_53 = arith.constant 7 : index
    %c0_54 = arith.constant 0 : index
    %c0_55 = arith.constant 0 : index
    %91 = vector.load %arg2[%c7_53, %c0_54, %c0_55] : memref<16x8x256xf32, #tpu.memory_space<vmem>>, vector<1x8x256xf32>
    %92 = vector.shape_cast %91 : vector<1x8x256xf32> to vector<8x256xf32>
    %93 = arith.maximumf %90, %92 : vector<8x256xf32>
    %c8 = arith.constant 8 : index
    %c0_56 = arith.constant 0 : index
    %c0_57 = arith.constant 0 : index
    %94 = vector.load %arg2[%c8, %c0_56, %c0_57] : memref<16x8x256xf32, #tpu.memory_space<vmem>>, vector<1x8x256xf32>
    %95 = vector.shape_cast %94 : vector<1x8x256xf32> to vector<8x256xf32>
    %96 = arith.maximumf %93, %95 : vector<8x256xf32>
    %c9 = arith.constant 9 : index
    %c0_58 = arith.constant 0 : index
    %c0_59 = arith.constant 0 : index
    %97 = vector.load %arg2[%c9, %c0_58, %c0_59] : memref<16x8x256xf32, #tpu.memory_space<vmem>>, vector<1x8x256xf32>
    %98 = vector.shape_cast %97 : vector<1x8x256xf32> to vector<8x256xf32>
    %99 = arith.maximumf %96, %98 : vector<8x256xf32>
    %c10 = arith.constant 10 : index
    %c0_60 = arith.constant 0 : index
    %c0_61 = arith.constant 0 : index
    %100 = vector.load %arg2[%c10, %c0_60, %c0_61] : memref<16x8x256xf32, #tpu.memory_space<vmem>>, vector<1x8x256xf32>
    %101 = vector.shape_cast %100 : vector<1x8x256xf32> to vector<8x256xf32>
    %102 = arith.maximumf %99, %101 : vector<8x256xf32>
    %c11 = arith.constant 11 : index
    %c0_62 = arith.constant 0 : index
    %c0_63 = arith.constant 0 : index
    %103 = vector.load %arg2[%c11, %c0_62, %c0_63] : memref<16x8x256xf32, #tpu.memory_space<vmem>>, vector<1x8x256xf32>
    %104 = vector.shape_cast %103 : vector<1x8x256xf32> to vector<8x256xf32>
    %105 = arith.maximumf %102, %104 : vector<8x256xf32>
    %c12 = arith.constant 12 : index
    %c0_64 = arith.constant 0 : index
    %c0_65 = arith.constant 0 : index
    %106 = vector.load %arg2[%c12, %c0_64, %c0_65] : memref<16x8x256xf32, #tpu.memory_space<vmem>>, vector<1x8x256xf32>
    %107 = vector.shape_cast %106 : vector<1x8x256xf32> to vector<8x256xf32>
    %108 = arith.maximumf %105, %107 : vector<8x256xf32>
    %c13 = arith.constant 13 : index
    %c0_66 = arith.constant 0 : index
    %c0_67 = arith.constant 0 : index
    %109 = vector.load %arg2[%c13, %c0_66, %c0_67] : memref<16x8x256xf32, #tpu.memory_space<vmem>>, vector<1x8x256xf32>
    %110 = vector.shape_cast %109 : vector<1x8x256xf32> to vector<8x256xf32>
    %111 = arith.maximumf %108, %110 : vector<8x256xf32>
    %c14 = arith.constant 14 : index
    %c0_68 = arith.constant 0 : index
    %c0_69 = arith.constant 0 : index
    %112 = vector.load %arg2[%c14, %c0_68, %c0_69] : memref<16x8x256xf32, #tpu.memory_space<vmem>>, vector<1x8x256xf32>
    %113 = vector.shape_cast %112 : vector<1x8x256xf32> to vector<8x256xf32>
    %114 = arith.maximumf %111, %113 : vector<8x256xf32>
    %c15 = arith.constant 15 : index
    %c0_70 = arith.constant 0 : index
    %c0_71 = arith.constant 0 : index
    %115 = vector.load %arg2[%c15, %c0_70, %c0_71] : memref<16x8x256xf32, #tpu.memory_space<vmem>>, vector<1x8x256xf32>
    %116 = vector.shape_cast %115 : vector<1x8x256xf32> to vector<8x256xf32>
    %117 = arith.maximumf %114, %116 : vector<8x256xf32>
    %cst_72 = arith.constant 0.000000e+00 : f32
    %118 = vector.broadcast %cst_72 : f32 to vector<8x256xf32>
    %cst_73 = arith.constant 0.000000e+00 : f32
    %119 = vector.broadcast %cst_73 : f32 to vector<8x256xf32>
    %c0_74 = arith.constant 0 : index
    %c0_75 = arith.constant 0 : index
    %c0_76 = arith.constant 0 : index
    %120 = vector.load %arg2[%c0_74, %c0_75, %c0_76] : memref<16x8x256xf32, #tpu.memory_space<vmem>>, vector<1x8x256xf32>
    %121 = vector.shape_cast %120 : vector<1x8x256xf32> to vector<8x256xf32>
    %122 = arith.subf %121, %117 : vector<8x256xf32>
    %123 = math.exp %122 : vector<8x256xf32>
    %124 = arith.addf %118, %123 : vector<8x256xf32>
    %c0_i32_77 = arith.constant 0 : i32
    %125 = vector.broadcast %c0_i32_77 : i32 to vector<8x256xi32>
    %126 = arith.cmpi eq, %0, %125 : vector<8x256xi32>
    %cst_78 = arith.constant 0.000000e+00 : f32
    %127 = vector.broadcast %cst_78 : f32 to vector<8x256xf32>
    %128 = arith.select %126, %121, %127 : vector<8x256xi1>, vector<8x256xf32>
    %129 = arith.addf %119, %128 : vector<8x256xf32>
    %c1_79 = arith.constant 1 : index
    %c0_80 = arith.constant 0 : index
    %c0_81 = arith.constant 0 : index
    %130 = vector.load %arg2[%c1_79, %c0_80, %c0_81] : memref<16x8x256xf32, #tpu.memory_space<vmem>>, vector<1x8x256xf32>
    %131 = vector.shape_cast %130 : vector<1x8x256xf32> to vector<8x256xf32>
    %132 = arith.subf %131, %117 : vector<8x256xf32>
    %133 = math.exp %132 : vector<8x256xf32>
    %134 = arith.addf %124, %133 : vector<8x256xf32>
    %c1_i32 = arith.constant 1 : i32
    %135 = vector.broadcast %c1_i32 : i32 to vector<8x256xi32>
    %136 = arith.cmpi eq, %0, %135 : vector<8x256xi32>
    %cst_82 = arith.constant 0.000000e+00 : f32
    %137 = vector.broadcast %cst_82 : f32 to vector<8x256xf32>
    %138 = arith.select %136, %131, %137 : vector<8x256xi1>, vector<8x256xf32>
    %139 = arith.addf %129, %138 : vector<8x256xf32>
    %c2_83 = arith.constant 2 : index
    %c0_84 = arith.constant 0 : index
    %c0_85 = arith.constant 0 : index
    %140 = vector.load %arg2[%c2_83, %c0_84, %c0_85] : memref<16x8x256xf32, #tpu.memory_space<vmem>>, vector<1x8x256xf32>
    %141 = vector.shape_cast %140 : vector<1x8x256xf32> to vector<8x256xf32>
    %142 = arith.subf %141, %117 : vector<8x256xf32>
    %143 = math.exp %142 : vector<8x256xf32>
    %144 = arith.addf %134, %143 : vector<8x256xf32>
    %c2_i32 = arith.constant 2 : i32
    %145 = vector.broadcast %c2_i32 : i32 to vector<8x256xi32>
    %146 = arith.cmpi eq, %0, %145 : vector<8x256xi32>
    %cst_86 = arith.constant 0.000000e+00 : f32
    %147 = vector.broadcast %cst_86 : f32 to vector<8x256xf32>
    %148 = arith.select %146, %141, %147 : vector<8x256xi1>, vector<8x256xf32>
    %149 = arith.addf %139, %148 : vector<8x256xf32>
    %c3_87 = arith.constant 3 : index
    %c0_88 = arith.constant 0 : index
    %c0_89 = arith.constant 0 : index
    %150 = vector.load %arg2[%c3_87, %c0_88, %c0_89] : memref<16x8x256xf32, #tpu.memory_space<vmem>>, vector<1x8x256xf32>
    %151 = vector.shape_cast %150 : vector<1x8x256xf32> to vector<8x256xf32>
    %152 = arith.subf %151, %117 : vector<8x256xf32>
    %153 = math.exp %152 : vector<8x256xf32>
    %154 = arith.addf %144, %153 : vector<8x256xf32>
    %c3_i32 = arith.constant 3 : i32
    %155 = vector.broadcast %c3_i32 : i32 to vector<8x256xi32>
    %156 = arith.cmpi eq, %0, %155 : vector<8x256xi32>
    %cst_90 = arith.constant 0.000000e+00 : f32
    %157 = vector.broadcast %cst_90 : f32 to vector<8x256xf32>
    %158 = arith.select %156, %151, %157 : vector<8x256xi1>, vector<8x256xf32>
    %159 = arith.addf %149, %158 : vector<8x256xf32>
    %c4_91 = arith.constant 4 : index
    %c0_92 = arith.constant 0 : index
    %c0_93 = arith.constant 0 : index
    %160 = vector.load %arg2[%c4_91, %c0_92, %c0_93] : memref<16x8x256xf32, #tpu.memory_space<vmem>>, vector<1x8x256xf32>
    %161 = vector.shape_cast %160 : vector<1x8x256xf32> to vector<8x256xf32>
    %162 = arith.subf %161, %117 : vector<8x256xf32>
    %163 = math.exp %162 : vector<8x256xf32>
    %164 = arith.addf %154, %163 : vector<8x256xf32>
    %c4_i32 = arith.constant 4 : i32
    %165 = vector.broadcast %c4_i32 : i32 to vector<8x256xi32>
    %166 = arith.cmpi eq, %0, %165 : vector<8x256xi32>
    %cst_94 = arith.constant 0.000000e+00 : f32
    %167 = vector.broadcast %cst_94 : f32 to vector<8x256xf32>
    %168 = arith.select %166, %161, %167 : vector<8x256xi1>, vector<8x256xf32>
    %169 = arith.addf %159, %168 : vector<8x256xf32>
    %c5_95 = arith.constant 5 : index
    %c0_96 = arith.constant 0 : index
    %c0_97 = arith.constant 0 : index
    %170 = vector.load %arg2[%c5_95, %c0_96, %c0_97] : memref<16x8x256xf32, #tpu.memory_space<vmem>>, vector<1x8x256xf32>
    %171 = vector.shape_cast %170 : vector<1x8x256xf32> to vector<8x256xf32>
    %172 = arith.subf %171, %117 : vector<8x256xf32>
    %173 = math.exp %172 : vector<8x256xf32>
    %174 = arith.addf %164, %173 : vector<8x256xf32>
    %c5_i32 = arith.constant 5 : i32
    %175 = vector.broadcast %c5_i32 : i32 to vector<8x256xi32>
    %176 = arith.cmpi eq, %0, %175 : vector<8x256xi32>
    %cst_98 = arith.constant 0.000000e+00 : f32
    %177 = vector.broadcast %cst_98 : f32 to vector<8x256xf32>
    %178 = arith.select %176, %171, %177 : vector<8x256xi1>, vector<8x256xf32>
    %179 = arith.addf %169, %178 : vector<8x256xf32>
    %c6_99 = arith.constant 6 : index
    %c0_100 = arith.constant 0 : index
    %c0_101 = arith.constant 0 : index
    %180 = vector.load %arg2[%c6_99, %c0_100, %c0_101] : memref<16x8x256xf32, #tpu.memory_space<vmem>>, vector<1x8x256xf32>
    %181 = vector.shape_cast %180 : vector<1x8x256xf32> to vector<8x256xf32>
    %182 = arith.subf %181, %117 : vector<8x256xf32>
    %183 = math.exp %182 : vector<8x256xf32>
    %184 = arith.addf %174, %183 : vector<8x256xf32>
    %c6_i32 = arith.constant 6 : i32
    %185 = vector.broadcast %c6_i32 : i32 to vector<8x256xi32>
    %186 = arith.cmpi eq, %0, %185 : vector<8x256xi32>
    %cst_102 = arith.constant 0.000000e+00 : f32
    %187 = vector.broadcast %cst_102 : f32 to vector<8x256xf32>
    %188 = arith.select %186, %181, %187 : vector<8x256xi1>, vector<8x256xf32>
    %189 = arith.addf %179, %188 : vector<8x256xf32>
    %c7_103 = arith.constant 7 : index
    %c0_104 = arith.constant 0 : index
    %c0_105 = arith.constant 0 : index
    %190 = vector.load %arg2[%c7_103, %c0_104, %c0_105] : memref<16x8x256xf32, #tpu.memory_space<vmem>>, vector<1x8x256xf32>
    %191 = vector.shape_cast %190 : vector<1x8x256xf32> to vector<8x256xf32>
    %192 = arith.subf %191, %117 : vector<8x256xf32>
    %193 = math.exp %192 : vector<8x256xf32>
    %194 = arith.addf %184, %193 : vector<8x256xf32>
    %c7_i32 = arith.constant 7 : i32
    %195 = vector.broadcast %c7_i32 : i32 to vector<8x256xi32>
    %196 = arith.cmpi eq, %0, %195 : vector<8x256xi32>
    %cst_106 = arith.constant 0.000000e+00 : f32
    %197 = vector.broadcast %cst_106 : f32 to vector<8x256xf32>
    %198 = arith.select %196, %191, %197 : vector<8x256xi1>, vector<8x256xf32>
    %199 = arith.addf %189, %198 : vector<8x256xf32>
    %c8_107 = arith.constant 8 : index
    %c0_108 = arith.constant 0 : index
    %c0_109 = arith.constant 0 : index
    %200 = vector.load %arg2[%c8_107, %c0_108, %c0_109] : memref<16x8x256xf32, #tpu.memory_space<vmem>>, vector<1x8x256xf32>
    %201 = vector.shape_cast %200 : vector<1x8x256xf32> to vector<8x256xf32>
    %202 = arith.subf %201, %117 : vector<8x256xf32>
    %203 = math.exp %202 : vector<8x256xf32>
    %204 = arith.addf %194, %203 : vector<8x256xf32>
    %c8_i32 = arith.constant 8 : i32
    %205 = vector.broadcast %c8_i32 : i32 to vector<8x256xi32>
    %206 = arith.cmpi eq, %0, %205 : vector<8x256xi32>
    %cst_110 = arith.constant 0.000000e+00 : f32
    %207 = vector.broadcast %cst_110 : f32 to vector<8x256xf32>
    %208 = arith.select %206, %201, %207 : vector<8x256xi1>, vector<8x256xf32>
    %209 = arith.addf %199, %208 : vector<8x256xf32>
    %c9_111 = arith.constant 9 : index
    %c0_112 = arith.constant 0 : index
    %c0_113 = arith.constant 0 : index
    %210 = vector.load %arg2[%c9_111, %c0_112, %c0_113] : memref<16x8x256xf32, #tpu.memory_space<vmem>>, vector<1x8x256xf32>
    %211 = vector.shape_cast %210 : vector<1x8x256xf32> to vector<8x256xf32>
    %212 = arith.subf %211, %117 : vector<8x256xf32>
    %213 = math.exp %212 : vector<8x256xf32>
    %214 = arith.addf %204, %213 : vector<8x256xf32>
    %c9_i32 = arith.constant 9 : i32
    %215 = vector.broadcast %c9_i32 : i32 to vector<8x256xi32>
    %216 = arith.cmpi eq, %0, %215 : vector<8x256xi32>
    %cst_114 = arith.constant 0.000000e+00 : f32
    %217 = vector.broadcast %cst_114 : f32 to vector<8x256xf32>
    %218 = arith.select %216, %211, %217 : vector<8x256xi1>, vector<8x256xf32>
    %219 = arith.addf %209, %218 : vector<8x256xf32>
    %c10_115 = arith.constant 10 : index
    %c0_116 = arith.constant 0 : index
    %c0_117 = arith.constant 0 : index
    %220 = vector.load %arg2[%c10_115, %c0_116, %c0_117] : memref<16x8x256xf32, #tpu.memory_space<vmem>>, vector<1x8x256xf32>
    %221 = vector.shape_cast %220 : vector<1x8x256xf32> to vector<8x256xf32>
    %222 = arith.subf %221, %117 : vector<8x256xf32>
    %223 = math.exp %222 : vector<8x256xf32>
    %224 = arith.addf %214, %223 : vector<8x256xf32>
    %c10_i32 = arith.constant 10 : i32
    %225 = vector.broadcast %c10_i32 : i32 to vector<8x256xi32>
    %226 = arith.cmpi eq, %0, %225 : vector<8x256xi32>
    %cst_118 = arith.constant 0.000000e+00 : f32
    %227 = vector.broadcast %cst_118 : f32 to vector<8x256xf32>
    %228 = arith.select %226, %221, %227 : vector<8x256xi1>, vector<8x256xf32>
    %229 = arith.addf %219, %228 : vector<8x256xf32>
    %c11_119 = arith.constant 11 : index
    %c0_120 = arith.constant 0 : index
    %c0_121 = arith.constant 0 : index
    %230 = vector.load %arg2[%c11_119, %c0_120, %c0_121] : memref<16x8x256xf32, #tpu.memory_space<vmem>>, vector<1x8x256xf32>
    %231 = vector.shape_cast %230 : vector<1x8x256xf32> to vector<8x256xf32>
    %232 = arith.subf %231, %117 : vector<8x256xf32>
    %233 = math.exp %232 : vector<8x256xf32>
    %234 = arith.addf %224, %233 : vector<8x256xf32>
    %c11_i32 = arith.constant 11 : i32
    %235 = vector.broadcast %c11_i32 : i32 to vector<8x256xi32>
    %236 = arith.cmpi eq, %0, %235 : vector<8x256xi32>
    %cst_122 = arith.constant 0.000000e+00 : f32
    %237 = vector.broadcast %cst_122 : f32 to vector<8x256xf32>
    %238 = arith.select %236, %231, %237 : vector<8x256xi1>, vector<8x256xf32>
    %239 = arith.addf %229, %238 : vector<8x256xf32>
    %c12_123 = arith.constant 12 : index
    %c0_124 = arith.constant 0 : index
    %c0_125 = arith.constant 0 : index
    %240 = vector.load %arg2[%c12_123, %c0_124, %c0_125] : memref<16x8x256xf32, #tpu.memory_space<vmem>>, vector<1x8x256xf32>
    %241 = vector.shape_cast %240 : vector<1x8x256xf32> to vector<8x256xf32>
    %242 = arith.subf %241, %117 : vector<8x256xf32>
    %243 = math.exp %242 : vector<8x256xf32>
    %244 = arith.addf %234, %243 : vector<8x256xf32>
    %c12_i32 = arith.constant 12 : i32
    %245 = vector.broadcast %c12_i32 : i32 to vector<8x256xi32>
    %246 = arith.cmpi eq, %0, %245 : vector<8x256xi32>
    %cst_126 = arith.constant 0.000000e+00 : f32
    %247 = vector.broadcast %cst_126 : f32 to vector<8x256xf32>
    %248 = arith.select %246, %241, %247 : vector<8x256xi1>, vector<8x256xf32>
    %249 = arith.addf %239, %248 : vector<8x256xf32>
    %c13_127 = arith.constant 13 : index
    %c0_128 = arith.constant 0 : index
    %c0_129 = arith.constant 0 : index
    %250 = vector.load %arg2[%c13_127, %c0_128, %c0_129] : memref<16x8x256xf32, #tpu.memory_space<vmem>>, vector<1x8x256xf32>
    %251 = vector.shape_cast %250 : vector<1x8x256xf32> to vector<8x256xf32>
    %252 = arith.subf %251, %117 : vector<8x256xf32>
    %253 = math.exp %252 : vector<8x256xf32>
    %254 = arith.addf %244, %253 : vector<8x256xf32>
    %c13_i32 = arith.constant 13 : i32
    %255 = vector.broadcast %c13_i32 : i32 to vector<8x256xi32>
    %256 = arith.cmpi eq, %0, %255 : vector<8x256xi32>
    %cst_130 = arith.constant 0.000000e+00 : f32
    %257 = vector.broadcast %cst_130 : f32 to vector<8x256xf32>
    %258 = arith.select %256, %251, %257 : vector<8x256xi1>, vector<8x256xf32>
    %259 = arith.addf %249, %258 : vector<8x256xf32>
    %c14_131 = arith.constant 14 : index
    %c0_132 = arith.constant 0 : index
    %c0_133 = arith.constant 0 : index
    %260 = vector.load %arg2[%c14_131, %c0_132, %c0_133] : memref<16x8x256xf32, #tpu.memory_space<vmem>>, vector<1x8x256xf32>
    %261 = vector.shape_cast %260 : vector<1x8x256xf32> to vector<8x256xf32>
    %262 = arith.subf %261, %117 : vector<8x256xf32>
    %263 = math.exp %262 : vector<8x256xf32>
    %264 = arith.addf %254, %263 : vector<8x256xf32>
    %c14_i32 = arith.constant 14 : i32
    %265 = vector.broadcast %c14_i32 : i32 to vector<8x256xi32>
    %266 = arith.cmpi eq, %0, %265 : vector<8x256xi32>
    %cst_134 = arith.constant 0.000000e+00 : f32
    %267 = vector.broadcast %cst_134 : f32 to vector<8x256xf32>
    %268 = arith.select %266, %261, %267 : vector<8x256xi1>, vector<8x256xf32>
    %269 = arith.addf %259, %268 : vector<8x256xf32>
    %c15_135 = arith.constant 15 : index
    %c0_136 = arith.constant 0 : index
    %c0_137 = arith.constant 0 : index
    %270 = vector.load %arg2[%c15_135, %c0_136, %c0_137] : memref<16x8x256xf32, #tpu.memory_space<vmem>>, vector<1x8x256xf32>
    %271 = vector.shape_cast %270 : vector<1x8x256xf32> to vector<8x256xf32>
    %272 = arith.subf %271, %117 : vector<8x256xf32>
    %273 = math.exp %272 : vector<8x256xf32>
    %274 = arith.addf %264, %273 : vector<8x256xf32>
    %c15_i32 = arith.constant 15 : i32
    %275 = vector.broadcast %c15_i32 : i32 to vector<8x256xi32>
    %276 = arith.cmpi eq, %0, %275 : vector<8x256xi32>
    %cst_138 = arith.constant 0.000000e+00 : f32
    %277 = vector.broadcast %cst_138 : f32 to vector<8x256xf32>
    %278 = arith.select %276, %271, %277 : vector<8x256xi1>, vector<8x256xf32>
    %279 = arith.addf %269, %278 : vector<8x256xf32>
    %280 = math.log %274 : vector<8x256xf32>
    %281 = arith.addf %280, %117 : vector<8x256xf32>
    %282 = arith.subf %281, %279 : vector<8x256xf32>
    %cst_139 = arith.constant 0.000000e+00 : f32
    %283 = vector.broadcast %cst_139 : f32 to vector<8x256xf32>
    %284 = arith.maximumf %282, %283 : vector<8x256xf32>
    %cst_140 = arith.constant 0.000000e+00 : f32
    %285 = vector.broadcast %cst_140 : f32 to vector<8x256xf32>
    %286 = arith.select %2, %285, %284 : vector<8x256xi1>, vector<8x256xf32>
    %cst_141 = arith.constant 3.000000e+00 : f32
    %287 = vector.broadcast %cst_141 : f32 to vector<8x1xf32>
    %288 = arith.mulf %287, %6 : vector<8x1xf32>
    %cst_142 = arith.constant 2.550000e+02 : f32
    %289 = vector.broadcast %cst_142 : f32 to vector<8x1xf32>
    %290 = arith.minimumf %288, %289 : vector<8x1xf32>
    %291 = tpu.bitcast %286 : vector<8x256xf32> -> vector<8x256xi32>
    %cst_143 = arith.constant 1.000000e+00 : f32
    %292 = vector.broadcast %cst_143 : f32 to vector<8x256xf32>
    %c0_i32_144 = arith.constant 0 : i32
    %293 = vector.broadcast %c0_i32_144 : i32 to vector<8x1xi32>
    %c536870912_i32 = arith.constant 536870912 : i32
    %294 = vector.broadcast %c536870912_i32 : i32 to vector<8x1xi32>
    %295 = arith.ori %293, %294 : vector<8x1xi32>
    %c1073741824_i32 = arith.constant 1073741824 : i32
    %296 = vector.broadcast %c1073741824_i32 : i32 to vector<8x1xi32>
    %297 = arith.ori %293, %296 : vector<8x1xi32>
    %c1610612736_i32 = arith.constant 1610612736 : i32
    %298 = vector.broadcast %c1610612736_i32 : i32 to vector<8x1xi32>
    %299 = arith.ori %293, %298 : vector<8x1xi32>
    %300 = vector.broadcast %295 : vector<8x1xi32> to vector<8x256xi32>
    %301 = arith.cmpi sge, %291, %300 : vector<8x256xi32>
    %302 = arith.extui %301 : vector<8x256xi1> to vector<8x256xi32>
    %303 = arith.sitofp %302 : vector<8x256xi32> to vector<8x256xf32>
    %cst_145 = arith.constant dense<0.000000e+00> : vector<8x8xf32>
    %304 = tpu.matmul %303, %292, %cst_145 {dimension_numbers = #tpu.dot_dimension_numbers<[1], [1], [0], [0], [0, 0, 1, 0], [], []>} : vector<8x256xf32>, vector<8x256xf32>, vector<8x8xf32> -> vector<8x8xf32>
    %305 = vector.extract_strided_slice %304 {offsets = [0, 0], sizes = [8, 1], strides = [1, 1]} : vector<8x8xf32> to vector<8x1xf32>
    %306 = vector.broadcast %297 : vector<8x1xi32> to vector<8x256xi32>
    %307 = arith.cmpi sge, %291, %306 : vector<8x256xi32>
    %308 = arith.extui %307 : vector<8x256xi1> to vector<8x256xi32>
    %309 = arith.sitofp %308 : vector<8x256xi32> to vector<8x256xf32>
    %cst_146 = arith.constant dense<0.000000e+00> : vector<8x8xf32>
    %310 = tpu.matmul %309, %292, %cst_146 {dimension_numbers = #tpu.dot_dimension_numbers<[1], [1], [0], [0], [0, 0, 1, 0], [], []>} : vector<8x256xf32>, vector<8x256xf32>, vector<8x8xf32> -> vector<8x8xf32>
    %311 = vector.extract_strided_slice %310 {offsets = [0, 0], sizes = [8, 1], strides = [1, 1]} : vector<8x8xf32> to vector<8x1xf32>
    %312 = vector.broadcast %299 : vector<8x1xi32> to vector<8x256xi32>
    %313 = arith.cmpi sge, %291, %312 : vector<8x256xi32>
    %314 = arith.extui %313 : vector<8x256xi1> to vector<8x256xi32>
    %315 = arith.sitofp %314 : vector<8x256xi32> to vector<8x256xf32>
    %cst_147 = arith.constant dense<0.000000e+00> : vector<8x8xf32>
    %316 = tpu.matmul %315, %292, %cst_147 {dimension_numbers = #tpu.dot_dimension_numbers<[1], [1], [0], [0], [0, 0, 1, 0], [], []>} : vector<8x256xf32>, vector<8x256xf32>, vector<8x8xf32> -> vector<8x8xf32>
    %317 = vector.extract_strided_slice %316 {offsets = [0, 0], sizes = [8, 1], strides = [1, 1]} : vector<8x8xf32> to vector<8x1xf32>
    %318 = arith.cmpf oge, %317, %290 : vector<8x1xf32>
    %319 = arith.cmpf oge, %311, %290 : vector<8x1xf32>
    %320 = arith.cmpf oge, %305, %290 : vector<8x1xf32>
    %321 = arith.select %320, %295, %293 : vector<8x1xi1>, vector<8x1xi32>
    %322 = arith.select %319, %297, %321 : vector<8x1xi1>, vector<8x1xi32>
    %323 = arith.select %318, %299, %322 : vector<8x1xi1>, vector<8x1xi32>
    %c134217728_i32 = arith.constant 134217728 : i32
    %324 = vector.broadcast %c134217728_i32 : i32 to vector<8x1xi32>
    %325 = arith.ori %323, %324 : vector<8x1xi32>
    %c268435456_i32 = arith.constant 268435456 : i32
    %326 = vector.broadcast %c268435456_i32 : i32 to vector<8x1xi32>
    %327 = arith.ori %323, %326 : vector<8x1xi32>
    %c402653184_i32 = arith.constant 402653184 : i32
    %328 = vector.broadcast %c402653184_i32 : i32 to vector<8x1xi32>
    %329 = arith.ori %323, %328 : vector<8x1xi32>
    %330 = vector.broadcast %325 : vector<8x1xi32> to vector<8x256xi32>
    %331 = arith.cmpi sge, %291, %330 : vector<8x256xi32>
    %332 = arith.extui %331 : vector<8x256xi1> to vector<8x256xi32>
    %333 = arith.sitofp %332 : vector<8x256xi32> to vector<8x256xf32>
    %cst_148 = arith.constant dense<0.000000e+00> : vector<8x8xf32>
    %334 = tpu.matmul %333, %292, %cst_148 {dimension_numbers = #tpu.dot_dimension_numbers<[1], [1], [0], [0], [0, 0, 1, 0], [], []>} : vector<8x256xf32>, vector<8x256xf32>, vector<8x8xf32> -> vector<8x8xf32>
    %335 = vector.extract_strided_slice %334 {offsets = [0, 0], sizes = [8, 1], strides = [1, 1]} : vector<8x8xf32> to vector<8x1xf32>
    %336 = vector.broadcast %327 : vector<8x1xi32> to vector<8x256xi32>
    %337 = arith.cmpi sge, %291, %336 : vector<8x256xi32>
    %338 = arith.extui %337 : vector<8x256xi1> to vector<8x256xi32>
    %339 = arith.sitofp %338 : vector<8x256xi32> to vector<8x256xf32>
    %cst_149 = arith.constant dense<0.000000e+00> : vector<8x8xf32>
    %340 = tpu.matmul %339, %292, %cst_149 {dimension_numbers = #tpu.dot_dimension_numbers<[1], [1], [0], [0], [0, 0, 1, 0], [], []>} : vector<8x256xf32>, vector<8x256xf32>, vector<8x8xf32> -> vector<8x8xf32>
    %341 = vector.extract_strided_slice %340 {offsets = [0, 0], sizes = [8, 1], strides = [1, 1]} : vector<8x8xf32> to vector<8x1xf32>
    %342 = vector.broadcast %329 : vector<8x1xi32> to vector<8x256xi32>
    %343 = arith.cmpi sge, %291, %342 : vector<8x256xi32>
    %344 = arith.extui %343 : vector<8x256xi1> to vector<8x256xi32>
    %345 = arith.sitofp %344 : vector<8x256xi32> to vector<8x256xf32>
    %cst_150 = arith.constant dense<0.000000e+00> : vector<8x8xf32>
    %346 = tpu.matmul %345, %292, %cst_150 {dimension_numbers = #tpu.dot_dimension_numbers<[1], [1], [0], [0], [0, 0, 1, 0], [], []>} : vector<8x256xf32>, vector<8x256xf32>, vector<8x8xf32> -> vector<8x8xf32>
    %347 = vector.extract_strided_slice %346 {offsets = [0, 0], sizes = [8, 1], strides = [1, 1]} : vector<8x8xf32> to vector<8x1xf32>
    %348 = arith.cmpf oge, %347, %290 : vector<8x1xf32>
    %349 = arith.cmpf oge, %341, %290 : vector<8x1xf32>
    %350 = arith.cmpf oge, %335, %290 : vector<8x1xf32>
    %351 = arith.select %350, %325, %323 : vector<8x1xi1>, vector<8x1xi32>
    %352 = arith.select %349, %327, %351 : vector<8x1xi1>, vector<8x1xi32>
    %353 = arith.select %348, %329, %352 : vector<8x1xi1>, vector<8x1xi32>
    %c33554432_i32 = arith.constant 33554432 : i32
    %354 = vector.broadcast %c33554432_i32 : i32 to vector<8x1xi32>
    %355 = arith.ori %353, %354 : vector<8x1xi32>
    %c67108864_i32 = arith.constant 67108864 : i32
    %356 = vector.broadcast %c67108864_i32 : i32 to vector<8x1xi32>
    %357 = arith.ori %353, %356 : vector<8x1xi32>
    %c100663296_i32 = arith.constant 100663296 : i32
    %358 = vector.broadcast %c100663296_i32 : i32 to vector<8x1xi32>
    %359 = arith.ori %353, %358 : vector<8x1xi32>
    %360 = vector.broadcast %355 : vector<8x1xi32> to vector<8x256xi32>
    %361 = arith.cmpi sge, %291, %360 : vector<8x256xi32>
    %362 = arith.extui %361 : vector<8x256xi1> to vector<8x256xi32>
    %363 = arith.sitofp %362 : vector<8x256xi32> to vector<8x256xf32>
    %cst_151 = arith.constant dense<0.000000e+00> : vector<8x8xf32>
    %364 = tpu.matmul %363, %292, %cst_151 {dimension_numbers = #tpu.dot_dimension_numbers<[1], [1], [0], [0], [0, 0, 1, 0], [], []>} : vector<8x256xf32>, vector<8x256xf32>, vector<8x8xf32> -> vector<8x8xf32>
    %365 = vector.extract_strided_slice %364 {offsets = [0, 0], sizes = [8, 1], strides = [1, 1]} : vector<8x8xf32> to vector<8x1xf32>
    %366 = vector.broadcast %357 : vector<8x1xi32> to vector<8x256xi32>
    %367 = arith.cmpi sge, %291, %366 : vector<8x256xi32>
    %368 = arith.extui %367 : vector<8x256xi1> to vector<8x256xi32>
    %369 = arith.sitofp %368 : vector<8x256xi32> to vector<8x256xf32>
    %cst_152 = arith.constant dense<0.000000e+00> : vector<8x8xf32>
    %370 = tpu.matmul %369, %292, %cst_152 {dimension_numbers = #tpu.dot_dimension_numbers<[1], [1], [0], [0], [0, 0, 1, 0], [], []>} : vector<8x256xf32>, vector<8x256xf32>, vector<8x8xf32> -> vector<8x8xf32>
    %371 = vector.extract_strided_slice %370 {offsets = [0, 0], sizes = [8, 1], strides = [1, 1]} : vector<8x8xf32> to vector<8x1xf32>
    %372 = vector.broadcast %359 : vector<8x1xi32> to vector<8x256xi32>
    %373 = arith.cmpi sge, %291, %372 : vector<8x256xi32>
    %374 = arith.extui %373 : vector<8x256xi1> to vector<8x256xi32>
    %375 = arith.sitofp %374 : vector<8x256xi32> to vector<8x256xf32>
    %cst_153 = arith.constant dense<0.000000e+00> : vector<8x8xf32>
    %376 = tpu.matmul %375, %292, %cst_153 {dimension_numbers = #tpu.dot_dimension_numbers<[1], [1], [0], [0], [0, 0, 1, 0], [], []>} : vector<8x256xf32>, vector<8x256xf32>, vector<8x8xf32> -> vector<8x8xf32>
    %377 = vector.extract_strided_slice %376 {offsets = [0, 0], sizes = [8, 1], strides = [1, 1]} : vector<8x8xf32> to vector<8x1xf32>
    %378 = arith.cmpf oge, %377, %290 : vector<8x1xf32>
    %379 = arith.cmpf oge, %371, %290 : vector<8x1xf32>
    %380 = arith.cmpf oge, %365, %290 : vector<8x1xf32>
    %381 = arith.select %380, %355, %353 : vector<8x1xi1>, vector<8x1xi32>
    %382 = arith.select %379, %357, %381 : vector<8x1xi1>, vector<8x1xi32>
    %383 = arith.select %378, %359, %382 : vector<8x1xi1>, vector<8x1xi32>
    %c8388608_i32 = arith.constant 8388608 : i32
    %384 = vector.broadcast %c8388608_i32 : i32 to vector<8x1xi32>
    %385 = arith.ori %383, %384 : vector<8x1xi32>
    %c16777216_i32 = arith.constant 16777216 : i32
    %386 = vector.broadcast %c16777216_i32 : i32 to vector<8x1xi32>
    %387 = arith.ori %383, %386 : vector<8x1xi32>
    %c25165824_i32 = arith.constant 25165824 : i32
    %388 = vector.broadcast %c25165824_i32 : i32 to vector<8x1xi32>
    %389 = arith.ori %383, %388 : vector<8x1xi32>
    %390 = vector.broadcast %385 : vector<8x1xi32> to vector<8x256xi32>
    %391 = arith.cmpi sge, %291, %390 : vector<8x256xi32>
    %392 = arith.extui %391 : vector<8x256xi1> to vector<8x256xi32>
    %393 = arith.sitofp %392 : vector<8x256xi32> to vector<8x256xf32>
    %cst_154 = arith.constant dense<0.000000e+00> : vector<8x8xf32>
    %394 = tpu.matmul %393, %292, %cst_154 {dimension_numbers = #tpu.dot_dimension_numbers<[1], [1], [0], [0], [0, 0, 1, 0], [], []>} : vector<8x256xf32>, vector<8x256xf32>, vector<8x8xf32> -> vector<8x8xf32>
    %395 = vector.extract_strided_slice %394 {offsets = [0, 0], sizes = [8, 1], strides = [1, 1]} : vector<8x8xf32> to vector<8x1xf32>
    %396 = vector.broadcast %387 : vector<8x1xi32> to vector<8x256xi32>
    %397 = arith.cmpi sge, %291, %396 : vector<8x256xi32>
    %398 = arith.extui %397 : vector<8x256xi1> to vector<8x256xi32>
    %399 = arith.sitofp %398 : vector<8x256xi32> to vector<8x256xf32>
    %cst_155 = arith.constant dense<0.000000e+00> : vector<8x8xf32>
    %400 = tpu.matmul %399, %292, %cst_155 {dimension_numbers = #tpu.dot_dimension_numbers<[1], [1], [0], [0], [0, 0, 1, 0], [], []>} : vector<8x256xf32>, vector<8x256xf32>, vector<8x8xf32> -> vector<8x8xf32>
    %401 = vector.extract_strided_slice %400 {offsets = [0, 0], sizes = [8, 1], strides = [1, 1]} : vector<8x8xf32> to vector<8x1xf32>
    %402 = vector.broadcast %389 : vector<8x1xi32> to vector<8x256xi32>
    %403 = arith.cmpi sge, %291, %402 : vector<8x256xi32>
    %404 = arith.extui %403 : vector<8x256xi1> to vector<8x256xi32>
    %405 = arith.sitofp %404 : vector<8x256xi32> to vector<8x256xf32>
    %cst_156 = arith.constant dense<0.000000e+00> : vector<8x8xf32>
    %406 = tpu.matmul %405, %292, %cst_156 {dimension_numbers = #tpu.dot_dimension_numbers<[1], [1], [0], [0], [0, 0, 1, 0], [], []>} : vector<8x256xf32>, vector<8x256xf32>, vector<8x8xf32> -> vector<8x8xf32>
    %407 = vector.extract_strided_slice %406 {offsets = [0, 0], sizes = [8, 1], strides = [1, 1]} : vector<8x8xf32> to vector<8x1xf32>
    %408 = arith.cmpf oge, %407, %290 : vector<8x1xf32>
    %409 = arith.cmpf oge, %401, %290 : vector<8x1xf32>
    %410 = arith.cmpf oge, %395, %290 : vector<8x1xf32>
    %411 = arith.select %410, %385, %383 : vector<8x1xi1>, vector<8x1xi32>
    %412 = arith.select %409, %387, %411 : vector<8x1xi1>, vector<8x1xi32>
    %413 = arith.select %408, %389, %412 : vector<8x1xi1>, vector<8x1xi32>
    %c2097152_i32 = arith.constant 2097152 : i32
    %414 = vector.broadcast %c2097152_i32 : i32 to vector<8x1xi32>
    %415 = arith.ori %413, %414 : vector<8x1xi32>
    %c4194304_i32 = arith.constant 4194304 : i32
    %416 = vector.broadcast %c4194304_i32 : i32 to vector<8x1xi32>
    %417 = arith.ori %413, %416 : vector<8x1xi32>
    %c6291456_i32 = arith.constant 6291456 : i32
    %418 = vector.broadcast %c6291456_i32 : i32 to vector<8x1xi32>
    %419 = arith.ori %413, %418 : vector<8x1xi32>
    %420 = vector.broadcast %415 : vector<8x1xi32> to vector<8x256xi32>
    %421 = arith.cmpi sge, %291, %420 : vector<8x256xi32>
    %422 = arith.extui %421 : vector<8x256xi1> to vector<8x256xi32>
    %423 = arith.sitofp %422 : vector<8x256xi32> to vector<8x256xf32>
    %cst_157 = arith.constant dense<0.000000e+00> : vector<8x8xf32>
    %424 = tpu.matmul %423, %292, %cst_157 {dimension_numbers = #tpu.dot_dimension_numbers<[1], [1], [0], [0], [0, 0, 1, 0], [], []>} : vector<8x256xf32>, vector<8x256xf32>, vector<8x8xf32> -> vector<8x8xf32>
    %425 = vector.extract_strided_slice %424 {offsets = [0, 0], sizes = [8, 1], strides = [1, 1]} : vector<8x8xf32> to vector<8x1xf32>
    %426 = vector.broadcast %417 : vector<8x1xi32> to vector<8x256xi32>
    %427 = arith.cmpi sge, %291, %426 : vector<8x256xi32>
    %428 = arith.extui %427 : vector<8x256xi1> to vector<8x256xi32>
    %429 = arith.sitofp %428 : vector<8x256xi32> to vector<8x256xf32>
    %cst_158 = arith.constant dense<0.000000e+00> : vector<8x8xf32>
    %430 = tpu.matmul %429, %292, %cst_158 {dimension_numbers = #tpu.dot_dimension_numbers<[1], [1], [0], [0], [0, 0, 1, 0], [], []>} : vector<8x256xf32>, vector<8x256xf32>, vector<8x8xf32> -> vector<8x8xf32>
    %431 = vector.extract_strided_slice %430 {offsets = [0, 0], sizes = [8, 1], strides = [1, 1]} : vector<8x8xf32> to vector<8x1xf32>
    %432 = vector.broadcast %419 : vector<8x1xi32> to vector<8x256xi32>
    %433 = arith.cmpi sge, %291, %432 : vector<8x256xi32>
    %434 = arith.extui %433 : vector<8x256xi1> to vector<8x256xi32>
    %435 = arith.sitofp %434 : vector<8x256xi32> to vector<8x256xf32>
    %cst_159 = arith.constant dense<0.000000e+00> : vector<8x8xf32>
    %436 = tpu.matmul %435, %292, %cst_159 {dimension_numbers = #tpu.dot_dimension_numbers<[1], [1], [0], [0], [0, 0, 1, 0], [], []>} : vector<8x256xf32>, vector<8x256xf32>, vector<8x8xf32> -> vector<8x8xf32>
    %437 = vector.extract_strided_slice %436 {offsets = [0, 0], sizes = [8, 1], strides = [1, 1]} : vector<8x8xf32> to vector<8x1xf32>
    %438 = arith.cmpf oge, %437, %290 : vector<8x1xf32>
    %439 = arith.cmpf oge, %431, %290 : vector<8x1xf32>
    %440 = arith.cmpf oge, %425, %290 : vector<8x1xf32>
    %441 = arith.select %440, %415, %413 : vector<8x1xi1>, vector<8x1xi32>
    %442 = arith.select %439, %417, %441 : vector<8x1xi1>, vector<8x1xi32>
    %443 = arith.select %438, %419, %442 : vector<8x1xi1>, vector<8x1xi32>
    %c524288_i32 = arith.constant 524288 : i32
    %444 = vector.broadcast %c524288_i32 : i32 to vector<8x1xi32>
    %445 = arith.ori %443, %444 : vector<8x1xi32>
    %c1048576_i32 = arith.constant 1048576 : i32
    %446 = vector.broadcast %c1048576_i32 : i32 to vector<8x1xi32>
    %447 = arith.ori %443, %446 : vector<8x1xi32>
    %c1572864_i32 = arith.constant 1572864 : i32
    %448 = vector.broadcast %c1572864_i32 : i32 to vector<8x1xi32>
    %449 = arith.ori %443, %448 : vector<8x1xi32>
    %450 = vector.broadcast %445 : vector<8x1xi32> to vector<8x256xi32>
    %451 = arith.cmpi sge, %291, %450 : vector<8x256xi32>
    %452 = arith.extui %451 : vector<8x256xi1> to vector<8x256xi32>
    %453 = arith.sitofp %452 : vector<8x256xi32> to vector<8x256xf32>
    %cst_160 = arith.constant dense<0.000000e+00> : vector<8x8xf32>
    %454 = tpu.matmul %453, %292, %cst_160 {dimension_numbers = #tpu.dot_dimension_numbers<[1], [1], [0], [0], [0, 0, 1, 0], [], []>} : vector<8x256xf32>, vector<8x256xf32>, vector<8x8xf32> -> vector<8x8xf32>
    %455 = vector.extract_strided_slice %454 {offsets = [0, 0], sizes = [8, 1], strides = [1, 1]} : vector<8x8xf32> to vector<8x1xf32>
    %456 = vector.broadcast %447 : vector<8x1xi32> to vector<8x256xi32>
    %457 = arith.cmpi sge, %291, %456 : vector<8x256xi32>
    %458 = arith.extui %457 : vector<8x256xi1> to vector<8x256xi32>
    %459 = arith.sitofp %458 : vector<8x256xi32> to vector<8x256xf32>
    %cst_161 = arith.constant dense<0.000000e+00> : vector<8x8xf32>
    %460 = tpu.matmul %459, %292, %cst_161 {dimension_numbers = #tpu.dot_dimension_numbers<[1], [1], [0], [0], [0, 0, 1, 0], [], []>} : vector<8x256xf32>, vector<8x256xf32>, vector<8x8xf32> -> vector<8x8xf32>
    %461 = vector.extract_strided_slice %460 {offsets = [0, 0], sizes = [8, 1], strides = [1, 1]} : vector<8x8xf32> to vector<8x1xf32>
    %462 = vector.broadcast %449 : vector<8x1xi32> to vector<8x256xi32>
    %463 = arith.cmpi sge, %291, %462 : vector<8x256xi32>
    %464 = arith.extui %463 : vector<8x256xi1> to vector<8x256xi32>
    %465 = arith.sitofp %464 : vector<8x256xi32> to vector<8x256xf32>
    %cst_162 = arith.constant dense<0.000000e+00> : vector<8x8xf32>
    %466 = tpu.matmul %465, %292, %cst_162 {dimension_numbers = #tpu.dot_dimension_numbers<[1], [1], [0], [0], [0, 0, 1, 0], [], []>} : vector<8x256xf32>, vector<8x256xf32>, vector<8x8xf32> -> vector<8x8xf32>
    %467 = vector.extract_strided_slice %466 {offsets = [0, 0], sizes = [8, 1], strides = [1, 1]} : vector<8x8xf32> to vector<8x1xf32>
    %468 = arith.cmpf oge, %467, %290 : vector<8x1xf32>
    %469 = arith.cmpf oge, %461, %290 : vector<8x1xf32>
    %470 = arith.cmpf oge, %455, %290 : vector<8x1xf32>
    %471 = arith.select %470, %445, %443 : vector<8x1xi1>, vector<8x1xi32>
    %472 = arith.select %469, %447, %471 : vector<8x1xi1>, vector<8x1xi32>
    %473 = arith.select %468, %449, %472 : vector<8x1xi1>, vector<8x1xi32>
    %c131072_i32 = arith.constant 131072 : i32
    %474 = vector.broadcast %c131072_i32 : i32 to vector<8x1xi32>
    %475 = arith.ori %473, %474 : vector<8x1xi32>
    %c262144_i32 = arith.constant 262144 : i32
    %476 = vector.broadcast %c262144_i32 : i32 to vector<8x1xi32>
    %477 = arith.ori %473, %476 : vector<8x1xi32>
    %c393216_i32 = arith.constant 393216 : i32
    %478 = vector.broadcast %c393216_i32 : i32 to vector<8x1xi32>
    %479 = arith.ori %473, %478 : vector<8x1xi32>
    %480 = vector.broadcast %475 : vector<8x1xi32> to vector<8x256xi32>
    %481 = arith.cmpi sge, %291, %480 : vector<8x256xi32>
    %482 = arith.extui %481 : vector<8x256xi1> to vector<8x256xi32>
    %483 = arith.sitofp %482 : vector<8x256xi32> to vector<8x256xf32>
    %cst_163 = arith.constant dense<0.000000e+00> : vector<8x8xf32>
    %484 = tpu.matmul %483, %292, %cst_163 {dimension_numbers = #tpu.dot_dimension_numbers<[1], [1], [0], [0], [0, 0, 1, 0], [], []>} : vector<8x256xf32>, vector<8x256xf32>, vector<8x8xf32> -> vector<8x8xf32>
    %485 = vector.extract_strided_slice %484 {offsets = [0, 0], sizes = [8, 1], strides = [1, 1]} : vector<8x8xf32> to vector<8x1xf32>
    %486 = vector.broadcast %477 : vector<8x1xi32> to vector<8x256xi32>
    %487 = arith.cmpi sge, %291, %486 : vector<8x256xi32>
    %488 = arith.extui %487 : vector<8x256xi1> to vector<8x256xi32>
    %489 = arith.sitofp %488 : vector<8x256xi32> to vector<8x256xf32>
    %cst_164 = arith.constant dense<0.000000e+00> : vector<8x8xf32>
    %490 = tpu.matmul %489, %292, %cst_164 {dimension_numbers = #tpu.dot_dimension_numbers<[1], [1], [0], [0], [0, 0, 1, 0], [], []>} : vector<8x256xf32>, vector<8x256xf32>, vector<8x8xf32> -> vector<8x8xf32>
    %491 = vector.extract_strided_slice %490 {offsets = [0, 0], sizes = [8, 1], strides = [1, 1]} : vector<8x8xf32> to vector<8x1xf32>
    %492 = vector.broadcast %479 : vector<8x1xi32> to vector<8x256xi32>
    %493 = arith.cmpi sge, %291, %492 : vector<8x256xi32>
    %494 = arith.extui %493 : vector<8x256xi1> to vector<8x256xi32>
    %495 = arith.sitofp %494 : vector<8x256xi32> to vector<8x256xf32>
    %cst_165 = arith.constant dense<0.000000e+00> : vector<8x8xf32>
    %496 = tpu.matmul %495, %292, %cst_165 {dimension_numbers = #tpu.dot_dimension_numbers<[1], [1], [0], [0], [0, 0, 1, 0], [], []>} : vector<8x256xf32>, vector<8x256xf32>, vector<8x8xf32> -> vector<8x8xf32>
    %497 = vector.extract_strided_slice %496 {offsets = [0, 0], sizes = [8, 1], strides = [1, 1]} : vector<8x8xf32> to vector<8x1xf32>
    %498 = arith.cmpf oge, %497, %290 : vector<8x1xf32>
    %499 = arith.cmpf oge, %491, %290 : vector<8x1xf32>
    %500 = arith.cmpf oge, %485, %290 : vector<8x1xf32>
    %501 = arith.select %500, %475, %473 : vector<8x1xi1>, vector<8x1xi32>
    %502 = arith.select %499, %477, %501 : vector<8x1xi1>, vector<8x1xi32>
    %503 = arith.select %498, %479, %502 : vector<8x1xi1>, vector<8x1xi32>
    %c32768_i32 = arith.constant 32768 : i32
    %504 = vector.broadcast %c32768_i32 : i32 to vector<8x1xi32>
    %505 = arith.ori %503, %504 : vector<8x1xi32>
    %c65536_i32 = arith.constant 65536 : i32
    %506 = vector.broadcast %c65536_i32 : i32 to vector<8x1xi32>
    %507 = arith.ori %503, %506 : vector<8x1xi32>
    %c98304_i32 = arith.constant 98304 : i32
    %508 = vector.broadcast %c98304_i32 : i32 to vector<8x1xi32>
    %509 = arith.ori %503, %508 : vector<8x1xi32>
    %510 = vector.broadcast %505 : vector<8x1xi32> to vector<8x256xi32>
    %511 = arith.cmpi sge, %291, %510 : vector<8x256xi32>
    %512 = arith.extui %511 : vector<8x256xi1> to vector<8x256xi32>
    %513 = arith.sitofp %512 : vector<8x256xi32> to vector<8x256xf32>
    %cst_166 = arith.constant dense<0.000000e+00> : vector<8x8xf32>
    %514 = tpu.matmul %513, %292, %cst_166 {dimension_numbers = #tpu.dot_dimension_numbers<[1], [1], [0], [0], [0, 0, 1, 0], [], []>} : vector<8x256xf32>, vector<8x256xf32>, vector<8x8xf32> -> vector<8x8xf32>
    %515 = vector.extract_strided_slice %514 {offsets = [0, 0], sizes = [8, 1], strides = [1, 1]} : vector<8x8xf32> to vector<8x1xf32>
    %516 = vector.broadcast %507 : vector<8x1xi32> to vector<8x256xi32>
    %517 = arith.cmpi sge, %291, %516 : vector<8x256xi32>
    %518 = arith.extui %517 : vector<8x256xi1> to vector<8x256xi32>
    %519 = arith.sitofp %518 : vector<8x256xi32> to vector<8x256xf32>
    %cst_167 = arith.constant dense<0.000000e+00> : vector<8x8xf32>
    %520 = tpu.matmul %519, %292, %cst_167 {dimension_numbers = #tpu.dot_dimension_numbers<[1], [1], [0], [0], [0, 0, 1, 0], [], []>} : vector<8x256xf32>, vector<8x256xf32>, vector<8x8xf32> -> vector<8x8xf32>
    %521 = vector.extract_strided_slice %520 {offsets = [0, 0], sizes = [8, 1], strides = [1, 1]} : vector<8x8xf32> to vector<8x1xf32>
    %522 = vector.broadcast %509 : vector<8x1xi32> to vector<8x256xi32>
    %523 = arith.cmpi sge, %291, %522 : vector<8x256xi32>
    %524 = arith.extui %523 : vector<8x256xi1> to vector<8x256xi32>
    %525 = arith.sitofp %524 : vector<8x256xi32> to vector<8x256xf32>
    %cst_168 = arith.constant dense<0.000000e+00> : vector<8x8xf32>
    %526 = tpu.matmul %525, %292, %cst_168 {dimension_numbers = #tpu.dot_dimension_numbers<[1], [1], [0], [0], [0, 0, 1, 0], [], []>} : vector<8x256xf32>, vector<8x256xf32>, vector<8x8xf32> -> vector<8x8xf32>
    %527 = vector.extract_strided_slice %526 {offsets = [0, 0], sizes = [8, 1], strides = [1, 1]} : vector<8x8xf32> to vector<8x1xf32>
    %528 = arith.cmpf oge, %527, %290 : vector<8x1xf32>
    %529 = arith.cmpf oge, %521, %290 : vector<8x1xf32>
    %530 = arith.cmpf oge, %515, %290 : vector<8x1xf32>
    %531 = arith.select %530, %505, %503 : vector<8x1xi1>, vector<8x1xi32>
    %532 = arith.select %529, %507, %531 : vector<8x1xi1>, vector<8x1xi32>
    %533 = arith.select %528, %509, %532 : vector<8x1xi1>, vector<8x1xi32>
    %c8192_i32 = arith.constant 8192 : i32
    %534 = vector.broadcast %c8192_i32 : i32 to vector<8x1xi32>
    %535 = arith.ori %533, %534 : vector<8x1xi32>
    %c16384_i32 = arith.constant 16384 : i32
    %536 = vector.broadcast %c16384_i32 : i32 to vector<8x1xi32>
    %537 = arith.ori %533, %536 : vector<8x1xi32>
    %c24576_i32 = arith.constant 24576 : i32
    %538 = vector.broadcast %c24576_i32 : i32 to vector<8x1xi32>
    %539 = arith.ori %533, %538 : vector<8x1xi32>
    %540 = vector.broadcast %535 : vector<8x1xi32> to vector<8x256xi32>
    %541 = arith.cmpi sge, %291, %540 : vector<8x256xi32>
    %542 = arith.extui %541 : vector<8x256xi1> to vector<8x256xi32>
    %543 = arith.sitofp %542 : vector<8x256xi32> to vector<8x256xf32>
    %cst_169 = arith.constant dense<0.000000e+00> : vector<8x8xf32>
    %544 = tpu.matmul %543, %292, %cst_169 {dimension_numbers = #tpu.dot_dimension_numbers<[1], [1], [0], [0], [0, 0, 1, 0], [], []>} : vector<8x256xf32>, vector<8x256xf32>, vector<8x8xf32> -> vector<8x8xf32>
    %545 = vector.extract_strided_slice %544 {offsets = [0, 0], sizes = [8, 1], strides = [1, 1]} : vector<8x8xf32> to vector<8x1xf32>
    %546 = vector.broadcast %537 : vector<8x1xi32> to vector<8x256xi32>
    %547 = arith.cmpi sge, %291, %546 : vector<8x256xi32>
    %548 = arith.extui %547 : vector<8x256xi1> to vector<8x256xi32>
    %549 = arith.sitofp %548 : vector<8x256xi32> to vector<8x256xf32>
    %cst_170 = arith.constant dense<0.000000e+00> : vector<8x8xf32>
    %550 = tpu.matmul %549, %292, %cst_170 {dimension_numbers = #tpu.dot_dimension_numbers<[1], [1], [0], [0], [0, 0, 1, 0], [], []>} : vector<8x256xf32>, vector<8x256xf32>, vector<8x8xf32> -> vector<8x8xf32>
    %551 = vector.extract_strided_slice %550 {offsets = [0, 0], sizes = [8, 1], strides = [1, 1]} : vector<8x8xf32> to vector<8x1xf32>
    %552 = vector.broadcast %539 : vector<8x1xi32> to vector<8x256xi32>
    %553 = arith.cmpi sge, %291, %552 : vector<8x256xi32>
    %554 = arith.extui %553 : vector<8x256xi1> to vector<8x256xi32>
    %555 = arith.sitofp %554 : vector<8x256xi32> to vector<8x256xf32>
    %cst_171 = arith.constant dense<0.000000e+00> : vector<8x8xf32>
    %556 = tpu.matmul %555, %292, %cst_171 {dimension_numbers = #tpu.dot_dimension_numbers<[1], [1], [0], [0], [0, 0, 1, 0], [], []>} : vector<8x256xf32>, vector<8x256xf32>, vector<8x8xf32> -> vector<8x8xf32>
    %557 = vector.extract_strided_slice %556 {offsets = [0, 0], sizes = [8, 1], strides = [1, 1]} : vector<8x8xf32> to vector<8x1xf32>
    %558 = arith.cmpf oge, %557, %290 : vector<8x1xf32>
    %559 = arith.cmpf oge, %551, %290 : vector<8x1xf32>
    %560 = arith.cmpf oge, %545, %290 : vector<8x1xf32>
    %561 = arith.select %560, %535, %533 : vector<8x1xi1>, vector<8x1xi32>
    %562 = arith.select %559, %537, %561 : vector<8x1xi1>, vector<8x1xi32>
    %563 = arith.select %558, %539, %562 : vector<8x1xi1>, vector<8x1xi32>
    %c2048_i32 = arith.constant 2048 : i32
    %564 = vector.broadcast %c2048_i32 : i32 to vector<8x1xi32>
    %565 = arith.ori %563, %564 : vector<8x1xi32>
    %c4096_i32 = arith.constant 4096 : i32
    %566 = vector.broadcast %c4096_i32 : i32 to vector<8x1xi32>
    %567 = arith.ori %563, %566 : vector<8x1xi32>
    %c6144_i32 = arith.constant 6144 : i32
    %568 = vector.broadcast %c6144_i32 : i32 to vector<8x1xi32>
    %569 = arith.ori %563, %568 : vector<8x1xi32>
    %570 = vector.broadcast %565 : vector<8x1xi32> to vector<8x256xi32>
    %571 = arith.cmpi sge, %291, %570 : vector<8x256xi32>
    %572 = arith.extui %571 : vector<8x256xi1> to vector<8x256xi32>
    %573 = arith.sitofp %572 : vector<8x256xi32> to vector<8x256xf32>
    %cst_172 = arith.constant dense<0.000000e+00> : vector<8x8xf32>
    %574 = tpu.matmul %573, %292, %cst_172 {dimension_numbers = #tpu.dot_dimension_numbers<[1], [1], [0], [0], [0, 0, 1, 0], [], []>} : vector<8x256xf32>, vector<8x256xf32>, vector<8x8xf32> -> vector<8x8xf32>
    %575 = vector.extract_strided_slice %574 {offsets = [0, 0], sizes = [8, 1], strides = [1, 1]} : vector<8x8xf32> to vector<8x1xf32>
    %576 = vector.broadcast %567 : vector<8x1xi32> to vector<8x256xi32>
    %577 = arith.cmpi sge, %291, %576 : vector<8x256xi32>
    %578 = arith.extui %577 : vector<8x256xi1> to vector<8x256xi32>
    %579 = arith.sitofp %578 : vector<8x256xi32> to vector<8x256xf32>
    %cst_173 = arith.constant dense<0.000000e+00> : vector<8x8xf32>
    %580 = tpu.matmul %579, %292, %cst_173 {dimension_numbers = #tpu.dot_dimension_numbers<[1], [1], [0], [0], [0, 0, 1, 0], [], []>} : vector<8x256xf32>, vector<8x256xf32>, vector<8x8xf32> -> vector<8x8xf32>
    %581 = vector.extract_strided_slice %580 {offsets = [0, 0], sizes = [8, 1], strides = [1, 1]} : vector<8x8xf32> to vector<8x1xf32>
    %582 = vector.broadcast %569 : vector<8x1xi32> to vector<8x256xi32>
    %583 = arith.cmpi sge, %291, %582 : vector<8x256xi32>
    %584 = arith.extui %583 : vector<8x256xi1> to vector<8x256xi32>
    %585 = arith.sitofp %584 : vector<8x256xi32> to vector<8x256xf32>
    %cst_174 = arith.constant dense<0.000000e+00> : vector<8x8xf32>
    %586 = tpu.matmul %585, %292, %cst_174 {dimension_numbers = #tpu.dot_dimension_numbers<[1], [1], [0], [0], [0, 0, 1, 0], [], []>} : vector<8x256xf32>, vector<8x256xf32>, vector<8x8xf32> -> vector<8x8xf32>
    %587 = vector.extract_strided_slice %586 {offsets = [0, 0], sizes = [8, 1], strides = [1, 1]} : vector<8x8xf32> to vector<8x1xf32>
    %588 = arith.cmpf oge, %587, %290 : vector<8x1xf32>
    %589 = arith.cmpf oge, %581, %290 : vector<8x1xf32>
    %590 = arith.cmpf oge, %575, %290 : vector<8x1xf32>
    %591 = arith.select %590, %565, %563 : vector<8x1xi1>, vector<8x1xi32>
    %592 = arith.select %589, %567, %591 : vector<8x1xi1>, vector<8x1xi32>
    %593 = arith.select %588, %569, %592 : vector<8x1xi1>, vector<8x1xi32>
    %c512_i32 = arith.constant 512 : i32
    %594 = vector.broadcast %c512_i32 : i32 to vector<8x1xi32>
    %595 = arith.ori %593, %594 : vector<8x1xi32>
    %c1024_i32 = arith.constant 1024 : i32
    %596 = vector.broadcast %c1024_i32 : i32 to vector<8x1xi32>
    %597 = arith.ori %593, %596 : vector<8x1xi32>
    %c1536_i32 = arith.constant 1536 : i32
    %598 = vector.broadcast %c1536_i32 : i32 to vector<8x1xi32>
    %599 = arith.ori %593, %598 : vector<8x1xi32>
    %600 = vector.broadcast %595 : vector<8x1xi32> to vector<8x256xi32>
    %601 = arith.cmpi sge, %291, %600 : vector<8x256xi32>
    %602 = arith.extui %601 : vector<8x256xi1> to vector<8x256xi32>
    %603 = arith.sitofp %602 : vector<8x256xi32> to vector<8x256xf32>
    %cst_175 = arith.constant dense<0.000000e+00> : vector<8x8xf32>
    %604 = tpu.matmul %603, %292, %cst_175 {dimension_numbers = #tpu.dot_dimension_numbers<[1], [1], [0], [0], [0, 0, 1, 0], [], []>} : vector<8x256xf32>, vector<8x256xf32>, vector<8x8xf32> -> vector<8x8xf32>
    %605 = vector.extract_strided_slice %604 {offsets = [0, 0], sizes = [8, 1], strides = [1, 1]} : vector<8x8xf32> to vector<8x1xf32>
    %606 = vector.broadcast %597 : vector<8x1xi32> to vector<8x256xi32>
    %607 = arith.cmpi sge, %291, %606 : vector<8x256xi32>
    %608 = arith.extui %607 : vector<8x256xi1> to vector<8x256xi32>
    %609 = arith.sitofp %608 : vector<8x256xi32> to vector<8x256xf32>
    %cst_176 = arith.constant dense<0.000000e+00> : vector<8x8xf32>
    %610 = tpu.matmul %609, %292, %cst_176 {dimension_numbers = #tpu.dot_dimension_numbers<[1], [1], [0], [0], [0, 0, 1, 0], [], []>} : vector<8x256xf32>, vector<8x256xf32>, vector<8x8xf32> -> vector<8x8xf32>
    %611 = vector.extract_strided_slice %610 {offsets = [0, 0], sizes = [8, 1], strides = [1, 1]} : vector<8x8xf32> to vector<8x1xf32>
    %612 = vector.broadcast %599 : vector<8x1xi32> to vector<8x256xi32>
    %613 = arith.cmpi sge, %291, %612 : vector<8x256xi32>
    %614 = arith.extui %613 : vector<8x256xi1> to vector<8x256xi32>
    %615 = arith.sitofp %614 : vector<8x256xi32> to vector<8x256xf32>
    %cst_177 = arith.constant dense<0.000000e+00> : vector<8x8xf32>
    %616 = tpu.matmul %615, %292, %cst_177 {dimension_numbers = #tpu.dot_dimension_numbers<[1], [1], [0], [0], [0, 0, 1, 0], [], []>} : vector<8x256xf32>, vector<8x256xf32>, vector<8x8xf32> -> vector<8x8xf32>
    %617 = vector.extract_strided_slice %616 {offsets = [0, 0], sizes = [8, 1], strides = [1, 1]} : vector<8x8xf32> to vector<8x1xf32>
    %618 = arith.cmpf oge, %617, %290 : vector<8x1xf32>
    %619 = arith.cmpf oge, %611, %290 : vector<8x1xf32>
    %620 = arith.cmpf oge, %605, %290 : vector<8x1xf32>
    %621 = arith.select %620, %595, %593 : vector<8x1xi1>, vector<8x1xi32>
    %622 = arith.select %619, %597, %621 : vector<8x1xi1>, vector<8x1xi32>
    %623 = arith.select %618, %599, %622 : vector<8x1xi1>, vector<8x1xi32>
    %c128_i32 = arith.constant 128 : i32
    %624 = vector.broadcast %c128_i32 : i32 to vector<8x1xi32>
    %625 = arith.ori %623, %624 : vector<8x1xi32>
    %c256_i32 = arith.constant 256 : i32
    %626 = vector.broadcast %c256_i32 : i32 to vector<8x1xi32>
    %627 = arith.ori %623, %626 : vector<8x1xi32>
    %c384_i32 = arith.constant 384 : i32
    %628 = vector.broadcast %c384_i32 : i32 to vector<8x1xi32>
    %629 = arith.ori %623, %628 : vector<8x1xi32>
    %630 = vector.broadcast %625 : vector<8x1xi32> to vector<8x256xi32>
    %631 = arith.cmpi sge, %291, %630 : vector<8x256xi32>
    %632 = arith.extui %631 : vector<8x256xi1> to vector<8x256xi32>
    %633 = arith.sitofp %632 : vector<8x256xi32> to vector<8x256xf32>
    %cst_178 = arith.constant dense<0.000000e+00> : vector<8x8xf32>
    %634 = tpu.matmul %633, %292, %cst_178 {dimension_numbers = #tpu.dot_dimension_numbers<[1], [1], [0], [0], [0, 0, 1, 0], [], []>} : vector<8x256xf32>, vector<8x256xf32>, vector<8x8xf32> -> vector<8x8xf32>
    %635 = vector.extract_strided_slice %634 {offsets = [0, 0], sizes = [8, 1], strides = [1, 1]} : vector<8x8xf32> to vector<8x1xf32>
    %636 = vector.broadcast %627 : vector<8x1xi32> to vector<8x256xi32>
    %637 = arith.cmpi sge, %291, %636 : vector<8x256xi32>
    %638 = arith.extui %637 : vector<8x256xi1> to vector<8x256xi32>
    %639 = arith.sitofp %638 : vector<8x256xi32> to vector<8x256xf32>
    %cst_179 = arith.constant dense<0.000000e+00> : vector<8x8xf32>
    %640 = tpu.matmul %639, %292, %cst_179 {dimension_numbers = #tpu.dot_dimension_numbers<[1], [1], [0], [0], [0, 0, 1, 0], [], []>} : vector<8x256xf32>, vector<8x256xf32>, vector<8x8xf32> -> vector<8x8xf32>
    %641 = vector.extract_strided_slice %640 {offsets = [0, 0], sizes = [8, 1], strides = [1, 1]} : vector<8x8xf32> to vector<8x1xf32>
    %642 = vector.broadcast %629 : vector<8x1xi32> to vector<8x256xi32>
    %643 = arith.cmpi sge, %291, %642 : vector<8x256xi32>
    %644 = arith.extui %643 : vector<8x256xi1> to vector<8x256xi32>
    %645 = arith.sitofp %644 : vector<8x256xi32> to vector<8x256xf32>
    %cst_180 = arith.constant dense<0.000000e+00> : vector<8x8xf32>
    %646 = tpu.matmul %645, %292, %cst_180 {dimension_numbers = #tpu.dot_dimension_numbers<[1], [1], [0], [0], [0, 0, 1, 0], [], []>} : vector<8x256xf32>, vector<8x256xf32>, vector<8x8xf32> -> vector<8x8xf32>
    %647 = vector.extract_strided_slice %646 {offsets = [0, 0], sizes = [8, 1], strides = [1, 1]} : vector<8x8xf32> to vector<8x1xf32>
    %648 = arith.cmpf oge, %647, %290 : vector<8x1xf32>
    %649 = arith.cmpf oge, %641, %290 : vector<8x1xf32>
    %650 = arith.cmpf oge, %635, %290 : vector<8x1xf32>
    %651 = arith.select %650, %625, %623 : vector<8x1xi1>, vector<8x1xi32>
    %652 = arith.select %649, %627, %651 : vector<8x1xi1>, vector<8x1xi32>
    %653 = arith.select %648, %629, %652 : vector<8x1xi1>, vector<8x1xi32>
    %c32_i32 = arith.constant 32 : i32
    %654 = vector.broadcast %c32_i32 : i32 to vector<8x1xi32>
    %655 = arith.ori %653, %654 : vector<8x1xi32>
    %c64_i32 = arith.constant 64 : i32
    %656 = vector.broadcast %c64_i32 : i32 to vector<8x1xi32>
    %657 = arith.ori %653, %656 : vector<8x1xi32>
    %c96_i32 = arith.constant 96 : i32
    %658 = vector.broadcast %c96_i32 : i32 to vector<8x1xi32>
    %659 = arith.ori %653, %658 : vector<8x1xi32>
    %660 = vector.broadcast %655 : vector<8x1xi32> to vector<8x256xi32>
    %661 = arith.cmpi sge, %291, %660 : vector<8x256xi32>
    %662 = arith.extui %661 : vector<8x256xi1> to vector<8x256xi32>
    %663 = arith.sitofp %662 : vector<8x256xi32> to vector<8x256xf32>
    %cst_181 = arith.constant dense<0.000000e+00> : vector<8x8xf32>
    %664 = tpu.matmul %663, %292, %cst_181 {dimension_numbers = #tpu.dot_dimension_numbers<[1], [1], [0], [0], [0, 0, 1, 0], [], []>} : vector<8x256xf32>, vector<8x256xf32>, vector<8x8xf32> -> vector<8x8xf32>
    %665 = vector.extract_strided_slice %664 {offsets = [0, 0], sizes = [8, 1], strides = [1, 1]} : vector<8x8xf32> to vector<8x1xf32>
    %666 = vector.broadcast %657 : vector<8x1xi32> to vector<8x256xi32>
    %667 = arith.cmpi sge, %291, %666 : vector<8x256xi32>
    %668 = arith.extui %667 : vector<8x256xi1> to vector<8x256xi32>
    %669 = arith.sitofp %668 : vector<8x256xi32> to vector<8x256xf32>
    %cst_182 = arith.constant dense<0.000000e+00> : vector<8x8xf32>
    %670 = tpu.matmul %669, %292, %cst_182 {dimension_numbers = #tpu.dot_dimension_numbers<[1], [1], [0], [0], [0, 0, 1, 0], [], []>} : vector<8x256xf32>, vector<8x256xf32>, vector<8x8xf32> -> vector<8x8xf32>
    %671 = vector.extract_strided_slice %670 {offsets = [0, 0], sizes = [8, 1], strides = [1, 1]} : vector<8x8xf32> to vector<8x1xf32>
    %672 = vector.broadcast %659 : vector<8x1xi32> to vector<8x256xi32>
    %673 = arith.cmpi sge, %291, %672 : vector<8x256xi32>
    %674 = arith.extui %673 : vector<8x256xi1> to vector<8x256xi32>
    %675 = arith.sitofp %674 : vector<8x256xi32> to vector<8x256xf32>
    %cst_183 = arith.constant dense<0.000000e+00> : vector<8x8xf32>
    %676 = tpu.matmul %675, %292, %cst_183 {dimension_numbers = #tpu.dot_dimension_numbers<[1], [1], [0], [0], [0, 0, 1, 0], [], []>} : vector<8x256xf32>, vector<8x256xf32>, vector<8x8xf32> -> vector<8x8xf32>
    %677 = vector.extract_strided_slice %676 {offsets = [0, 0], sizes = [8, 1], strides = [1, 1]} : vector<8x8xf32> to vector<8x1xf32>
    %678 = arith.cmpf oge, %677, %290 : vector<8x1xf32>
    %679 = arith.cmpf oge, %671, %290 : vector<8x1xf32>
    %680 = arith.cmpf oge, %665, %290 : vector<8x1xf32>
    %681 = arith.select %680, %655, %653 : vector<8x1xi1>, vector<8x1xi32>
    %682 = arith.select %679, %657, %681 : vector<8x1xi1>, vector<8x1xi32>
    %683 = arith.select %678, %659, %682 : vector<8x1xi1>, vector<8x1xi32>
    %c8_i32_184 = arith.constant 8 : i32
    %684 = vector.broadcast %c8_i32_184 : i32 to vector<8x1xi32>
    %685 = arith.ori %683, %684 : vector<8x1xi32>
    %c16_i32 = arith.constant 16 : i32
    %686 = vector.broadcast %c16_i32 : i32 to vector<8x1xi32>
    %687 = arith.ori %683, %686 : vector<8x1xi32>
    %c24_i32 = arith.constant 24 : i32
    %688 = vector.broadcast %c24_i32 : i32 to vector<8x1xi32>
    %689 = arith.ori %683, %688 : vector<8x1xi32>
    %690 = vector.broadcast %685 : vector<8x1xi32> to vector<8x256xi32>
    %691 = arith.cmpi sge, %291, %690 : vector<8x256xi32>
    %692 = arith.extui %691 : vector<8x256xi1> to vector<8x256xi32>
    %693 = arith.sitofp %692 : vector<8x256xi32> to vector<8x256xf32>
    %cst_185 = arith.constant dense<0.000000e+00> : vector<8x8xf32>
    %694 = tpu.matmul %693, %292, %cst_185 {dimension_numbers = #tpu.dot_dimension_numbers<[1], [1], [0], [0], [0, 0, 1, 0], [], []>} : vector<8x256xf32>, vector<8x256xf32>, vector<8x8xf32> -> vector<8x8xf32>
    %695 = vector.extract_strided_slice %694 {offsets = [0, 0], sizes = [8, 1], strides = [1, 1]} : vector<8x8xf32> to vector<8x1xf32>
    %696 = vector.broadcast %687 : vector<8x1xi32> to vector<8x256xi32>
    %697 = arith.cmpi sge, %291, %696 : vector<8x256xi32>
    %698 = arith.extui %697 : vector<8x256xi1> to vector<8x256xi32>
    %699 = arith.sitofp %698 : vector<8x256xi32> to vector<8x256xf32>
    %cst_186 = arith.constant dense<0.000000e+00> : vector<8x8xf32>
    %700 = tpu.matmul %699, %292, %cst_186 {dimension_numbers = #tpu.dot_dimension_numbers<[1], [1], [0], [0], [0, 0, 1, 0], [], []>} : vector<8x256xf32>, vector<8x256xf32>, vector<8x8xf32> -> vector<8x8xf32>
    %701 = vector.extract_strided_slice %700 {offsets = [0, 0], sizes = [8, 1], strides = [1, 1]} : vector<8x8xf32> to vector<8x1xf32>
    %702 = vector.broadcast %689 : vector<8x1xi32> to vector<8x256xi32>
    %703 = arith.cmpi sge, %291, %702 : vector<8x256xi32>
    %704 = arith.extui %703 : vector<8x256xi1> to vector<8x256xi32>
    %705 = arith.sitofp %704 : vector<8x256xi32> to vector<8x256xf32>
    %cst_187 = arith.constant dense<0.000000e+00> : vector<8x8xf32>
    %706 = tpu.matmul %705, %292, %cst_187 {dimension_numbers = #tpu.dot_dimension_numbers<[1], [1], [0], [0], [0, 0, 1, 0], [], []>} : vector<8x256xf32>, vector<8x256xf32>, vector<8x8xf32> -> vector<8x8xf32>
    %707 = vector.extract_strided_slice %706 {offsets = [0, 0], sizes = [8, 1], strides = [1, 1]} : vector<8x8xf32> to vector<8x1xf32>
    %708 = arith.cmpf oge, %707, %290 : vector<8x1xf32>
    %709 = arith.cmpf oge, %701, %290 : vector<8x1xf32>
    %710 = arith.cmpf oge, %695, %290 : vector<8x1xf32>
    %711 = arith.select %710, %685, %683 : vector<8x1xi1>, vector<8x1xi32>
    %712 = arith.select %709, %687, %711 : vector<8x1xi1>, vector<8x1xi32>
    %713 = arith.select %708, %689, %712 : vector<8x1xi1>, vector<8x1xi32>
    %c2_i32_188 = arith.constant 2 : i32
    %714 = vector.broadcast %c2_i32_188 : i32 to vector<8x1xi32>
    %715 = arith.ori %713, %714 : vector<8x1xi32>
    %c4_i32_189 = arith.constant 4 : i32
    %716 = vector.broadcast %c4_i32_189 : i32 to vector<8x1xi32>
    %717 = arith.ori %713, %716 : vector<8x1xi32>
    %c6_i32_190 = arith.constant 6 : i32
    %718 = vector.broadcast %c6_i32_190 : i32 to vector<8x1xi32>
    %719 = arith.ori %713, %718 : vector<8x1xi32>
    %720 = vector.broadcast %715 : vector<8x1xi32> to vector<8x256xi32>
    %721 = arith.cmpi sge, %291, %720 : vector<8x256xi32>
    %722 = arith.extui %721 : vector<8x256xi1> to vector<8x256xi32>
    %723 = arith.sitofp %722 : vector<8x256xi32> to vector<8x256xf32>
    %cst_191 = arith.constant dense<0.000000e+00> : vector<8x8xf32>
    %724 = tpu.matmul %723, %292, %cst_191 {dimension_numbers = #tpu.dot_dimension_numbers<[1], [1], [0], [0], [0, 0, 1, 0], [], []>} : vector<8x256xf32>, vector<8x256xf32>, vector<8x8xf32> -> vector<8x8xf32>
    %725 = vector.extract_strided_slice %724 {offsets = [0, 0], sizes = [8, 1], strides = [1, 1]} : vector<8x8xf32> to vector<8x1xf32>
    %726 = vector.broadcast %717 : vector<8x1xi32> to vector<8x256xi32>
    %727 = arith.cmpi sge, %291, %726 : vector<8x256xi32>
    %728 = arith.extui %727 : vector<8x256xi1> to vector<8x256xi32>
    %729 = arith.sitofp %728 : vector<8x256xi32> to vector<8x256xf32>
    %cst_192 = arith.constant dense<0.000000e+00> : vector<8x8xf32>
    %730 = tpu.matmul %729, %292, %cst_192 {dimension_numbers = #tpu.dot_dimension_numbers<[1], [1], [0], [0], [0, 0, 1, 0], [], []>} : vector<8x256xf32>, vector<8x256xf32>, vector<8x8xf32> -> vector<8x8xf32>
    %731 = vector.extract_strided_slice %730 {offsets = [0, 0], sizes = [8, 1], strides = [1, 1]} : vector<8x8xf32> to vector<8x1xf32>
    %732 = vector.broadcast %719 : vector<8x1xi32> to vector<8x256xi32>
    %733 = arith.cmpi sge, %291, %732 : vector<8x256xi32>
    %734 = arith.extui %733 : vector<8x256xi1> to vector<8x256xi32>
    %735 = arith.sitofp %734 : vector<8x256xi32> to vector<8x256xf32>
    %cst_193 = arith.constant dense<0.000000e+00> : vector<8x8xf32>
    %736 = tpu.matmul %735, %292, %cst_193 {dimension_numbers = #tpu.dot_dimension_numbers<[1], [1], [0], [0], [0, 0, 1, 0], [], []>} : vector<8x256xf32>, vector<8x256xf32>, vector<8x8xf32> -> vector<8x8xf32>
    %737 = vector.extract_strided_slice %736 {offsets = [0, 0], sizes = [8, 1], strides = [1, 1]} : vector<8x8xf32> to vector<8x1xf32>
    %738 = arith.cmpf oge, %737, %290 : vector<8x1xf32>
    %739 = arith.cmpf oge, %731, %290 : vector<8x1xf32>
    %740 = arith.cmpf oge, %725, %290 : vector<8x1xf32>
    %741 = arith.select %740, %715, %713 : vector<8x1xi1>, vector<8x1xi32>
    %742 = arith.select %739, %717, %741 : vector<8x1xi1>, vector<8x1xi32>
    %743 = arith.select %738, %719, %742 : vector<8x1xi1>, vector<8x1xi32>
    %c1_i32_194 = arith.constant 1 : i32
    %744 = vector.broadcast %c1_i32_194 : i32 to vector<8x1xi32>
    %745 = arith.ori %743, %744 : vector<8x1xi32>
    %746 = vector.broadcast %745 : vector<8x1xi32> to vector<8x256xi32>
    %747 = arith.cmpi sge, %291, %746 : vector<8x256xi32>
    %748 = arith.extui %747 : vector<8x256xi1> to vector<8x256xi32>
    %749 = arith.sitofp %748 : vector<8x256xi32> to vector<8x256xf32>
    %cst_195 = arith.constant dense<0.000000e+00> : vector<8x8xf32>
    %750 = tpu.matmul %749, %292, %cst_195 {dimension_numbers = #tpu.dot_dimension_numbers<[1], [1], [0], [0], [0, 0, 1, 0], [], []>} : vector<8x256xf32>, vector<8x256xf32>, vector<8x8xf32> -> vector<8x8xf32>
    %751 = vector.extract_strided_slice %750 {offsets = [0, 0], sizes = [8, 1], strides = [1, 1]} : vector<8x8xf32> to vector<8x1xf32>
    %752 = arith.cmpf oge, %751, %290 : vector<8x1xf32>
    %753 = arith.select %752, %745, %743 : vector<8x1xi1>, vector<8x1xi32>
    %754 = tpu.bitcast %753 : vector<8x1xi32> -> vector<8x1xf32>
    %755 = vector.broadcast %754 : vector<8x1xf32> to vector<8x256xf32>
    %756 = arith.cmpf ogt, %286, %755 : vector<8x256xf32>
    %757 = arith.extui %756 : vector<8x256xi1> to vector<8x256xi32>
    %758 = arith.sitofp %757 : vector<8x256xi32> to vector<8x256xf32>
    %cst_196 = arith.constant dense<0.000000e+00> : vector<8xf32>
    %759 = vector.multi_reduction <add>, %758, %cst_196 [1] : vector<8x256xf32> to vector<8xf32>
    %760 = vector.shape_cast %759 : vector<8xf32> to vector<8x1xf32>
    %761 = arith.mulf %286, %758 : vector<8x256xf32>
    %cst_197 = arith.constant dense<0.000000e+00> : vector<8xf32>
    %762 = vector.multi_reduction <add>, %761, %cst_197 [1] : vector<8x256xf32> to vector<8xf32>
    %763 = vector.shape_cast %762 : vector<8xf32> to vector<8x1xf32>
    %cst_198 = arith.constant 0.000000e+00 : f32
    %764 = vector.broadcast %cst_198 : f32 to vector<8x1xf32>
    %765 = arith.cmpf ogt, %290, %764 : vector<8x1xf32>
    %766 = arith.subf %290, %760 : vector<8x1xf32>
    %767 = arith.mulf %754, %766 : vector<8x1xf32>
    %768 = arith.addf %763, %767 : vector<8x1xf32>
    %cst_199 = arith.constant 0.000000e+00 : f32
    %769 = vector.broadcast %cst_199 : f32 to vector<8x1xf32>
    %770 = arith.select %765, %768, %769 : vector<8x1xi1>, vector<8x1xf32>
    %771 = arith.mulf %282, %4 : vector<8x256xf32>
    %cst_200 = arith.constant dense<0.000000e+00> : vector<8xf32>
    %772 = vector.multi_reduction <add>, %771, %cst_200 [1] : vector<8x256xf32> to vector<8xf32>
    %773 = vector.shape_cast %772 : vector<8xf32> to vector<8x1xf32>
    %774 = arith.addf %773, %770 : vector<8x1xf32>
    %775 = tpu.iota {dimensions = array<i32: 1>} : vector<8x128xi32>
    %c0_i32_201 = arith.constant 0 : i32
    %776 = vector.broadcast %c0_i32_201 : i32 to vector<8x128xi32>
    %777 = arith.cmpi eq, %775, %776 : vector<8x128xi32>
    %cst_202 = arith.constant 0.000000e+00 : f32
    %778 = vector.shape_cast %70 : vector<8x1xf32> to vector<8x1xf32>
    %779 = vector.broadcast %778 : vector<8x1xf32> to vector<8x128xf32>
    %780 = vector.broadcast %cst_202 : f32 to vector<8x128xf32>
    %781 = arith.select %777, %779, %780 : vector<8x128xi1>, vector<8x128xf32>
    %c1_i32_203 = arith.constant 1 : i32
    %782 = vector.broadcast %c1_i32_203 : i32 to vector<8x128xi32>
    %783 = arith.cmpi eq, %775, %782 : vector<8x128xi32>
    %cst_204 = arith.constant 0.000000e+00 : f32
    %784 = vector.shape_cast %774 : vector<8x1xf32> to vector<8x1xf32>
    %785 = vector.broadcast %784 : vector<8x1xf32> to vector<8x128xf32>
    %786 = vector.broadcast %cst_204 : f32 to vector<8x128xf32>
    %787 = arith.select %783, %785, %786 : vector<8x128xi1>, vector<8x128xf32>
    %788 = arith.addf %781, %787 : vector<8x128xf32>
    %c2_i32_205 = arith.constant 2 : i32
    %789 = vector.broadcast %c2_i32_205 : i32 to vector<8x128xi32>
    %790 = arith.cmpi eq, %775, %789 : vector<8x128xi32>
    %cst_206 = arith.constant 0.000000e+00 : f32
    %791 = vector.shape_cast %6 : vector<8x1xf32> to vector<8x1xf32>
    %792 = vector.broadcast %791 : vector<8x1xf32> to vector<8x128xf32>
    %793 = vector.broadcast %cst_206 : f32 to vector<8x128xf32>
    %794 = arith.select %790, %792, %793 : vector<8x128xi1>, vector<8x128xf32>
    %795 = arith.addf %788, %794 : vector<8x128xf32>
    %c0_207 = arith.constant 0 : index
    %c0_208 = arith.constant 0 : index
    %796 = vector.load %arg4[%c0_207, %c0_208] : memref<8x128xf32, #tpu.memory_space<vmem>>, vector<8x128xf32>
    tpu.vector_store %arg4[%c0_207, %c0_208], %795 {strides = array<i32>} : memref<8x128xf32, #tpu.memory_space<vmem>>, vector<8x128xf32>,
    return
  }
  func.func @transform_0(%arg0: i32) -> (i32, i32, i32) {
    %c0_i32 = arith.constant 0 : i32
    %c0_i32_0 = arith.constant 0 : i32
    %c0_i32_1 = arith.constant 0 : i32
    return %c0_i32, %arg0, %c0_i32_0 : i32, i32, i32
  }
  func.func @transform_1(%arg0: i32) -> (i32, i32, i32) {
    %c0_i32 = arith.constant 0 : i32
    %c0_i32_0 = arith.constant 0 : i32
    %c0_i32_1 = arith.constant 0 : i32
    return %c0_i32, %arg0, %c0_i32_0 : i32, i32, i32
  }
  func.func @transform_2(%arg0: i32) -> (i32, i32) {
    %c0_i32 = arith.constant 0 : i32
    %c0_i32_0 = arith.constant 0 : i32
    return %arg0, %c0_i32 : i32, i32
  }
  func.func @transform_3(%arg0: i32) -> (i32, i32) {
    %c0_i32 = arith.constant 0 : i32
    %c0_i32_0 = arith.constant 0 : i32
    return %arg0, %c0_i32 : i32, i32
  }
}

</mosaic_0001>

<bundles_post_ra>
// kernel: tpu_custom_call.1
= control target key start
LH: loop header
LB: loop body
LE: loop exit
PB: predicated region body
PF: predicated region fallthrough
CT: control target
= control target key end

     0   :  { %8 = vsyncpa [#allocation3], 0  ;;  %s5345_s0 = inlined_call_operand.hbm [shape: f32[8,8,256], index: 0, kind: input, shape index: {}]   ;;  %s5346_s1 = inlined_call_operand.hbm [shape: f32[16,8,256], index: 1, kind: input, shape index: {}]   ;;  %s5347_s2 = inlined_call_operand.hbm [shape: s32[8,256], index: 2, kind: input, shape index: {}]   ;;  %s5348_s3 = inlined_call_operand.hbm [shape: f32[8,128], index: 3, kind: output, shape index: {}]  }
   0x1   :  { %9 = vsyncpa [#allocation6], 0 }
   0x2   :  { %10 = vsyncpa [#allocation4], 0  ;;  %s4657_s12 = smov [#allocation5]   ;;  %s4658_s14 = smov [#allocation2]  }
   0x3   :  { %s28_s13 = sshll.u32 %s4657_s12, 4  ;;  %s16_s15 = sshll.u32 %s4658_s14, 4  ;;  %s29_s13 = int_to_ptr.vmem [resolvable:$true] %s28_s13  ;;  %s17_s15 = int_to_ptr.vmem [resolvable:$true] %s16_s15 }
   0x4   :  { %s4579_s16 = scalar_lea.vmem %s29_s13, 4096  ;;  %p4584_p1 = scmp.lt.s32.totalorder %s29_s13, %s29_s13 }
   0x5   :  { %p4580_p0 = scmp.ne.s32.totalorder %s29_s13, %s4579_s16  ;;  %p4585_p2 = scmp.lt.s32.totalorder %s4579_s16, %s4579_s16 }
   0x7   :  { %p4586_p3 = por %p4585_p2, %p4584_p1 }
   0x9   :  { %p4587_p4 = pnand %p4586_p3, %p4580_p0 }
   0xb   :  { %4590 = shalt.err (!%p4587_p4)
}
   0xc   :  { %s4659_s17 = smov 256   ;;  %s4660_s18 = smov 16  }
   0xd   :  { %34 = dma.hbm_to_vmem [thread:$0]  %s5346_s1, 4096, %s29_s13, [#allocation6], %s4659_s17, %s4659_s17, %s4660_s18  }
   0xe   :  { %s4599_s21 = scalar_lea.vmem %s17_s15, 2048  ;;  %p4604_p6 = scmp.lt.s32.totalorder %s17_s15, %s17_s15 }
   0xf   :  { %p4600_p5 = scmp.ne.s32.totalorder %s17_s15, %s4599_s21  ;;  %p4605_p7 = scmp.lt.s32.totalorder %s4599_s21, %s4599_s21 }
  0x11   :  { %p4606_p8 = por %p4605_p7, %p4604_p6 }
  0x13   :  { %p4607_p9 = pnand %p4606_p8, %p4600_p5 }
  0x15   :  { %4610 = shalt.err (!%p4607_p9)
}
  0x16   :  { %22 = dma.hbm_to_vmem [thread:$0]  %s5345_s0, 2048, %s17_s15, [#allocation3], %s4659_s17, %s4659_s17, %s4660_s18  }
  0x17   :  { %s4661_s24 = smov [#allocation7]  }
  0x18   :  { %s41_s25 = sshll.u32 %s4661_s24, 4  ;;  %s42_s25 = int_to_ptr.vmem [resolvable:$true] %s41_s25 }
  0x19   :  { %s4619_s26 = scalar_lea.vmem %s42_s25, 256  ;;  %p4624_p11 = scmp.lt.s32.totalorder %s42_s25, %s42_s25 }
  0x1a   :  { %p4620_p10 = scmp.ne.s32.totalorder %s42_s25, %s4619_s26  ;;  %p4625_p12 = scmp.lt.s32.totalorder %s4619_s26, %s4619_s26 }
  0x1c   :  { %p4626_p13 = por %p4625_p12, %p4624_p11 }
  0x1e   :  { %p4627_p0 = pnand %p4626_p13, %p4620_p10 }
  0x20   :  { %4630 = shalt.err (!%p4627_p0)
}
  0x21   :  { %44 = dma.hbm_to_vmem [thread:$0]  %s5347_s2, 256, %s42_s25, [#allocation6]  }
  0x22   :  { %4651 = dma.done.wait [#allocation3], 2048  }
  0x23   :  { %4652 = vsyncadd [#allocation3], 4294965248 }
  0x24   :  { %4653 = dma.done.wait [#allocation6], 4352  }
  0x25   :  { %4654 = vsyncadd [#allocation6], 4294962944  ;;  %v4662_v0 = vmov 1.0   ;;  %v4701_v1 = vld [vmem:[#allocation7 + $0x8] sm:$0xff]  ;;  %v4705_v3 = vld [vmem:[#allocation5 + $0x18] sm:$0xff]  ;;  %s4665_s0 = smov [#allocation8]  }
  0x26   :  { %510 = vmatprep.subr.mxu0 %v4662_v0  ;;  %586 = vmatprep.subr.mxu1 %v4662_v0  ;;  %v4703_v2 = vld [vmem:[#allocation5 + $0x8] sm:$0xff]  ;;  %vm243_vm0 = vcmp.eq.s32.totalorder %v4701_v1, 0  ;;  %vm257_vm1 = vcmp.eq.s32.totalorder %v4701_v1, 1  ;;  %v4713_v6 = vld [vmem:[#allocation5 + $0x38] sm:$0xff]  ;;  %vm271_vm2 = vcmp.eq.s32.totalorder %v4701_v1, 2  ;;  %vm285_vm3 = vcmp.eq.s32.totalorder %v4701_v1, 3 }
  0x27   :  { %511 = vmatpush1.xpose.msra.mxu0 %v4662_v0  ;;  %587 = vmatpush1.xpose.msra.mxu1 %v4662_v0  ;;  %v163_v4 = vmax.f32 %v4703_v2, %v4705_v3  ;;  %v4709_v5 = vld [vmem:[#allocation5 + $0x28] sm:$0xff]  ;;  %v245_v7 = vsel %vm243_vm0, %v4703_v2, 0.0  ;;  %v259_v8 = vsel %vm257_vm1, %v4705_v3, 0.0  ;;  %v287_v13 = vsel %vm285_vm3, %v4713_v6, 0.0  ;;  %v4728_v17 = vld [vmem:[#allocation5 + $0x58] sm:$0xff]  ;;  %v4760_v35 = vld [vmem:[#allocation5] sm:$0xff] }
  0x28   :  { %662 = vmatprep.subr.mxu0 %v4662_v0  ;;  %750 = vmatprep.subr.mxu1 %v4662_v0  ;;  %v261_v10 = vadd.f32 %v259_v8, %v245_v7  ;;  %v273_v11 = vsel %vm271_vm2, %v4709_v5, 0.0  ;;  %v4721_v12 = vld [vmem:[#allocation5 + $0x48] sm:$0xff]  ;;  %vm299_vm4 = vcmp.eq.s32.totalorder %v4701_v1, 4  ;;  %vm313_vm5 = vcmp.eq.s32.totalorder %v4701_v1, 5  ;;  %v4737_v20 = vld [vmem:[#allocation5 + $0x78] sm:$0xff]  ;;  %v4762_v36 = vld [vmem:[#allocation5 + $0x10] sm:$0xff] }
  0x29   :  { %v168_v9 = vmax.f32 %v163_v4, %v4709_v5  ;;  %v301_v16 = vsel %vm299_vm4, %v4721_v12, 0.0  ;;  %v4730_v18 = vld [vmem:[#allocation5 + $0x68] sm:$0xff]  ;;  %vm327_vm6 = vcmp.eq.s32.totalorder %v4701_v1, 6  ;;  %vm341_vm7 = vcmp.eq.s32.totalorder %v4701_v1, 7  ;;  %v4741_v22 = vld [vmem:[#allocation5 + $0x98] sm:$0xff]  ;;  %v4770_v38 = vld [vmem:[#allocation7] sm:$0xff] }
  0x2a   :  { %v275_v15 = vadd.f32 %v273_v11, %v261_v10  ;;  %vm355_vm8 = vcmp.eq.s32.totalorder %v4701_v1, 8  ;;  %vm369_vm9 = vcmp.eq.s32.totalorder %v4701_v1, 9  ;;  %v4739_v21 = vld [vmem:[#allocation5 + $0x88] sm:$0xff]  ;;  %v315_v24 = vsel %vm313_vm5, %v4728_v17, 0.0  ;;  %v4747_v27 = vld [vmem:[#allocation5 + $0xb8] sm:$0xff]  ;;  %v4783_v45 = vld [vmem:[#allocation5 + $0x20] sm:$0xff] }
  0x2b   :  { %v173_v14 = vmax.f32 %v168_v9, %v4713_v6  ;;  %v329_v25 = vsel %vm327_vm6, %v4730_v18, 0.0  ;;  %v4745_v26 = vld [vmem:[#allocation5 + $0xa8] sm:$0xff]  ;;  %v343_v28 = vsel %vm341_vm7, %v4737_v20, 0.0  ;;  %v357_v29 = vsel %vm355_vm8, %v4739_v21, 0.0  ;;  %v4764_v37 = vld [vmem:[#allocation5 + $0xd8] sm:$0xff]  ;;  %v4797_v52 = vld [vmem:[#allocation5 + $0x30] sm:$0xff] }
  0x2c   :  { %v289_v23 = vadd.f32 %v287_v13, %v275_v15  ;;  %vm383_vm10 = vcmp.eq.s32.totalorder %v4701_v1, 10  ;;  %vm397_vm11 = vcmp.eq.s32.totalorder %v4701_v1, 11  ;;  %v4754_v31 = vld [vmem:[#allocation5 + $0xc8] sm:$0xff]  ;;  %v371_v33 = vsel %vm369_vm9, %v4741_v22, 0.0  ;;  %v4775_v41 = vld [vmem:[#allocation5 + $0xf8] sm:$0xff]  ;;  %v4806_v58 = vld [vmem:[#allocation5 + $0x40] sm:$0xff] }
  0x2d   :  { %v178_v19 = vmax.f32 %v173_v14, %v4721_v12  ;;  %v385_v34 = vsel %vm383_vm10, %v4745_v26, 0.0  ;;  %vm411_vm12 = vcmp.eq.s32.totalorder %v4701_v1, 12  ;;  %vm425_vm13 = vcmp.eq.s32.totalorder %v4701_v1, 13  ;;  %v4773_v40 = vld [vmem:[#allocation5 + $0xe8] sm:$0xff]  ;;  %v4814_v4 = vld [vmem:[#allocation5 + $0x50] sm:$0xff]  ;;  %v4818_v10 = vld [vmem:[#allocation5 + $0x60] sm:$0xff] }
  0x2e   :  { %v303_v32 = vadd.f32 %v301_v16, %v289_v23  ;;  %vm439_vm14 = vcmp.eq.s32.totalorder %v4701_v1, 14  ;;  %vm453_vm15 = vcmp.eq.s32.totalorder %v4701_v1, 15  ;;  %v399_v43 = vsel %vm397_vm11, %v4747_v27, 0.0  ;;  %s4286_s2 = sshll.u32 %s4665_s0, 4  ;;  %s4287_s2 = int_to_ptr.vmem [resolvable:$true] %s4286_s2 }
  0x2f   :  { %v183_v30 = vmax.f32 %v178_v19, %v4728_v17  ;;  %v4781_v44 = vsel %vm411_vm12, %v4754_v31, 0.0  ;;  %v4786_v46 = vsel %vm425_vm13, %v4764_v37, 0.0  ;;  %v4789_v47 = vsel %vm439_vm14, %v4773_v40, 0.0  ;;  %s4631_s28 = scalar_lea.vmem %s4287_s2, 128  ;;  %p4636_p2 = scmp.lt.s32.totalorder %s4287_s2, %s4287_s2 }
  0x30   :  { %v317_v42 = vadd.f32 %v315_v24, %v303_v32  ;;  %v4792_v48 = vsel %vm453_vm15, %v4775_v41, 0.0  ;;  %v162_v49 = vmax.f32 %v4760_v35, %v4762_v36  ;;  %vm242_vm0 = vcmp.eq.s32.totalorder %v4770_v38, 0  ;;  %v4827_v24 = vld [vmem:[#allocation5 + $0x70] sm:$0xff]  ;;  %p4632_p1 = scmp.ne.s32.totalorder %s4287_s2, %s4631_s28  ;;  %p4637_p3 = scmp.lt.s32.totalorder %s4631_s28, %s4631_s28 }
  0x31   :  { %v188_v39 = vmax.f32 %v183_v30, %v4730_v18  ;;  %vm256_vm1 = vcmp.eq.s32.totalorder %v4770_v38, 1  ;;  %v244_v54 = vsel %vm242_vm0, %v4760_v35, 0.0  ;;  %vm270_vm2 = vcmp.eq.s32.totalorder %v4770_v38, 2  ;;  %v4835_v30 = vld [vmem:[#allocation5 + $0x90] sm:$0xff] }
  0x32   :  { %v331_v51 = vadd.f32 %v329_v25, %v317_v42  ;;  %v167_v53 = vmax.f32 %v162_v49, %v4783_v45  ;;  %v258_v55 = vsel %vm256_vm1, %v4762_v36, 0.0  ;;  %v272_v60 = vsel %vm270_vm2, %v4783_v45, 0.0  ;;  %v4839_v42 = vld [vmem:[#allocation5 + $0xa0] sm:$0xff]  ;;  %p4638_p4 = por %p4637_p3, %p4636_p2 }
  0x33   :  { %v193_v50 = vmax.f32 %v188_v39, %v4737_v20  ;;  %v260_v59 = vadd.f32 %v258_v55, %v244_v54  ;;  %vm284_vm3 = vcmp.eq.s32.totalorder %v4770_v38, 3  ;;  %vm298_vm4 = vcmp.eq.s32.totalorder %v4770_v38, 4 }
  0x34   :  { %v345_v57 = vadd.f32 %v343_v28, %v331_v51  ;;  %v172_v61 = vmax.f32 %v167_v53, %v4797_v52  ;;  %vm312_vm5 = vcmp.eq.s32.totalorder %v4770_v38, 5  ;;  %v286_v8 = vsel %vm284_vm3, %v4797_v52, 0.0  ;;  %p4639_p5 = pnand %p4638_p4, %p4632_p1 }
  0x35   :  { %v198_v56 = vmax.f32 %v193_v50, %v4739_v21  ;;  %v274_v7 = vadd.f32 %v272_v60, %v260_v59  ;;  %v300_v11 = vsel %vm298_vm4, %v4806_v58, 0.0  ;;  %v314_v13 = vsel %vm312_vm5, %v4814_v4, 0.0  ;;  %v4858_v60 = vld [vmem:[#allocation5 + $0xc0] sm:$0xff] }
  0x36   :  { %v359_v63 = vadd.f32 %v357_v29, %v345_v57  ;;  %v177_v9 = vmax.f32 %v172_v61, %v4806_v58  ;;  %vm326_vm6 = vcmp.eq.s32.totalorder %v4770_v38, 6  ;;  %vm57_vm7 = vcmp.gt.s32.totalorder %v4701_v1, 0  ;;  %v4833_v29 = vld [vmem:[#allocation5 + $0x80] sm:$0xff] }
  0x37   :  { %v203_v62 = vmax.f32 %v198_v56, %v4741_v22  ;;  %v288_v16 = vadd.f32 %v286_v8, %v274_v7  ;;  %v328_v19 = vsel %vm326_vm6, %v4818_v10, 0.0  ;;  %vm340_vm8 = vcmp.eq.s32.totalorder %v4770_v38, 7  ;;  %v4851_v56 = vld [vmem:[#allocation5 + $0xb0] sm:$0xff] }
  0x38   :  { %v373_v15 = vadd.f32 %v371_v33, %v359_v63  ;;  %v182_v23 = vmax.f32 %v177_v9, %v4814_v4  ;;  %vm354_vm9 = vcmp.eq.s32.totalorder %v4770_v38, 8  ;;  %vm368_vm10 = vcmp.eq.s32.totalorder %v4770_v38, 9  ;;  %v4864_v63 = vld [vmem:[#allocation5 + $0xe0] sm:$0xff] }
  0x39   :  { %v208_v14 = vmax.f32 %v203_v62, %v4745_v26  ;;  %v302_v32 = vadd.f32 %v300_v11, %v288_v16  ;;  %v342_v33 = vsel %vm340_vm8, %v4827_v24, 0.0  ;;  %v356_v49 = vsel %vm354_vm9, %v4833_v29, 0.0 }
  0x3a   :  { %v387_v28 = vadd.f32 %v385_v34, %v373_v15  ;;  %v187_v39 = vmax.f32 %v182_v23, %v4818_v10  ;;  %v4843_v50 = vsel %vm368_vm10, %v4835_v30, 0.0  ;;  %vm382_vm11 = vcmp.eq.s32.totalorder %v4770_v38, 10  ;;  %v4877_v15 = vld [vmem:[#allocation5 + $0xf0] sm:$0xff] }
  0x3b   :  { %v213_v25 = vmax.f32 %v208_v14, %v4747_v27  ;;  %v316_v53 = vadd.f32 %v314_v13, %v302_v32  ;;  %v4848_v54 = vsel %vm382_vm11, %v4839_v42, 0.0  ;;  %vm396_vm12 = vcmp.eq.s32.totalorder %v4770_v38, 11 }
  0x3c   :  { %v401_v51 = vadd.f32 %v399_v43, %v387_v28  ;;  %v192_v55 = vmax.f32 %v187_v39, %v4827_v24  ;;  %vm410_vm13 = vcmp.eq.s32.totalorder %v4770_v38, 12  ;;  %vm424_vm14 = vcmp.eq.s32.totalorder %v4770_v38, 13  ;;  %v4860_v43 = vld [vmem:[#allocation5 + $0xd0] sm:$0xff] }
  0x3d   :  { %v218_v34 = vmax.f32 %v213_v25, %v4754_v31  ;;  %v330_v61 = vadd.f32 %v328_v19, %v316_v53  ;;  %v398_v62 = vsel %vm396_vm12, %v4851_v56, 0.0  ;;  %vm56_vm15 = vcmp.gt.s32.totalorder %v4770_v38, 0 }
  0x3e   :  { %v415_v59 = vadd.f32 %v4781_v44, %v401_v51  ;;  %v412_v7 = vsel %vm410_vm13, %v4858_v60, 0.0  ;;  %v4868_v8 = vsel %vm424_vm14, %v4860_v43, 0.0  ;;  %vm438_vm0 = vcmp.eq.s32.totalorder %v4770_v38, 14 }
  0x3f   :  { %v223_v57 = vmax.f32 %v218_v34, %v4764_v37  ;;  %v344_v11 = vadd.f32 %v342_v33, %v330_v61  ;;  %v4874_v13 = vsel %vm438_vm0, %v4864_v63, 0.0  ;;  %v197_v14 = vmax.f32 %v192_v55, %v4833_v29 }
  0x40   :  { %v429_v9 = vadd.f32 %v4786_v46, %v415_v59  ;;  %vm452_vm1 = vcmp.eq.s32.totalorder %v4770_v38, 15  ;;  %v4663_v16 = vmov 0.0   ;;  %v4664_v38 = vmov 0  }
  0x41   :  { %v228_v44 = vmax.f32 %v223_v57, %v4773_v40  ;;  %v4883_v19 = vsel %vm56_vm15, 1.0, %v4663_v16  ;;  %v4888_v46 = vsel %vm57_vm7, 1.0, %v4663_v16  ;;  %v358_v28 = vadd.f32 %v356_v49, %v344_v11  ;;  %4502 = vset.pattern.permute.xlu1 %v4664_v38  ;;  %4501 = vset.pattern.permute.xlu0 %v4664_v38 }
  0x42   :  { %v443_v25 = vadd.f32 %v4789_v47, %v429_v9  ;;  %v4895_v32 = vsel %vm452_vm1, %v4877_v15, 0.0  ;;  %v62_v33 = vadd.f32 %v4888_v46, %v4883_v19  ;;  %v202_v49 = vmax.f32 %v197_v14, %v4835_v30 }
  0x43   :  { %v4891_v23 = vmax.f32 %v228_v44, %v4775_v41 }
  0x44   :  { %63 = vadd.xlane.f32.xlu0 %v62_v33 }
  0x45   :  { %v235_v39 = vsub.f32 %v4703_v2, %v4891_v23  ;;  %v249_v34 = vsub.f32 %v4705_v3, %v4891_v23  ;;  %v263_v51 = vsub.f32 %v4709_v5, %v4891_v23  ;;  %v277_v53 = vsub.f32 %v4713_v6, %v4891_v23 }
  0x46   :  { %v291_v47 = vsub.f32 %v4721_v12, %v4891_v23  ;;  %v305_v2 = vsub.f32 %v4728_v17, %v4891_v23  ;;  %v319_v5 = vsub.f32 %v4730_v18, %v4891_v23  ;;  %v207_v6 = vmax.f32 %v202_v49, %v4839_v42 }
  0x47   :  { %v238_v55 = vmul.f32 1.442695, %v235_v39  ;;  %v252_v57 = vmul.f32 1.442695, %v249_v34  ;;  %v266_v59 = vmul.f32 1.442695, %v263_v51  ;;  %v333_v44 = vsub.f32 %v4737_v20, %v4891_v23 }
  0x48   :  { %v280_v61 = vmul.f32 1.442695, %v277_v53  ;;  %v294_v3 = vmul.f32 1.442695, %v291_v47  ;;  %v308_v12 = vmul.f32 1.442695, %v305_v2  ;;  %v347_v9 = vsub.f32 %v4739_v21, %v4891_v23 }
  0x49   :  { %4503 = vpow2.f32 %v238_v55  ;;  %v322_v11 = vmul.f32 1.442695, %v319_v5  ;;  %v4920_v17 = vadd.f32 %v4792_v48, %v443_v25  ;;  %v212_v14 = vmax.f32 %v207_v6, %v4851_v56 }
  0x4a   :  { %4505 = vpow2.f32 %v252_v57  ;;  %v372_v18 = vadd.f32 %v4843_v50, %v358_v28  ;;  %v336_v33 = vmul.f32 1.442695, %v333_v44  ;;  %v361_v39 = vsub.f32 %v4741_v22, %v4891_v23 }
  0x4b   :  { %4507 = vpow2.f32 %v266_v59  ;;  %v217_v34 = vmax.f32 %v212_v14, %v4858_v60  ;;  %v375_v20 = vsub.f32 %v4745_v26, %v4891_v23  ;;  %v350_v51 = vmul.f32 1.442695, %v347_v9 }
  0x4c   :  { %4509 = vpow2.f32 %v280_v61  ;;  %v386_v21 = vadd.f32 %v4848_v54, %v372_v18  ;;  %v389_v48 = vsub.f32 %v4747_v27, %v4891_v23  ;;  %v403_v50 = vsub.f32 %v4754_v31, %v4891_v23 }
  0x4d   :  { %4511 = vpow2.f32 %v294_v3  ;;  %v222_v25 = vmax.f32 %v217_v34, %v4860_v43  ;;  %v364_v22 = vmul.f32 1.442695, %v361_v39  ;;  %v378_v47 = vmul.f32 1.442695, %v375_v20 }
  0x4e   :  { %4513 = vpow2.f32 %v308_v12  ;;  %v400_v28 = vadd.f32 %v398_v62, %v386_v21  ;;  %v392_v54 = vmul.f32 1.442695, %v389_v48  ;;  %v406_v27 = vmul.f32 1.442695, %v403_v50 }
  0x4f   :  { %4515 = vpow2.f32 %v322_v11  ;;  %v227_v53 = vmax.f32 %v222_v25, %v4864_v63  ;;  %v417_v59 = vsub.f32 %v4764_v37, %v4891_v23  ;;  %v431_v31 = vsub.f32 %v4773_v40, %v4891_v23 }
  0x50   :  { %4517 = vpow2.f32 %v336_v33  ;;  %v414_v49 = vadd.f32 %v412_v7, %v400_v28 }
  0x51   :  { %4519 = vpow2.f32 %v350_v51  ;;  %v4937_v55 = vmax.f32 %v227_v53, %v4877_v15  ;;  %v420_v18 = vmul.f32 1.442695, %v417_v59  ;;  %v434_v34 = vmul.f32 1.442695, %v431_v31 }
  0x52   :  { %v428_v62 = vadd.f32 %v4868_v8, %v414_v49  ;;  %4521 = vpow2.f32 %v364_v22 }
  0x53   :  { %v234_v7 = vsub.f32 %v4760_v35, %v4937_v55  ;;  %v248_v3 = vsub.f32 %v4762_v36, %v4937_v55  ;;  %4523 = vpow2.f32 %v378_v47  ;;  %v262_v6 = vsub.f32 %v4783_v45, %v4937_v55 }
  0x54   :  { %v276_v37 = vsub.f32 %v4797_v52, %v4937_v55  ;;  %v290_v40 = vsub.f32 %v4806_v58, %v4937_v55  ;;  %4525 = vpow2.f32 %v392_v54  ;;  %v304_v36 = vsub.f32 %v4814_v4, %v4937_v55 }
  0x55   :  { %v236_v12 = vmul.f32 1.442695, %v234_v7  ;;  %v250_v44 = vmul.f32 1.442695, %v248_v3  ;;  %4527 = vpow2.f32 %v406_v27  ;;  %v264_v35 = vmul.f32 1.442695, %v262_v6 }
  0x56   :  { %v4504_v26 = vpop.eup %4503  ;;  %v278_v11 = vmul.f32 1.442695, %v276_v37  ;;  %v445_v45 = vsub.f32 %v4775_v41, %v4891_v23  ;;  %v292_v58 = vmul.f32 1.442695, %v290_v40  ;;  %v318_v33 = vsub.f32 %v4818_v10, %v4937_v55 }
  0x57   :  { %v4506_v57 = vpop.eup %4505  ;;  %4529 = vpow2.f32 %v236_v12  ;;  %v306_v21 = vmul.f32 1.442695, %v304_v36  ;;  %v332_v4 = vsub.f32 %v4827_v24, %v4937_v55  ;;  %v346_v50 = vsub.f32 %v4833_v29, %v4937_v55 }
  0x58   :  { %v4508_v61 = vpop.eup %4507  ;;  %v255_v2 = vadd.f32 %v4506_v57, %v4504_v26  ;;  %4531 = vpow2.f32 %v250_v44  ;;  %v448_v48 = vmul.f32 1.442695, %v445_v45  ;;  %v320_v25 = vmul.f32 1.442695, %v318_v33 }
  0x59   :  { %v4510_v5 = vpop.eup %4509  ;;  %4533 = vpow2.f32 %v264_v35  ;;  %v442_v10 = vadd.f32 %v4874_v13, %v428_v62  ;;  %v334_v53 = vmul.f32 1.442695, %v332_v4  ;;  %v360_v47 = vsub.f32 %v4835_v30, %v4937_v55 }
  0x5a   :  { %v269_v8 = vadd.f32 %v4508_v61, %v255_v2  ;;  %v4512_v9 = vpop.eup %4511  ;;  %4535 = vpow2.f32 %v278_v11  ;;  %v348_v54 = vmul.f32 1.442695, %v346_v50  ;;  %v374_v29 = vsub.f32 %v4839_v42, %v4937_v55 }
  0x5b   :  { %v4514_v52 = vpop.eup %4513  ;;  %4537 = vpow2.f32 %v420_v18  ;;  %v4968_v49 = vadd.f32 %v4895_v32, %v442_v10  ;;  %v362_v59 = vmul.f32 1.442695, %v360_v47  ;;  %v388_v31 = vsub.f32 %v4851_v56, %v4937_v55 }
  0x5c   :  { %v283_v14 = vadd.f32 %v4510_v5, %v269_v8  ;;  %v4516_v20 = vpop.eup %4515  ;;  %4539 = vpow2.f32 %v292_v58  ;;  %v376_v32 = vmul.f32 1.442695, %v374_v29  ;;  %v402_v2 = vsub.f32 %v4858_v60, %v4937_v55 }
  0x5d   :  { %v4518_v41 = vpop.eup %4517  ;;  %4541 = vpow2.f32 %v434_v34  ;;  %v390_v6 = vmul.f32 1.442695, %v388_v31  ;;  %v416_v37 = vsub.f32 %v4860_v43, %v4937_v55  ;;  %v444_v18 = vsub.f32 %v4877_v15, %v4937_v55 }
  0x5e   :  { %v297_v39 = vadd.f32 %v4512_v9, %v283_v14  ;;  %v4520_v22 = vpop.eup %4519  ;;  %4543 = vpow2.f32 %v306_v21  ;;  %v404_v44 = vmul.f32 1.442695, %v402_v2  ;;  %v430_v9 = vsub.f32 %v4864_v63, %v4937_v55 }
  0x5f   :  { %4545 = vpow2.f32 %v448_v48  ;;  %v4522_v26 = vpop.eup %4521  ;;  %v418_v14 = vmul.f32 1.442695, %v416_v37  ;;  %v446_v63 = vmul.f32 1.442695, %v444_v18 }
  0x60   :  { %v311_v51 = vadd.f32 %v4514_v52, %v297_v39  ;;  %4547 = vpow2.f32 %v320_v25  ;;  %v4524_v57 = vpop.eup %4523  ;;  %v432_v33 = vmul.f32 1.442695, %v430_v9 }
  0x61   :  { %v4526_v13 = vpop.eup %4525  ;;  %4549 = vpow2.f32 %v334_v53 }
  0x62   :  { %v325_v28 = vadd.f32 %v4516_v20, %v311_v51  ;;  %v4528_v30 = vpop.eup %4527  ;;  %4551 = vpow2.f32 %v348_v54 }
  0x63   :  { %4553 = vpow2.f32 %v362_v59 }
  0x64   :  { %v339_v24 = vadd.f32 %v4518_v41, %v325_v28  ;;  %v4530_v61 = vpop.eup %4529  ;;  %4555 = vpow2.f32 %v376_v32 }
  0x65   :  { %v4532_v7 = vpop.eup %4531  ;;  %4557 = vpow2.f32 %v390_v6 }
  0x66   :  { %v353_v27 = vadd.f32 %v4520_v22, %v339_v24  ;;  %v4534_v5 = vpop.eup %4533  ;;  %v254_v42 = vadd.f32 %v4532_v7, %v4530_v61  ;;  %4559 = vpow2.f32 %v404_v44 }
  0x67   :  { %v4536_v40 = vpop.eup %4535  ;;  %4561 = vpow2.f32 %v418_v14 }
  0x68   :  { %v367_v62 = vadd.f32 %v4522_v26, %v353_v27  ;;  %v4538_v56 = vpop.eup %4537  ;;  %v268_v12 = vadd.f32 %v4534_v5, %v254_v42  ;;  %4563 = vpow2.f32 %v432_v33 }
  0x69   :  { %v4540_v35 = vpop.eup %4539 }
  0x6a   :  { %v381_v3 = vadd.f32 %v4524_v57, %v367_v62  ;;  %v4542_v11 = vpop.eup %4541  ;;  %v282_v36 = vadd.f32 %v4536_v40, %v268_v12 }
  0x6b   :  { %v4544_v45 = vpop.eup %4543 }
  0x6c   :  { %v395_v8 = vadd.f32 %v4526_v13, %v381_v3  ;;  %v4546_v52 = vpop.eup %4545  ;;  %v296_v58 = vadd.f32 %v4540_v35, %v282_v36 }
  0x6d   :  { %v4548_v39 = vpop.eup %4547 }
  0x6e   :  { %v409_v60 = vadd.f32 %v4528_v30, %v395_v8  ;;  %v310_v20 = vadd.f32 %v4544_v45, %v296_v58  ;;  %v4550_v21 = vpop.eup %4549 }
  0x6f   :  { %v4552_v48 = vpop.eup %4551 }
  0x70   :  { %v423_v43 = vadd.f32 %v4538_v56, %v409_v60  ;;  %v324_v51 = vadd.f32 %v4548_v39, %v310_v20  ;;  %v4554_v15 = vpop.eup %4553 }
  0x71   :  { %v4556_v50 = vpop.eup %4555 }
  0x72   :  { %v437_v34 = vadd.f32 %v4542_v11, %v423_v43  ;;  %v338_v41 = vadd.f32 %v4550_v21, %v324_v51  ;;  %v4558_v10 = vpop.eup %4557 }
  0x73   :  { %v4560_v53 = vpop.eup %4559 }
  0x74   :  { %v451_v4 = vadd.f32 %v4546_v52, %v437_v34  ;;  %v352_v25 = vadd.f32 %v4552_v48, %v338_v41  ;;  %v4562_v24 = vpop.eup %4561 }
  0x75   :  { %v4564_v54 = vpop.eup %4563 }
  0x76   :  { %4565 = vlog2.f32 %v451_v4  ;;  %v366_v28 = vadd.f32 %v4554_v15, %v352_v25 }
  0x77   :  { %4567 = vpow2.f32 %v446_v63 }
  0x78   :  { %v380_v22 = vadd.f32 %v4556_v50, %v366_v28 }
  0x7a   :  { %v394_v47 = vadd.f32 %v4558_v10, %v380_v22 }
  0x7c   :  { %v408_v26 = vadd.f32 %v4560_v53, %v394_v47 }
  0x7e   :  { %v422_v57 = vadd.f32 %v4562_v24, %v408_v26 }
  0x80   :  { %v436_v59 = vadd.f32 %v4564_v54, %v422_v57 }
  0x83   :  { %v4566_v29 = vpop.eup %4565 }
  0x84   :  { %v4568_v27 = vpop.eup %4567  ;;  %v461_v13 = vmul.f32 0.6931472, %v4566_v29 }
  0x85   :  { %v450_v30 = vadd.f32 %v4568_v27, %v436_v59 }
  0x86   :  { %v463_v31 = vadd.f32 %v461_v13, %v4891_v23 }
  0x87   :  { %4569 = vlog2.f32 %v450_v30 }
  0x88   :  { %v4984_v62 = vsub.f32 %v463_v31, %v4920_v17 }
  0x8a   :  { %v467_v61 = vmax.f32 %v4984_v62, 0.0 }
  0x8c   :  { %v4989_v32 = vsel %vm57_vm7, 0.0, %v467_v61 }
  0x8d   :  { %vm475_vm2 = vcmp.ge.s32.totalorder %v4989_v32, 536870912  ;;  %vm551_vm3 = vcmp.ge.s32.totalorder %v4989_v32, 1073741824  ;;  %vm627_vm4 = vcmp.ge.s32.totalorder %v4989_v32, 1610612736 }
  0x8e   :  { %4308 = vmatprep.mubr.msk.f32.mxu0 %vm475_vm2, %v4662_v0  ;;  %4312 = vmatprep.mubr.msk.f32.mxu1 %vm551_vm3, %v4662_v0 }
  0x94   :  { %v4570_v23 = vpop.eup %4569 }
  0x95   :  { %v459_v2 = vmul.f32 0.6931472, %v4570_v23 }
  0x97   :  { %v462_v17 = vadd.f32 %v459_v2, %v4937_v55 }
  0x99   :  { %v4997_v7 = vsub.f32 %v462_v17, %v4968_v49 }
  0x9b   :  { %v466_v3 = vmax.f32 %v4997_v7, 0.0 }
  0x9d   :  { %v5002_v1 = vsel %vm56_vm15, 0.0, %v466_v3 }
  0x9e   :  { %vm474_vm5 = vcmp.ge.s32.totalorder %v5002_v1, 536870912  ;;  %vm550_vm6 = vcmp.ge.s32.totalorder %v5002_v1, 1073741824  ;;  %vm626_vm7 = vcmp.ge.s32.totalorder %v5002_v1, 1610612736 }
  0x9f   :  { %4309 = vmatmul.mubr.msk.f32.vlgmr.msra.gmra.mxu0 %vm474_vm5, %v4662_v0  ;;  %4313 = vmatmul.mubr.msk.f32.vlgmr.msra.gmra.mxu1 %vm550_vm6, %v4662_v0 }
  0xa0   :  { %663 = vmatpush1.xpose.msra.mxu0 %v4662_v0  ;;  %4316 = vmatprep.mubr.msk.f32.mxu0 %vm627_vm4, %v4662_v0 }
  0xa1   :  { %751 = vmatpush1.xpose.msra.mxu1 %v4662_v0  ;;  %829 = vmatprep.subr.mxu0 %v4662_v0 }
  0xa2   :  { %908 = vmatprep.subr.mxu1 %v4662_v0 }
  0xa3   :  { %4317 = vmatmul.mubr.msk.f32.vlgmr.msra.gmra.mxu0 %vm626_vm7, %v4662_v0 }
  0xa4   :  { %830 = vmatpush1.xpose.msra.mxu0 %v4662_v0 }
  0xa5   :  { %996 = vmatprep.subr.mxu0 %v4662_v0 }
  0xcd   :  { %v5018_v55 = vpop.xlane.xlu0 %63 }
  0xce   :  { %v470_v49 = vmul.f32 3.0, %v5018_v55 }
  0xd0   :  { %v5021_v5 = vmin.f32 %v470_v49, 255.0 }
 0x15f   :  { %v546_v42 = vpop.f32.mrf.mxu0  ;;  %v622_v6 = vpop.f32.mrf.mxu1 }
 0x160   :  { %vm704_vm8 = vcmp.ge.f32.partialorder %v546_v42, %v5021_v5  ;;  %vm703_vm9 = vcmp.ge.f32.partialorder %v622_v6, %v5021_v5 }
 0x161   :  { %v705_v37 = vsel %vm704_vm8, 536870912, %v4664_v38  ;;  %v548_v40 = vpop.f32.mrf.mxu0  ;;  %v624_v8 = vpop.f32.mrf.mxu1 }
 0x162   :  { %v706_v12 = vsel %vm703_vm9, 1073741824, %v705_v37 }
 0x163   :  { %v698_v56 = vpop.f32.mrf.mxu0 }
 0x164   :  { %vm702_vm10 = vcmp.ge.f32.partialorder %v698_v56, %v5021_v5 }
 0x165   :  { %v707_v44 = vsel %vm702_vm10, 1610612736, %v706_v12  ;;  %v700_v9 = vpop.f32.mrf.mxu0 }
 0x166   :  { %v709_v35 = vor.u32 268435456, %v707_v44  ;;  %v708_v60 = vor.u32 134217728, %v707_v44  ;;  %v710_v11 = vor.u32 402653184, %v707_v44 }
 0x168   :  { %791 = vperm.xlu1 %4502, %v709_v35   ;;  %712 = vperm.xlu0 %4501, %v708_v60  }
 0x16c   :  { %870 = vperm.xlu1 %4502, %v710_v11  }
 0x1e3   :  { %v792_v36 = vpop.permute.xlu1 %791  ;;  %v713_v14 = vpop.permute.xlu0 %712 }
 0x1e4   :  { %vm793_vm11 = vcmp.ge.s32.totalorder %v5002_v1, %v792_v36  ;;  %vm794_vm12 = vcmp.ge.s32.totalorder %v4989_v32, %v792_v36  ;;  %vm714_vm13 = vcmp.ge.s32.totalorder %v5002_v1, %v713_v14  ;;  %vm715_vm14 = vcmp.ge.s32.totalorder %v4989_v32, %v713_v14 }
 0x1e5   :  { %4320 = vmatprep.mubr.msk.f32.mxu1 %vm715_vm14, %v4662_v0  ;;  %4324 = vmatprep.mubr.msk.f32.mxu0 %vm794_vm12, %v4662_v0 }
 0x1e6   :  { %4321 = vmatmul.mubr.msk.f32.vlgmr.msra.gmra.mxu1 %vm714_vm13, %v4662_v0  ;;  %4325 = vmatmul.mubr.msk.f32.vlgmr.msra.gmra.mxu0 %vm793_vm11, %v4662_v0 }
 0x1e7   :  { %909 = vmatpush1.xpose.msra.mxu1 %v4662_v0  ;;  %v871_v18 = vpop.permute.xlu1 %870  ;;  %997 = vmatpush1.xpose.msra.mxu0 %v4662_v0 }
 0x1e8   :  { %vm872_vm15 = vcmp.ge.s32.totalorder %v5002_v1, %v871_v18  ;;  %vm873_vm0 = vcmp.ge.s32.totalorder %v4989_v32, %v871_v18  ;;  %1075 = vmatprep.subr.mxu1 %v4662_v0  ;;  %1154 = vmatprep.subr.mxu0 %v4662_v0 }
 0x1e9   :  { %4328 = vmatprep.mubr.msk.f32.mxu1 %vm873_vm0, %v4662_v0 }
 0x1ea   :  { %4329 = vmatmul.mubr.msk.f32.vlgmr.msra.gmra.mxu1 %vm872_vm15, %v4662_v0 }
 0x1eb   :  { %1076 = vmatpush1.xpose.msra.mxu1 %v4662_v0 }
 0x1ec   :  { %1242 = vmatprep.subr.mxu1 %v4662_v0 }
 0x2a6   :  { %v786_v45 = vpop.f32.mrf.mxu1  ;;  %v865_v43 = vpop.f32.mrf.mxu0 }
 0x2a7   :  { %vm950_vm1 = vcmp.ge.f32.partialorder %v786_v45, %v5021_v5  ;;  %vm949_vm2 = vcmp.ge.f32.partialorder %v865_v43, %v5021_v5 }
 0x2a8   :  { %v951_v52 = vsel %vm950_vm1, %v708_v60, %v707_v44  ;;  %v788_v58 = vpop.f32.mrf.mxu1  ;;  %v867_v33 = vpop.f32.mrf.mxu0 }
 0x2a9   :  { %v952_v34 = vsel %vm949_vm2, %v709_v35, %v951_v52 }
 0x2aa   :  { %v944_v39 = vpop.f32.mrf.mxu1 }
 0x2ab   :  { %vm948_vm3 = vcmp.ge.f32.partialorder %v944_v39, %v5021_v5 }
 0x2ac   :  { %v953_v20 = vsel %vm948_vm3, %v710_v11, %v952_v34  ;;  %v946_v63 = vpop.f32.mrf.mxu1 }
 0x2ad   :  { %v954_v21 = vor.u32 33554432, %v953_v20  ;;  %v955_v4 = vor.u32 67108864, %v953_v20  ;;  %v956_v51 = vor.u32 100663296, %v953_v20 }
 0x2af   :  { %958 = vperm.xlu1 %4502, %v954_v21  }
 0x2b3   :  { %1037 = vperm.xlu1 %4502, %v955_v4  }
 0x2b7   :  { %1116 = vperm.xlu1 %4502, %v956_v51  }
 0x32a   :  { %v959_v48 = vpop.permute.xlu1 %958 }
 0x32b   :  { %vm960_vm4 = vcmp.ge.s32.totalorder %v5002_v1, %v959_v48  ;;  %vm961_vm5 = vcmp.ge.s32.totalorder %v4989_v32, %v959_v48 }
 0x32c   :  { %4332 = vmatprep.mubr.msk.f32.mxu0 %vm961_vm5, %v4662_v0 }
 0x32d   :  { %4333 = vmatmul.mubr.msk.f32.vlgmr.msra.gmra.mxu0 %vm960_vm4, %v4662_v0 }
 0x32e   :  { %v1038_v41 = vpop.permute.xlu1 %1037  ;;  %1155 = vmatpush1.xpose.msra.mxu0 %v4662_v0 }
 0x32f   :  { %vm1039_vm6 = vcmp.ge.s32.totalorder %v5002_v1, %v1038_v41  ;;  %vm1040_vm7 = vcmp.ge.s32.totalorder %v4989_v32, %v1038_v41  ;;  %1321 = vmatprep.subr.mxu0 %v4662_v0 }
 0x330   :  { %4336 = vmatprep.mubr.msk.f32.mxu1 %vm1040_vm7, %v4662_v0 }
 0x331   :  { %4337 = vmatmul.mubr.msk.f32.vlgmr.msra.gmra.mxu1 %vm1039_vm6, %v4662_v0 }
 0x332   :  { %v1117_v15 = vpop.permute.xlu1 %1116  ;;  %1243 = vmatpush1.xpose.msra.mxu1 %v4662_v0 }
 0x333   :  { %vm1118_vm8 = vcmp.ge.s32.totalorder %v5002_v1, %v1117_v15  ;;  %vm1119_vm9 = vcmp.ge.s32.totalorder %v4989_v32, %v1117_v15  ;;  %1400 = vmatprep.subr.mxu1 %v4662_v0 }
 0x334   :  { %4340 = vmatprep.mubr.msk.f32.mxu0 %vm1119_vm9, %v4662_v0 }
 0x335   :  { %4341 = vmatmul.mubr.msk.f32.vlgmr.msra.gmra.mxu0 %vm1118_vm8, %v4662_v0 }
 0x336   :  { %1322 = vmatpush1.xpose.msra.mxu0 %v4662_v0 }
 0x337   :  { %1488 = vmatprep.subr.mxu0 %v4662_v0 }
 0x3ed   :  { %v1032_v25 = vpop.f32.mrf.mxu0 }
 0x3ee   :  { %vm1196_vm10 = vcmp.ge.f32.partialorder %v1032_v25, %v5021_v5 }
 0x3ef   :  { %v1034_v50 = vpop.f32.mrf.mxu0  ;;  %v1197_v22 = vsel %vm1196_vm10, %v954_v21, %v953_v20 }
 0x3f1   :  { %v1111_v28 = vpop.f32.mrf.mxu1 }
 0x3f2   :  { %vm1195_vm11 = vcmp.ge.f32.partialorder %v1111_v28, %v5021_v5 }
 0x3f3   :  { %v1113_v10 = vpop.f32.mrf.mxu1  ;;  %v1198_v47 = vsel %vm1195_vm11, %v955_v4, %v1197_v22 }
 0x3f5   :  { %v1190_v53 = vpop.f32.mrf.mxu0 }
 0x3f6   :  { %vm1194_vm12 = vcmp.ge.f32.partialorder %v1190_v53, %v5021_v5 }
 0x3f7   :  { %v1199_v24 = vsel %vm1194_vm12, %v956_v51, %v1198_v47  ;;  %v1192_v26 = vpop.f32.mrf.mxu0 }
 0x3f8   :  { %v1200_v54 = vor.u32 8388608, %v1199_v24  ;;  %v1201_v29 = vor.u32 16777216, %v1199_v24  ;;  %v1202_v57 = vor.u32 25165824, %v1199_v24 }
 0x3fa   :  { %1204 = vperm.xlu1 %4502, %v1200_v54  }
 0x3fe   :  { %1283 = vperm.xlu1 %4502, %v1201_v29  }
 0x402   :  { %1362 = vperm.xlu1 %4502, %v1202_v57  }
 0x475   :  { %v1205_v27 = vpop.permute.xlu1 %1204 }
 0x476   :  { %vm1206_vm13 = vcmp.ge.s32.totalorder %v5002_v1, %v1205_v27  ;;  %vm1207_vm14 = vcmp.ge.s32.totalorder %v4989_v32, %v1205_v27 }
 0x477   :  { %4344 = vmatprep.mubr.msk.f32.mxu1 %vm1207_vm14, %v4662_v0 }
 0x478   :  { %4345 = vmatmul.mubr.msk.f32.vlgmr.msra.gmra.mxu1 %vm1206_vm13, %v4662_v0 }
 0x479   :  { %v1284_v13 = vpop.permute.xlu1 %1283  ;;  %1401 = vmatpush1.xpose.msra.mxu1 %v4662_v0 }
 0x47a   :  { %vm1285_vm15 = vcmp.ge.s32.totalorder %v5002_v1, %v1284_v13  ;;  %vm1286_vm0 = vcmp.ge.s32.totalorder %v4989_v32, %v1284_v13  ;;  %1567 = vmatprep.subr.mxu1 %v4662_v0 }
 0x47b   :  { %4348 = vmatprep.mubr.msk.f32.mxu0 %vm1286_vm0, %v4662_v0 }
 0x47c   :  { %4349 = vmatmul.mubr.msk.f32.vlgmr.msra.gmra.mxu0 %vm1285_vm15, %v4662_v0 }
 0x47d   :  { %v1363_v59 = vpop.permute.xlu1 %1362  ;;  %1489 = vmatpush1.xpose.msra.mxu0 %v4662_v0 }
 0x47e   :  { %vm1364_vm1 = vcmp.ge.s32.totalorder %v5002_v1, %v1363_v59  ;;  %vm1365_vm2 = vcmp.ge.s32.totalorder %v4989_v32, %v1363_v59  ;;  %1646 = vmatprep.subr.mxu0 %v4662_v0 }
 0x47f   :  { %4352 = vmatprep.mubr.msk.f32.mxu1 %vm1365_vm2, %v4662_v0 }
 0x480   :  { %4353 = vmatmul.mubr.msk.f32.vlgmr.msra.gmra.mxu1 %vm1364_vm1, %v4662_v0 }
 0x481   :  { %1568 = vmatpush1.xpose.msra.mxu1 %v4662_v0 }
 0x482   :  { %1734 = vmatprep.subr.mxu1 %v4662_v0 }
 0x538   :  { %v1278_v31 = vpop.f32.mrf.mxu1 }
 0x539   :  { %vm1442_vm3 = vcmp.ge.f32.partialorder %v1278_v31, %v5021_v5 }
 0x53a   :  { %v1280_v30 = vpop.f32.mrf.mxu1  ;;  %v1443_v2 = vsel %vm1442_vm3, %v1200_v54, %v1199_v24 }
 0x53c   :  { %v1357_v61 = vpop.f32.mrf.mxu0 }
 0x53d   :  { %vm1441_vm4 = vcmp.ge.f32.partialorder %v1357_v61, %v5021_v5 }
 0x53e   :  { %v1359_v23 = vpop.f32.mrf.mxu0  ;;  %v1444_v3 = vsel %vm1441_vm4, %v1201_v29, %v1443_v2 }
 0x540   :  { %v1436_v17 = vpop.f32.mrf.mxu1 }
 0x541   :  { %vm1440_vm5 = vcmp.ge.f32.partialorder %v1436_v17, %v5021_v5 }
 0x542   :  { %v1445_v38 = vsel %vm1440_vm5, %v1202_v57, %v1444_v3  ;;  %v1438_v49 = vpop.f32.mrf.mxu1 }
 0x543   :  { %v1446_v42 = vor.u32 2097152, %v1445_v38  ;;  %v1447_v6 = vor.u32 4194304, %v1445_v38  ;;  %v1448_v37 = vor.u32 6291456, %v1445_v38 }
 0x545   :  { %1450 = vperm.xlu1 %4502, %v1446_v42  }
 0x549   :  { %1529 = vperm.xlu1 %4502, %v1447_v6  }
 0x54d   :  { %1608 = vperm.xlu1 %4502, %v1448_v37  }
 0x5c0   :  { %v1451_v40 = vpop.permute.xlu1 %1450 }
 0x5c1   :  { %vm1452_vm6 = vcmp.ge.s32.totalorder %v5002_v1, %v1451_v40  ;;  %vm1453_vm7 = vcmp.ge.s32.totalorder %v4989_v32, %v1451_v40 }
 0x5c2   :  { %4356 = vmatprep.mubr.msk.f32.mxu0 %vm1453_vm7, %v4662_v0 }
 0x5c3   :  { %4357 = vmatmul.mubr.msk.f32.vlgmr.msra.gmra.mxu0 %vm1452_vm6, %v4662_v0 }
 0x5c4   :  { %v1530_v8 = vpop.permute.xlu1 %1529  ;;  %1647 = vmatpush1.xpose.msra.mxu0 %v4662_v0 }
 0x5c5   :  { %vm1531_vm8 = vcmp.ge.s32.totalorder %v5002_v1, %v1530_v8  ;;  %vm1532_vm9 = vcmp.ge.s32.totalorder %v4989_v32, %v1530_v8  ;;  %1813 = vmatprep.subr.mxu0 %v4662_v0 }
 0x5c6   :  { %4360 = vmatprep.mubr.msk.f32.mxu1 %vm1532_vm9, %v4662_v0 }
 0x5c7   :  { %4361 = vmatmul.mubr.msk.f32.vlgmr.msra.gmra.mxu1 %vm1531_vm8, %v4662_v0 }
 0x5c8   :  { %v1609_v56 = vpop.permute.xlu1 %1608  ;;  %1735 = vmatpush1.xpose.msra.mxu1 %v4662_v0 }
 0x5c9   :  { %vm1610_vm10 = vcmp.ge.s32.totalorder %v5002_v1, %v1609_v56  ;;  %vm1611_vm11 = vcmp.ge.s32.totalorder %v4989_v32, %v1609_v56  ;;  %1892 = vmatprep.subr.mxu1 %v4662_v0 }
 0x5ca   :  { %4364 = vmatprep.mubr.msk.f32.mxu0 %vm1611_vm11, %v4662_v0 }
 0x5cb   :  { %4365 = vmatmul.mubr.msk.f32.vlgmr.msra.gmra.mxu0 %vm1610_vm10, %v4662_v0 }
 0x5cc   :  { %1814 = vmatpush1.xpose.msra.mxu0 %v4662_v0 }
 0x5cd   :  { %1980 = vmatprep.subr.mxu0 %v4662_v0 }
 0x683   :  { %v1524_v12 = vpop.f32.mrf.mxu0 }
 0x684   :  { %vm1688_vm12 = vcmp.ge.f32.partialorder %v1524_v12, %v5021_v5 }
 0x685   :  { %v1526_v44 = vpop.f32.mrf.mxu0  ;;  %v1689_v60 = vsel %vm1688_vm12, %v1446_v42, %v1445_v38 }
 0x687   :  { %v1603_v9 = vpop.f32.mrf.mxu1 }
 0x688   :  { %vm1687_vm13 = vcmp.ge.f32.partialorder %v1603_v9, %v5021_v5 }
 0x689   :  { %v1605_v35 = vpop.f32.mrf.mxu1  ;;  %v1690_v36 = vsel %vm1687_vm13, %v1447_v6, %v1689_v60 }
 0x68b   :  { %v1682_v11 = vpop.f32.mrf.mxu0 }
 0x68c   :  { %vm1686_vm14 = vcmp.ge.f32.partialorder %v1682_v11, %v5021_v5 }
 0x68d   :  { %v1691_v14 = vsel %vm1686_vm14, %v1448_v37, %v1690_v36  ;;  %v1684_v18 = vpop.f32.mrf.mxu0 }
 0x68e   :  { %v1693_v45 = vor.u32 1048576, %v1691_v14  ;;  %v1692_v43 = vor.u32 524288, %v1691_v14  ;;  %v1694_v52 = vor.u32 1572864, %v1691_v14 }
 0x690   :  { %1775 = vperm.xlu0 %4501, %v1693_v45   ;;  %1696 = vperm.xlu1 %4502, %v1692_v43  }
 0x694   :  { %1854 = vperm.xlu1 %4502, %v1694_v52  }
 0x70b   :  { %v1776_v58 = vpop.permute.xlu0 %1775  ;;  %v1697_v33 = vpop.permute.xlu1 %1696 }
 0x70c   :  { %vm1777_vm15 = vcmp.ge.s32.totalorder %v5002_v1, %v1776_v58  ;;  %vm1778_vm0 = vcmp.ge.s32.totalorder %v4989_v32, %v1776_v58  ;;  %vm1698_vm1 = vcmp.ge.s32.totalorder %v5002_v1, %v1697_v33  ;;  %vm1699_vm2 = vcmp.ge.s32.totalorder %v4989_v32, %v1697_v33 }
 0x70d   :  { %4368 = vmatprep.mubr.msk.f32.mxu1 %vm1699_vm2, %v4662_v0  ;;  %4372 = vmatprep.mubr.msk.f32.mxu0 %vm1778_vm0, %v4662_v0 }
 0x70e   :  { %4369 = vmatmul.mubr.msk.f32.vlgmr.msra.gmra.mxu1 %vm1698_vm1, %v4662_v0  ;;  %4373 = vmatmul.mubr.msk.f32.vlgmr.msra.gmra.mxu0 %vm1777_vm15, %v4662_v0 }
 0x70f   :  { %1893 = vmatpush1.xpose.msra.mxu1 %v4662_v0  ;;  %v1855_v39 = vpop.permute.xlu1 %1854  ;;  %1981 = vmatpush1.xpose.msra.mxu0 %v4662_v0 }
 0x710   :  { %vm1856_vm3 = vcmp.ge.s32.totalorder %v5002_v1, %v1855_v39  ;;  %vm1857_vm4 = vcmp.ge.s32.totalorder %v4989_v32, %v1855_v39  ;;  %2059 = vmatprep.subr.mxu1 %v4662_v0  ;;  %2138 = vmatprep.subr.mxu0 %v4662_v0 }
 0x711   :  { %4376 = vmatprep.mubr.msk.f32.mxu1 %vm1857_vm4, %v4662_v0 }
 0x712   :  { %4377 = vmatmul.mubr.msk.f32.vlgmr.msra.gmra.mxu1 %vm1856_vm3, %v4662_v0 }
 0x713   :  { %2060 = vmatpush1.xpose.msra.mxu1 %v4662_v0 }
 0x714   :  { %2226 = vmatprep.subr.mxu1 %v4662_v0 }
 0x7ce   :  { %v1770_v34 = vpop.f32.mrf.mxu1  ;;  %v1849_v20 = vpop.f32.mrf.mxu0 }
 0x7cf   :  { %vm1934_vm5 = vcmp.ge.f32.partialorder %v1770_v34, %v5021_v5  ;;  %vm1933_vm6 = vcmp.ge.f32.partialorder %v1849_v20, %v5021_v5 }
 0x7d0   :  { %v1935_v63 = vsel %vm1934_vm5, %v1692_v43, %v1691_v14  ;;  %v1772_v21 = vpop.f32.mrf.mxu1  ;;  %v1851_v4 = vpop.f32.mrf.mxu0 }
 0x7d1   :  { %v1936_v48 = vsel %vm1933_vm6, %v1693_v45, %v1935_v63 }
 0x7d2   :  { %v1928_v51 = vpop.f32.mrf.mxu1 }
 0x7d3   :  { %vm1932_vm7 = vcmp.ge.f32.partialorder %v1928_v51, %v5021_v5 }
 0x7d4   :  { %v1937_v41 = vsel %vm1932_vm7, %v1694_v52, %v1936_v48  ;;  %v1930_v15 = vpop.f32.mrf.mxu1 }
 0x7d5   :  { %v1939_v25 = vor.u32 262144, %v1937_v41  ;;  %v1938_v50 = vor.u32 131072, %v1937_v41  ;;  %v1940_v28 = vor.u32 393216, %v1937_v41 }
 0x7d7   :  { %2021 = vperm.xlu1 %4502, %v1939_v25   ;;  %1942 = vperm.xlu0 %4501, %v1938_v50  }
 0x7db   :  { %2100 = vperm.xlu0 %4501, %v1940_v28  }
 0x852   :  { %v2022_v10 = vpop.permute.xlu1 %2021  ;;  %v1943_v22 = vpop.permute.xlu0 %1942 }
 0x853   :  { %vm2023_vm8 = vcmp.ge.s32.totalorder %v5002_v1, %v2022_v10  ;;  %vm2024_vm9 = vcmp.ge.s32.totalorder %v4989_v32, %v2022_v10  ;;  %vm1944_vm10 = vcmp.ge.s32.totalorder %v5002_v1, %v1943_v22  ;;  %vm1945_vm11 = vcmp.ge.s32.totalorder %v4989_v32, %v1943_v22 }
 0x854   :  { %4380 = vmatprep.mubr.msk.f32.mxu0 %vm1945_vm11, %v4662_v0  ;;  %4384 = vmatprep.mubr.msk.f32.mxu1 %vm2024_vm9, %v4662_v0 }
 0x855   :  { %4381 = vmatmul.mubr.msk.f32.vlgmr.msra.gmra.mxu0 %vm1944_vm10, %v4662_v0  ;;  %4385 = vmatmul.mubr.msk.f32.vlgmr.msra.gmra.mxu1 %vm2023_vm8, %v4662_v0 }
 0x856   :  { %2139 = vmatpush1.xpose.msra.mxu0 %v4662_v0  ;;  %v2101_v53 = vpop.permute.xlu0 %2100  ;;  %2227 = vmatpush1.xpose.msra.mxu1 %v4662_v0 }
 0x857   :  { %vm2102_vm12 = vcmp.ge.s32.totalorder %v5002_v1, %v2101_v53  ;;  %vm2103_vm13 = vcmp.ge.s32.totalorder %v4989_v32, %v2101_v53  ;;  %2305 = vmatprep.subr.mxu0 %v4662_v0  ;;  %2384 = vmatprep.subr.mxu1 %v4662_v0 }
 0x858   :  { %4388 = vmatprep.mubr.msk.f32.mxu0 %vm2103_vm13, %v4662_v0 }
 0x859   :  { %4389 = vmatmul.mubr.msk.f32.vlgmr.msra.gmra.mxu0 %vm2102_vm12, %v4662_v0 }
 0x85a   :  { %2306 = vmatpush1.xpose.msra.mxu0 %v4662_v0 }
 0x85b   :  { %2472 = vmatprep.subr.mxu0 %v4662_v0 }
 0x915   :  { %v2016_v47 = vpop.f32.mrf.mxu0  ;;  %v2095_v24 = vpop.f32.mrf.mxu1 }
 0x916   :  { %vm2180_vm14 = vcmp.ge.f32.partialorder %v2016_v47, %v5021_v5  ;;  %vm2179_vm15 = vcmp.ge.f32.partialorder %v2095_v24, %v5021_v5 }
 0x917   :  { %v2181_v26 = vsel %vm2180_vm14, %v1938_v50, %v1937_v41  ;;  %v2018_v54 = vpop.f32.mrf.mxu0  ;;  %v2097_v29 = vpop.f32.mrf.mxu1 }
 0x918   :  { %v2182_v27 = vsel %vm2179_vm15, %v1939_v25, %v2181_v26 }
 0x919   :  { %v2174_v57 = vpop.f32.mrf.mxu0 }
 0x91a   :  { %vm2178_vm0 = vcmp.ge.f32.partialorder %v2174_v57, %v5021_v5 }
 0x91b   :  { %v2183_v13 = vsel %vm2178_vm0, %v1940_v28, %v2182_v27  ;;  %v2176_v59 = vpop.f32.mrf.mxu0 }
 0x91c   :  { %v2185_v31 = vor.u32 65536, %v2183_v13  ;;  %v2184_v30 = vor.u32 32768, %v2183_v13  ;;  %v2186_v61 = vor.u32 98304, %v2183_v13 }
 0x91e   :  { %2267 = vperm.xlu0 %4501, %v2185_v31   ;;  %2188 = vperm.xlu1 %4502, %v2184_v30  }
 0x922   :  { %2346 = vperm.xlu1 %4502, %v2186_v61  }
 0x999   :  { %v2268_v23 = vpop.permute.xlu0 %2267  ;;  %v2189_v2 = vpop.permute.xlu1 %2188 }
 0x99a   :  { %vm2269_vm1 = vcmp.ge.s32.totalorder %v5002_v1, %v2268_v23  ;;  %vm2270_vm2 = vcmp.ge.s32.totalorder %v4989_v32, %v2268_v23  ;;  %vm2190_vm3 = vcmp.ge.s32.totalorder %v5002_v1, %v2189_v2  ;;  %vm2191_vm4 = vcmp.ge.s32.totalorder %v4989_v32, %v2189_v2 }
 0x99b   :  { %4392 = vmatprep.mubr.msk.f32.mxu1 %vm2191_vm4, %v4662_v0  ;;  %4396 = vmatprep.mubr.msk.f32.mxu0 %vm2270_vm2, %v4662_v0 }
 0x99c   :  { %4393 = vmatmul.mubr.msk.f32.vlgmr.msra.gmra.mxu1 %vm2190_vm3, %v4662_v0  ;;  %4397 = vmatmul.mubr.msk.f32.vlgmr.msra.gmra.mxu0 %vm2269_vm1, %v4662_v0 }
 0x99d   :  { %2385 = vmatpush1.xpose.msra.mxu1 %v4662_v0  ;;  %v2347_v17 = vpop.permute.xlu1 %2346  ;;  %2473 = vmatpush1.xpose.msra.mxu0 %v4662_v0 }
 0x99e   :  { %vm2348_vm5 = vcmp.ge.s32.totalorder %v5002_v1, %v2347_v17  ;;  %vm2349_vm6 = vcmp.ge.s32.totalorder %v4989_v32, %v2347_v17  ;;  %2551 = vmatprep.subr.mxu1 %v4662_v0  ;;  %2630 = vmatprep.subr.mxu0 %v4662_v0 }
 0x99f   :  { %4400 = vmatprep.mubr.msk.f32.mxu1 %vm2349_vm6, %v4662_v0 }
 0x9a0   :  { %4401 = vmatmul.mubr.msk.f32.vlgmr.msra.gmra.mxu1 %vm2348_vm5, %v4662_v0 }
 0x9a1   :  { %2552 = vmatpush1.xpose.msra.mxu1 %v4662_v0 }
 0x9a2   :  { %2718 = vmatprep.subr.mxu1 %v4662_v0 }
 0xa5c   :  { %v2262_v3 = vpop.f32.mrf.mxu1  ;;  %v2341_v38 = vpop.f32.mrf.mxu0 }
 0xa5d   :  { %vm2426_vm7 = vcmp.ge.f32.partialorder %v2262_v3, %v5021_v5  ;;  %vm2425_vm8 = vcmp.ge.f32.partialorder %v2341_v38, %v5021_v5 }
 0xa5e   :  { %v2427_v49 = vsel %vm2426_vm7, %v2184_v30, %v2183_v13  ;;  %v2264_v42 = vpop.f32.mrf.mxu1  ;;  %v2343_v6 = vpop.f32.mrf.mxu0 }
 0xa5f   :  { %v2428_v40 = vsel %vm2425_vm8, %v2185_v31, %v2427_v49 }
 0xa60   :  { %v2420_v37 = vpop.f32.mrf.mxu1 }
 0xa61   :  { %vm2424_vm9 = vcmp.ge.f32.partialorder %v2420_v37, %v5021_v5 }
 0xa62   :  { %v2429_v8 = vsel %vm2424_vm9, %v2186_v61, %v2428_v40  ;;  %v2422_v56 = vpop.f32.mrf.mxu1 }
 0xa63   :  { %v2431_v12 = vor.u32 16384, %v2429_v8  ;;  %v2430_v44 = vor.u32 8192, %v2429_v8  ;;  %v2432_v9 = vor.u32 24576, %v2429_v8 }
 0xa65   :  { %2513 = vperm.xlu1 %4502, %v2431_v12   ;;  %2434 = vperm.xlu0 %4501, %v2430_v44  }
 0xa69   :  { %2592 = vperm.xlu0 %4501, %v2432_v9  }
 0xae0   :  { %v2514_v35 = vpop.permute.xlu1 %2513  ;;  %v2435_v60 = vpop.permute.xlu0 %2434 }
 0xae1   :  { %vm2515_vm10 = vcmp.ge.s32.totalorder %v5002_v1, %v2514_v35  ;;  %vm2516_vm11 = vcmp.ge.s32.totalorder %v4989_v32, %v2514_v35  ;;  %vm2436_vm12 = vcmp.ge.s32.totalorder %v5002_v1, %v2435_v60  ;;  %vm2437_vm13 = vcmp.ge.s32.totalorder %v4989_v32, %v2435_v60 }
 0xae2   :  { %4404 = vmatprep.mubr.msk.f32.mxu0 %vm2437_vm13, %v4662_v0  ;;  %4408 = vmatprep.mubr.msk.f32.mxu1 %vm2516_vm11, %v4662_v0 }
 0xae3   :  { %4405 = vmatmul.mubr.msk.f32.vlgmr.msra.gmra.mxu0 %vm2436_vm12, %v4662_v0  ;;  %4409 = vmatmul.mubr.msk.f32.vlgmr.msra.gmra.mxu1 %vm2515_vm10, %v4662_v0 }
 0xae4   :  { %2631 = vmatpush1.xpose.msra.mxu0 %v4662_v0  ;;  %v2593_v11 = vpop.permute.xlu0 %2592  ;;  %2719 = vmatpush1.xpose.msra.mxu1 %v4662_v0 }
 0xae5   :  { %vm2594_vm14 = vcmp.ge.s32.totalorder %v5002_v1, %v2593_v11  ;;  %vm2595_vm15 = vcmp.ge.s32.totalorder %v4989_v32, %v2593_v11  ;;  %2797 = vmatprep.subr.mxu0 %v4662_v0  ;;  %2876 = vmatprep.subr.mxu1 %v4662_v0 }
 0xae6   :  { %4412 = vmatprep.mubr.msk.f32.mxu0 %vm2595_vm15, %v4662_v0 }
 0xae7   :  { %4413 = vmatmul.mubr.msk.f32.vlgmr.msra.gmra.mxu0 %vm2594_vm14, %v4662_v0 }
 0xae8   :  { %2798 = vmatpush1.xpose.msra.mxu0 %v4662_v0 }
 0xae9   :  { %2964 = vmatprep.subr.mxu0 %v4662_v0 }
 0xba3   :  { %v2508_v36 = vpop.f32.mrf.mxu0  ;;  %v2587_v14 = vpop.f32.mrf.mxu1 }
 0xba4   :  { %vm2672_vm0 = vcmp.ge.f32.partialorder %v2508_v36, %v5021_v5  ;;  %vm2671_vm1 = vcmp.ge.f32.partialorder %v2587_v14, %v5021_v5 }
 0xba5   :  { %v2673_v18 = vsel %vm2672_vm0, %v2430_v44, %v2429_v8  ;;  %v2510_v45 = vpop.f32.mrf.mxu0  ;;  %v2589_v43 = vpop.f32.mrf.mxu1 }
 0xba6   :  { %v2674_v58 = vsel %vm2671_vm1, %v2431_v12, %v2673_v18 }
 0xba7   :  { %v2666_v52 = vpop.f32.mrf.mxu0 }
 0xba8   :  { %vm2670_vm2 = vcmp.ge.f32.partialorder %v2666_v52, %v5021_v5 }
 0xba9   :  { %v2675_v33 = vsel %vm2670_vm2, %v2432_v9, %v2674_v58  ;;  %v2668_v39 = vpop.f32.mrf.mxu0 }
 0xbaa   :  { %v2677_v34 = vor.u32 4096, %v2675_v33  ;;  %v2676_v20 = vor.u32 2048, %v2675_v33  ;;  %v2678_v63 = vor.u32 6144, %v2675_v33 }
 0xbac   :  { %2759 = vperm.xlu0 %4501, %v2677_v34   ;;  %2680 = vperm.xlu1 %4502, %v2676_v20  }
 0xbb0   :  { %2838 = vperm.xlu1 %4502, %v2678_v63  }
 0xc27   :  { %v2760_v21 = vpop.permute.xlu0 %2759  ;;  %v2681_v4 = vpop.permute.xlu1 %2680 }
 0xc28   :  { %vm2761_vm3 = vcmp.ge.s32.totalorder %v5002_v1, %v2760_v21  ;;  %vm2762_vm4 = vcmp.ge.s32.totalorder %v4989_v32, %v2760_v21  ;;  %vm2682_vm5 = vcmp.ge.s32.totalorder %v5002_v1, %v2681_v4  ;;  %vm2683_vm6 = vcmp.ge.s32.totalorder %v4989_v32, %v2681_v4 }
 0xc29   :  { %4416 = vmatprep.mubr.msk.f32.mxu1 %vm2683_vm6, %v4662_v0  ;;  %4420 = vmatprep.mubr.msk.f32.mxu0 %vm2762_vm4, %v4662_v0 }
 0xc2a   :  { %4417 = vmatmul.mubr.msk.f32.vlgmr.msra.gmra.mxu1 %vm2682_vm5, %v4662_v0  ;;  %4421 = vmatmul.mubr.msk.f32.vlgmr.msra.gmra.mxu0 %vm2761_vm3, %v4662_v0 }
 0xc2b   :  { %2877 = vmatpush1.xpose.msra.mxu1 %v4662_v0  ;;  %v2839_v51 = vpop.permute.xlu1 %2838  ;;  %2965 = vmatpush1.xpose.msra.mxu0 %v4662_v0 }
 0xc2c   :  { %vm2840_vm7 = vcmp.ge.s32.totalorder %v5002_v1, %v2839_v51  ;;  %vm2841_vm8 = vcmp.ge.s32.totalorder %v4989_v32, %v2839_v51  ;;  %3043 = vmatprep.subr.mxu1 %v4662_v0  ;;  %3122 = vmatprep.subr.mxu0 %v4662_v0 }
 0xc2d   :  { %4424 = vmatprep.mubr.msk.f32.mxu1 %vm2841_vm8, %v4662_v0 }
 0xc2e   :  { %4425 = vmatmul.mubr.msk.f32.vlgmr.msra.gmra.mxu1 %vm2840_vm7, %v4662_v0 }
 0xc2f   :  { %3044 = vmatpush1.xpose.msra.mxu1 %v4662_v0 }
 0xc30   :  { %3210 = vmatprep.subr.mxu1 %v4662_v0 }
 0xcea   :  { %v2754_v48 = vpop.f32.mrf.mxu1  ;;  %v2833_v41 = vpop.f32.mrf.mxu0 }
 0xceb   :  { %vm2918_vm9 = vcmp.ge.f32.partialorder %v2754_v48, %v5021_v5  ;;  %vm2917_vm10 = vcmp.ge.f32.partialorder %v2833_v41, %v5021_v5 }
 0xcec   :  { %v2919_v15 = vsel %vm2918_vm9, %v2676_v20, %v2675_v33  ;;  %v2756_v25 = vpop.f32.mrf.mxu1  ;;  %v2835_v50 = vpop.f32.mrf.mxu0 }
 0xced   :  { %v2920_v10 = vsel %vm2917_vm10, %v2677_v34, %v2919_v15 }
 0xcee   :  { %v2912_v28 = vpop.f32.mrf.mxu1 }
 0xcef   :  { %vm2916_vm11 = vcmp.ge.f32.partialorder %v2912_v28, %v5021_v5 }
 0xcf0   :  { %v2921_v22 = vsel %vm2916_vm11, %v2678_v63, %v2920_v10  ;;  %v2914_v53 = vpop.f32.mrf.mxu1 }
 0xcf1   :  { %v2923_v47 = vor.u32 1024, %v2921_v22  ;;  %v2922_v24 = vor.u32 512, %v2921_v22  ;;  %v2924_v26 = vor.u32 1536, %v2921_v22 }
 0xcf3   :  { %3005 = vperm.xlu1 %4502, %v2923_v47   ;;  %2926 = vperm.xlu0 %4501, %v2922_v24  }
 0xcf7   :  { %3084 = vperm.xlu0 %4501, %v2924_v26  }
 0xd6e   :  { %v3006_v54 = vpop.permute.xlu1 %3005  ;;  %v2927_v29 = vpop.permute.xlu0 %2926 }
 0xd6f   :  { %vm3007_vm12 = vcmp.ge.s32.totalorder %v5002_v1, %v3006_v54  ;;  %vm3008_vm13 = vcmp.ge.s32.totalorder %v4989_v32, %v3006_v54  ;;  %vm2928_vm14 = vcmp.ge.s32.totalorder %v5002_v1, %v2927_v29  ;;  %vm2929_vm15 = vcmp.ge.s32.totalorder %v4989_v32, %v2927_v29 }
 0xd70   :  { %4428 = vmatprep.mubr.msk.f32.mxu0 %vm2929_vm15, %v4662_v0  ;;  %4432 = vmatprep.mubr.msk.f32.mxu1 %vm3008_vm13, %v4662_v0 }
 0xd71   :  { %4429 = vmatmul.mubr.msk.f32.vlgmr.msra.gmra.mxu0 %vm2928_vm14, %v4662_v0  ;;  %4433 = vmatmul.mubr.msk.f32.vlgmr.msra.gmra.mxu1 %vm3007_vm12, %v4662_v0 }
 0xd72   :  { %3123 = vmatpush1.xpose.msra.mxu0 %v4662_v0  ;;  %v3085_v57 = vpop.permute.xlu0 %3084  ;;  %3211 = vmatpush1.xpose.msra.mxu1 %v4662_v0 }
 0xd73   :  { %vm3086_vm0 = vcmp.ge.s32.totalorder %v5002_v1, %v3085_v57  ;;  %vm3087_vm1 = vcmp.ge.s32.totalorder %v4989_v32, %v3085_v57  ;;  %3289 = vmatprep.subr.mxu0 %v4662_v0  ;;  %3368 = vmatprep.subr.mxu1 %v4662_v0 }
 0xd74   :  { %4436 = vmatprep.mubr.msk.f32.mxu0 %vm3087_vm1, %v4662_v0 }
 0xd75   :  { %4437 = vmatmul.mubr.msk.f32.vlgmr.msra.gmra.mxu0 %vm3086_vm0, %v4662_v0 }
 0xd76   :  { %3290 = vmatpush1.xpose.msra.mxu0 %v4662_v0 }
 0xd77   :  { %3456 = vmatprep.subr.mxu0 %v4662_v0 }
 0xe31   :  { %v3000_v27 = vpop.f32.mrf.mxu0  ;;  %v3079_v13 = vpop.f32.mrf.mxu1 }
 0xe32   :  { %vm3164_vm2 = vcmp.ge.f32.partialorder %v3000_v27, %v5021_v5  ;;  %vm3163_vm3 = vcmp.ge.f32.partialorder %v3079_v13, %v5021_v5 }
 0xe33   :  { %v3165_v59 = vsel %vm3164_vm2, %v2922_v24, %v2921_v22  ;;  %v3002_v31 = vpop.f32.mrf.mxu0  ;;  %v3081_v30 = vpop.f32.mrf.mxu1 }
 0xe34   :  { %v3166_v23 = vsel %vm3163_vm3, %v2923_v47, %v3165_v59 }
 0xe35   :  { %v3158_v61 = vpop.f32.mrf.mxu0 }
 0xe36   :  { %vm3162_vm4 = vcmp.ge.f32.partialorder %v3158_v61, %v5021_v5 }
 0xe37   :  { %v3167_v2 = vsel %vm3162_vm4, %v2924_v26, %v3166_v23  ;;  %v3160_v17 = vpop.f32.mrf.mxu0 }
 0xe38   :  { %v3169_v3 = vor.u32 256, %v3167_v2  ;;  %v3168_v38 = vor.u32 128, %v3167_v2  ;;  %v3170_v49 = vor.u32 384, %v3167_v2 }
 0xe3a   :  { %3251 = vperm.xlu0 %4501, %v3169_v3   ;;  %3172 = vperm.xlu1 %4502, %v3168_v38  }
 0xe3e   :  { %3330 = vperm.xlu1 %4502, %v3170_v49  }
 0xeb5   :  { %v3252_v42 = vpop.permute.xlu0 %3251  ;;  %v3173_v6 = vpop.permute.xlu1 %3172 }
 0xeb6   :  { %vm3253_vm5 = vcmp.ge.s32.totalorder %v5002_v1, %v3252_v42  ;;  %vm3254_vm6 = vcmp.ge.s32.totalorder %v4989_v32, %v3252_v42  ;;  %vm3174_vm7 = vcmp.ge.s32.totalorder %v5002_v1, %v3173_v6  ;;  %vm3175_vm8 = vcmp.ge.s32.totalorder %v4989_v32, %v3173_v6 }
 0xeb7   :  { %4440 = vmatprep.mubr.msk.f32.mxu1 %vm3175_vm8, %v4662_v0  ;;  %4444 = vmatprep.mubr.msk.f32.mxu0 %vm3254_vm6, %v4662_v0 }
 0xeb8   :  { %4441 = vmatmul.mubr.msk.f32.vlgmr.msra.gmra.mxu1 %vm3174_vm7, %v4662_v0  ;;  %4445 = vmatmul.mubr.msk.f32.vlgmr.msra.gmra.mxu0 %vm3253_vm5, %v4662_v0 }
 0xeb9   :  { %3369 = vmatpush1.xpose.msra.mxu1 %v4662_v0  ;;  %v3331_v37 = vpop.permute.xlu1 %3330  ;;  %3457 = vmatpush1.xpose.msra.mxu0 %v4662_v0 }
 0xeba   :  { %vm3332_vm9 = vcmp.ge.s32.totalorder %v5002_v1, %v3331_v37  ;;  %vm3333_vm10 = vcmp.ge.s32.totalorder %v4989_v32, %v3331_v37  ;;  %3535 = vmatprep.subr.mxu1 %v4662_v0  ;;  %3614 = vmatprep.subr.mxu0 %v4662_v0 }
 0xebb   :  { %4448 = vmatprep.mubr.msk.f32.mxu1 %vm3333_vm10, %v4662_v0 }
 0xebc   :  { %4449 = vmatmul.mubr.msk.f32.vlgmr.msra.gmra.mxu1 %vm3332_vm9, %v4662_v0 }
 0xebd   :  { %3536 = vmatpush1.xpose.msra.mxu1 %v4662_v0 }
 0xebe   :  { %3702 = vmatprep.subr.mxu1 %v4662_v0 }
 0xf78   :  { %v3246_v40 = vpop.f32.mrf.mxu1  ;;  %v3325_v8 = vpop.f32.mrf.mxu0 }
 0xf79   :  { %vm3410_vm11 = vcmp.ge.f32.partialorder %v3246_v40, %v5021_v5  ;;  %vm3409_vm12 = vcmp.ge.f32.partialorder %v3325_v8, %v5021_v5 }
 0xf7a   :  { %v3411_v56 = vsel %vm3410_vm11, %v3168_v38, %v3167_v2  ;;  %v3248_v12 = vpop.f32.mrf.mxu1  ;;  %v3327_v44 = vpop.f32.mrf.mxu0 }
 0xf7b   :  { %v3412_v35 = vsel %vm3409_vm12, %v3169_v3, %v3411_v56 }
 0xf7c   :  { %v3404_v9 = vpop.f32.mrf.mxu1 }
 0xf7d   :  { %vm3408_vm13 = vcmp.ge.f32.partialorder %v3404_v9, %v5021_v5  ;;  %v65_v9 = vld [vmem:[#allocation2] sm:$0xff] }
 0xf7e   :  { %v3413_v60 = vsel %vm3408_vm13, %v3170_v49, %v3412_v35  ;;  %v3406_v11 = vpop.f32.mrf.mxu1  ;;  %v66_v35 = vld [vmem:[#allocation2 + $0x8] sm:$0xff] }
 0xf7f   :  { %v3415_v36 = vor.u32 64, %v3413_v60  ;;  %v3414_v14 = vor.u32 32, %v3413_v60  ;;  %v3416_v18 = vor.u32 96, %v3413_v60  ;;  %v69_v11 = vld [vmem:[#allocation2 + $0x48] sm:$0xff] }
 0xf81   :  { %3497 = vperm.xlu1 %4502, %v3415_v36   ;;  %3418 = vperm.xlu0 %4501, %v3414_v14  }
 0xf85   :  { %3576 = vperm.xlu0 %4501, %v3416_v18  }
 0xffc   :  { %v3498_v45 = vpop.permute.xlu1 %3497  ;;  %v3419_v43 = vpop.permute.xlu0 %3418 }
 0xffd   :  { %vm3499_vm14 = vcmp.ge.s32.totalorder %v5002_v1, %v3498_v45  ;;  %vm3500_vm15 = vcmp.ge.s32.totalorder %v4989_v32, %v3498_v45  ;;  %vm3420_vm0 = vcmp.ge.s32.totalorder %v5002_v1, %v3419_v43  ;;  %vm3421_vm1 = vcmp.ge.s32.totalorder %v4989_v32, %v3419_v43  ;;  %v91_v45 = vld [vmem:[#allocation2 + $0x58] sm:$0xff] }
 0xffe   :  { %4452 = vmatprep.mubr.msk.f32.mxu0 %vm3421_vm1, %v4662_v0  ;;  %4456 = vmatprep.mubr.msk.f32.mxu1 %vm3500_vm15, %v4662_v0 }
 0xfff   :  { %4453 = vmatmul.mubr.msk.f32.vlgmr.msra.gmra.mxu0 %vm3420_vm0, %v4662_v0  ;;  %4457 = vmatmul.mubr.msk.f32.vlgmr.msra.gmra.mxu1 %vm3499_vm14, %v4662_v0 }
0x1000   :  { %3615 = vmatpush1.xpose.msra.mxu0 %v4662_v0  ;;  %v3577_v52 = vpop.permute.xlu0 %3576  ;;  %3703 = vmatpush1.xpose.msra.mxu1 %v4662_v0 }
0x1001   :  { %vm3578_vm2 = vcmp.ge.s32.totalorder %v5002_v1, %v3577_v52  ;;  %vm3579_vm3 = vcmp.ge.s32.totalorder %v4989_v32, %v3577_v52  ;;  %3781 = vmatprep.subr.mxu0 %v4662_v0  ;;  %3860 = vmatprep.subr.mxu1 %v4662_v0  ;;  %v71_v52 = vsub.f32 %v66_v35, %v69_v11 }
0x1002   :  { %4460 = vmatprep.mubr.msk.f32.mxu0 %vm3579_vm3, %v4662_v0 }
0x1003   :  { %4461 = vmatmul.mubr.msk.f32.vlgmr.msra.gmra.mxu0 %vm3578_vm2, %v4662_v0 }
0x1004   :  { %3782 = vmatpush1.xpose.msra.mxu0 %v4662_v0 }
0x1005   :  { %3948 = vmatprep.subr.mxu0 %v4662_v0 }
0x10bf   :  { %v3492_v58 = vpop.f32.mrf.mxu0  ;;  %v3571_v33 = vpop.f32.mrf.mxu1 }
0x10c0   :  { %vm3656_vm4 = vcmp.ge.f32.partialorder %v3492_v58, %v5021_v5  ;;  %vm3655_vm5 = vcmp.ge.f32.partialorder %v3571_v33, %v5021_v5  ;;  %v109_v33 = vld [vmem:[#allocation2 + $0x20] sm:$0xff] }
0x10c1   :  { %v3657_v39 = vsel %vm3656_vm4, %v3414_v14, %v3413_v60  ;;  %v3494_v34 = vpop.f32.mrf.mxu0  ;;  %v3573_v20 = vpop.f32.mrf.mxu1  ;;  %v68_v60 = vld [vmem:[#allocation2 + $0x40] sm:$0xff]  ;;  %v90_v14 = vld [vmem:[#allocation2 + $0x50] sm:$0xff] }
0x10c2   :  { %v3658_v21 = vsel %vm3655_vm5, %v3415_v36, %v3657_v39  ;;  %v87_v36 = vld [vmem:[#allocation2 + $0x10] sm:$0xff]  ;;  %v70_v43 = vsub.f32 %v65_v9, %v68_v60  ;;  %v112_v39 = vld [vmem:[#allocation2 + $0x60] sm:$0xff]  ;;  %v110_v34 = vld [vmem:[#allocation2 + $0x28] sm:$0xff] }
0x10c3   :  { %v3650_v63 = vpop.f32.mrf.mxu0  ;;  %v92_v58 = vsub.f32 %v87_v36, %v90_v14  ;;  %v113_v20 = vld [vmem:[#allocation2 + $0x68] sm:$0xff] }
0x10c4   :  { %vm3654_vm6 = vcmp.ge.f32.partialorder %v3650_v63, %v5021_v5  ;;  %v72_v63 = vand.u32 2147483647, %v70_v43 }
0x10c5   :  { %v3659_v4 = vsel %vm3654_vm6, %v3416_v18, %v3658_v21  ;;  %v3652_v51 = vpop.f32.mrf.mxu0  ;;  %v88_v18 = vld [vmem:[#allocation2 + $0x18] sm:$0xff]  ;;  %v73_v21 = vand.u32 2147483647, %v71_v52 }
0x10c6   :  { %v3661_v48 = vor.u32 16, %v3659_v4  ;;  %v3660_v41 = vor.u32 8, %v3659_v4  ;;  %v3662_v15 = vor.u32 24, %v3659_v4 }
0x10c8   :  { %3743 = vperm.xlu0 %4501, %v3661_v48   ;;  %3664 = vperm.xlu1 %4502, %v3660_v41  }
0x10cc   :  { %3822 = vperm.xlu1 %4502, %v3662_v15  }
0x1143   :  { %v3744_v25 = vpop.permute.xlu0 %3743  ;;  %v3665_v50 = vpop.permute.xlu1 %3664 }
0x1144   :  { %vm3745_vm7 = vcmp.ge.s32.totalorder %v5002_v1, %v3744_v25  ;;  %vm3746_vm8 = vcmp.ge.s32.totalorder %v4989_v32, %v3744_v25  ;;  %vm3666_vm9 = vcmp.ge.s32.totalorder %v5002_v1, %v3665_v50  ;;  %vm3667_vm10 = vcmp.ge.s32.totalorder %v4989_v32, %v3665_v50  ;;  %v132_v25 = vld [vmem:[#allocation2 + $0x38] sm:$0xff]  ;;  %v134_v50 = vld [vmem:[#allocation2 + $0x70] sm:$0xff] }
0x1145   :  { %4464 = vmatprep.mubr.msk.f32.mxu1 %vm3667_vm10, %v4662_v0  ;;  %4468 = vmatprep.mubr.msk.f32.mxu0 %vm3746_vm8, %v4662_v0 }
0x1146   :  { %4465 = vmatmul.mubr.msk.f32.vlgmr.msra.gmra.mxu1 %vm3666_vm9, %v4662_v0  ;;  %4469 = vmatmul.mubr.msk.f32.vlgmr.msra.gmra.mxu0 %vm3745_vm7, %v4662_v0 }
0x1147   :  { %3861 = vmatpush1.xpose.msra.mxu1 %v4662_v0  ;;  %v3823_v28 = vpop.permute.xlu1 %3822  ;;  %3949 = vmatpush1.xpose.msra.mxu0 %v4662_v0 }
0x1148   :  { %vm3824_vm11 = vcmp.ge.s32.totalorder %v5002_v1, %v3823_v28  ;;  %vm3825_vm12 = vcmp.ge.s32.totalorder %v4989_v32, %v3823_v28  ;;  %4027 = vmatprep.subr.mxu1 %v4662_v0  ;;  %4106 = vmatprep.subr.mxu0 %v4662_v0  ;;  %v135_v28 = vld [vmem:[#allocation2 + $0x78] sm:$0xff] }
0x1149   :  { %4472 = vmatprep.mubr.msk.f32.mxu1 %vm3825_vm12, %v4662_v0  ;;  %vm74_vm12 = vcmp.lt.f32.partialorder %v72_v63, 1.0 }
0x114a   :  { %4473 = vmatmul.mubr.msk.f32.vlgmr.msra.gmra.mxu1 %vm3824_vm11, %v4662_v0 }
0x114b   :  { %4028 = vmatpush1.xpose.msra.mxu1 %v4662_v0 }
0x114c   :  { %4192 = vmatprep.subr.mxu1 %v4662_v0 }
0x1206   :  { %v3738_v10 = vpop.f32.mrf.mxu1  ;;  %v3817_v22 = vpop.f32.mrf.mxu0 }
0x1207   :  { %vm3902_vm13 = vcmp.ge.f32.partialorder %v3738_v10, %v5021_v5  ;;  %vm3901_vm14 = vcmp.ge.f32.partialorder %v3817_v22, %v5021_v5  ;;  %v76_v10 = vmul.f32 0.5, %v72_v63  ;;  %v77_v22 = vmul.f32 0.5, %v73_v21 }
0x1208   :  { %v3903_v53 = vsel %vm3902_vm13, %v3660_v41, %v3659_v4  ;;  %v3740_v47 = vpop.f32.mrf.mxu1  ;;  %v3819_v24 = vpop.f32.mrf.mxu0  ;;  %v94_v4 = vand.u32 2147483647, %v92_v58  ;;  %v115_v41 = vsub.f32 %v110_v34, %v113_v20  ;;  %vm75_vm13 = vcmp.lt.f32.partialorder %v73_v21, 1.0 }
0x1209   :  { %v3904_v54 = vsel %vm3901_vm14, %v3661_v48, %v3903_v53  ;;  %v114_v48 = vsub.f32 %v109_v33, %v112_v39 }
0x120a   :  { %v3896_v26 = vpop.f32.mrf.mxu1  ;;  %v98_v53 = vmul.f32 0.5, %v94_v4  ;;  %vm96_vm14 = vcmp.lt.f32.partialorder %v94_v4, 1.0 }
0x120b   :  { %vm3900_vm15 = vcmp.ge.f32.partialorder %v3896_v26, %v5021_v5  ;;  %v116_v24 = vand.u32 2147483647, %v114_v48  ;;  %v117_v26 = vand.u32 2147483647, %v115_v41  ;;  %v4258_v41 = vmul.f32 %v4883_v19, %v4997_v7 }
0x120c   :  { %v3905_v29 = vsel %vm3900_vm15, %v3662_v15, %v3904_v54  ;;  %v3898_v57 = vpop.f32.mrf.mxu1  ;;  %v131_v15 = vld [vmem:[#allocation2 + $0x30] sm:$0xff] }
0x120d   :  { %v3907_v27 = vor.u32 4, %v3905_v29  ;;  %v3906_v13 = vor.u32 2, %v3905_v29  ;;  %v3908_v59 = vor.u32 6, %v3905_v29  ;;  %v136_v54 = vsub.f32 %v131_v15, %v134_v50 }
0x120e   :  { %v4298_v57 = vadd.f32 -0.5, %v72_v63 }
0x120f   :  { %3989 = vperm.xlu1 %4502, %v3907_v27   ;;  %3910 = vperm.xlu0 %4501, %v3906_v13  }
0x1213   :  { %4068 = vperm.xlu0 %4501, %v3908_v59  }
0x128a   :  { %v3990_v31 = vpop.permute.xlu1 %3989  ;;  %v3911_v30 = vpop.permute.xlu0 %3910 }
0x128b   :  { %vm3991_vm0 = vcmp.ge.s32.totalorder %v5002_v1, %v3990_v31  ;;  %vm3992_vm1 = vcmp.ge.s32.totalorder %v4989_v32, %v3990_v31  ;;  %vm3912_vm2 = vcmp.ge.s32.totalorder %v5002_v1, %v3911_v30  ;;  %vm3913_vm3 = vcmp.ge.s32.totalorder %v4989_v32, %v3911_v30 }
0x128c   :  { %4476 = vmatprep.mubr.msk.f32.mxu0 %vm3913_vm3, %v4662_v0  ;;  %4480 = vmatprep.mubr.msk.f32.mxu1 %vm3992_vm1, %v4662_v0  ;;  %v100_v31 = vmul.f32 %v98_v53, %v94_v4  ;;  %v4300_v30 = vadd.f32 -0.5, %v94_v4  ;;  %vm119_vm1 = vcmp.lt.f32.partialorder %v117_v26, 1.0 }
0x128d   :  { %4477 = vmatmul.mubr.msk.f32.vlgmr.msra.gmra.mxu0 %vm3912_vm2, %v4662_v0  ;;  %4481 = vmatmul.mubr.msk.f32.vlgmr.msra.gmra.mxu1 %vm3991_vm0, %v4662_v0  ;;  %vm118_vm0 = vcmp.lt.f32.partialorder %v116_v24, 1.0 }
0x128e   :  { %4107 = vmatpush1.xpose.msra.mxu0 %v4662_v0  ;;  %v4069_v61 = vpop.permute.xlu0 %4068  ;;  %4193 = vmatpush1.xpose.msra.mxu1 %v4662_v0 }
0x128f   :  { %vm4070_vm4 = vcmp.ge.s32.totalorder %v5002_v1, %v4069_v61  ;;  %vm4071_vm5 = vcmp.ge.s32.totalorder %v4989_v32, %v4069_v61 }
0x1290   :  { %4484 = vmatprep.mubr.msk.f32.mxu0 %vm4071_vm5, %v4662_v0 }
0x1291   :  { %4485 = vmatmul.mubr.msk.f32.vlgmr.msra.gmra.mxu0 %vm4070_vm4, %v4662_v0 }
0x134d   :  { %v3984_v23 = vpop.f32.mrf.mxu0  ;;  %v4063_v2 = vpop.f32.mrf.mxu1 }
0x134e   :  { %vm4148_vm6 = vcmp.ge.f32.partialorder %v3984_v23, %v5021_v5  ;;  %vm4147_vm7 = vcmp.ge.f32.partialorder %v4063_v2, %v5021_v5  ;;  %v120_v2 = vmul.f32 0.5, %v116_v24 }
0x134f   :  { %v4149_v17 = vsel %vm4148_vm6, %v3906_v13, %v3905_v29  ;;  %v3986_v3 = vpop.f32.mrf.mxu0  ;;  %v4065_v38 = vpop.f32.mrf.mxu1  ;;  %v137_v29 = vsub.f32 %v132_v25, %v135_v28  ;;  %v78_v13 = vmul.f32 %v76_v10, %v72_v63  ;;  %v4259_v28 = vmul.f32 %v4888_v46, %v4984_v62 }
0x1350   :  { %v4150_v42 = vsel %vm4147_vm7, %v3907_v27, %v4149_v17  ;;  %v4299_v27 = vadd.f32 -0.5, %v73_v21  ;;  %v121_v17 = vmul.f32 0.5, %v117_v26  ;;  %v138_v3 = vand.u32 2147483647, %v136_v54 }
0x1351   :  { %v4142_v49 = vpop.f32.mrf.mxu0  ;;  %v139_v38 = vand.u32 2147483647, %v137_v29  ;;  %v4260_v53 = vadd.f32 %v4259_v28, %v4258_v41  ;;  %vm4253_vm6 = vcmp.gt.f32.partialorder %v5021_v5, 0.0 }
0x1352   :  { %vm4146_vm8 = vcmp.ge.f32.partialorder %v4142_v49, %v5021_v5  ;;  %v82_v49 = vsel %vm74_vm12, %v78_v13, %v4298_v57  ;;  %v142_v9 = vmul.f32 0.5, %v138_v3  ;;  %v4304_v14 = vadd.f32 -0.5, %v138_v3 }
0x1353   :  { %v4151_v6 = vsel %vm4146_vm8, %v3908_v59, %v4150_v42  ;;  %v4144_v37 = vpop.f32.mrf.mxu0  ;;  %v79_v59 = vmul.f32 %v77_v22, %v73_v21  ;;  %v143_v35 = vmul.f32 0.5, %v139_v38  ;;  %v4305_v52 = vadd.f32 -0.5, %v139_v38 }
0x1354   :  { %v4152_v40 = vor.u32 1, %v4151_v6  ;;  %vm140_vm2 = vcmp.lt.f32.partialorder %v138_v3, 1.0  ;;  %vm141_vm3 = vcmp.lt.f32.partialorder %v139_v38, 1.0 }
0x1355   :  { %v83_v42 = vsel %vm75_vm13, %v79_v59, %v4299_v27  ;;  %v145_v43 = vmul.f32 %v143_v35, %v139_v38 }
0x1356   :  { %4154 = vperm.xlu1 %4502, %v4152_v40  }
0x1357   :  { %v149_v39 = vsel %vm141_vm3, %v145_v43, %v4305_v52 }
0x13d1   :  { %v4155_v8 = vpop.permute.xlu1 %4154 }
0x13d2   :  { %vm4156_vm9 = vcmp.ge.s32.totalorder %v5002_v1, %v4155_v8  ;;  %vm4157_vm10 = vcmp.ge.s32.totalorder %v4989_v32, %v4155_v8  ;;  %v4302_v8 = vadd.f32 -0.5, %v116_v24 }
0x13d3   :  { %4488 = vmatprep.mubr.msk.f32.mxu1 %vm4157_vm10, %v4662_v0 }
0x13d4   :  { %4489 = vmatmul.mubr.msk.f32.vlgmr.msra.gmra.mxu1 %vm4156_vm9, %v4662_v0  ;;  %v93_v0 = vsub.f32 %v88_v18, %v91_v45  ;;  %v144_v45 = vmul.f32 %v142_v9, %v138_v3 }
0x13d6   :  { %v95_v51 = vand.u32 2147483647, %v93_v0  ;;  %v148_v33 = vsel %vm140_vm2, %v144_v45, %v4304_v14 }
0x13d8   :  { %v99_v47 = vmul.f32 0.5, %v95_v51  ;;  %v4301_v23 = vadd.f32 -0.5, %v95_v51  ;;  %vm97_vm15 = vcmp.lt.f32.partialorder %v95_v51, 1.0 }
0x13da   :  { %v101_v61 = vmul.f32 %v99_v47, %v95_v51 }
0x13dc   :  { %v105_v37 = vsel %vm97_vm15, %v101_v61, %v4301_v23 }
0x13dd   :  { %v107_v11 = vadd.f32 %v105_v37, %v83_v42 }
0x1494   :  { %v4228_v56 = vpop.f32.mrf.mxu1 }
0x1495   :  { %vm4232_vm11 = vcmp.ge.f32.partialorder %v4228_v56, %v5021_v5  ;;  %v123_v56 = vmul.f32 %v121_v17, %v117_v26 }
0x1496   :  { %v4230_v12 = vpop.f32.mrf.mxu1  ;;  %v5321_v44 = vsel %vm4232_vm11, %v4152_v40, %v4151_v6  ;;  %v104_v6 = vsel %vm96_vm14, %v100_v31, %v4300_v30  ;;  %v122_v40 = vmul.f32 %v120_v2, %v116_v24 }
0x1497   :  { %4236 = vperm.xlu0 %4501, %v5321_v44   ;;  %v4303_v12 = vadd.f32 -0.5, %v117_v26  ;;  %v106_v60 = vadd.f32 %v104_v6, %v82_v49 }
0x1498   :  { %v126_v36 = vsel %vm118_vm0, %v122_v40, %v4302_v8 }
0x1499   :  { %v127_v18 = vsel %vm119_vm1, %v123_v56, %v4303_v12  ;;  %v128_v58 = vadd.f32 %v126_v36, %v106_v60 }
0x149a   :  { %v129_v0 = vadd.f32 %v127_v18, %v107_v11 }
0x149b   :  { %v150_v34 = vadd.f32 %v148_v33, %v128_v58 }
0x149c   :  { %v151_v20 = vadd.f32 %v149_v39, %v129_v0 }
0x149d   :  { %v152_v21 = vmul.f32 %v4883_v19, %v150_v34 }
0x149e   :  { %v153_v4 = vmul.f32 %v4888_v46, %v151_v20  ;;  %v4264_v46 = vlaneseq }
0x14a0   :  { %v154_v22 = vadd.f32 %v153_v4, %v152_v21  ;;  %v4265_v62 = vand.u32 127, %v4264_v46 }
0x14a2   :  { %vm4266_vm7 = vcmp.eq.s32.totalorder %v4265_v62, 0  ;;  %vm4268_vm8 = vcmp.eq.s32.totalorder %v4265_v62, 1  ;;  %vm4276_vm9 = vcmp.eq.s32.totalorder %v4265_v62, 2 }
0x1512   :  { %v4237_v63 = vpop.permute.xlu0 %4236 }
0x1513   :  { %vm4239_vm4 = vcmp.gt.f32.partialorder %v5002_v1, %v4237_v63  ;;  %vm4240_vm5 = vcmp.gt.f32.partialorder %v4989_v32, %v4237_v63 }
0x1514   :  { %v4490_v51 = vsel %vm4239_vm4, 1.0, %v4663_v16  ;;  %v4491_v48 = vsel %vm4240_vm5, 1.0, %v4663_v16 }
0x1515   :  { %v4245_v15 = vadd.f32 %v4491_v48, %v4490_v51  ;;  %v4248_v25 = vmul.f32 %v4490_v51, %v5002_v1  ;;  %v4249_v50 = vmul.f32 %v4491_v48, %v4989_v32 }
0x1517   :  { %4246 = vadd.xlane.f32.xlu1 %v4245_v15  ;;  %v4250_v10 = vadd.f32 %v4249_v50, %v4248_v25 }
0x1519   :  { %4251 = vadd.xlane.f32.xlu0 %v4250_v10 }
0x151b   :  { %155 = vadd.xlane.f32.xlu1 %v154_v22 }
0x151d   :  { %4261 = vadd.xlane.f32.xlu0 %v4260_v53 }
0x15a0   :  { %v4247_v47 = vpop.xlane.xlu1 %4246 }
0x15a1   :  { %v4254_v16 = vsub.f32 %v5021_v5, %v4247_v47 }
0x15a2   :  { %v4252_v24 = vpop.xlane.xlu0 %4251 }
0x15a3   :  { %v4255_v19 = vmul.f32 %v4254_v16, %v5321_v44  ;;  %v4277_v44 = vsel %vm4276_vm9, %v5018_v55, 0.0 }
0x15a4   :  { %v156_v54 = vpop.xlane.xlu1 %155 }
0x15a5   :  { %v4256_v7 = vadd.f32 %v4255_v19, %v4252_v24  ;;  %v4267_v29 = vsel %vm4266_vm7, %v156_v54, 0.0 }
0x15a6   :  { %v4262_v32 = vpop.xlane.xlu0 %4261 }
0x15a7   :  { %v4257_v1 = vsel %vm4253_vm6, %v4256_v7, 0.0 }
0x15a8   :  { %v4263_v26 = vadd.f32 %v4262_v32, %v4257_v1 }
0x15aa   :  { %4271 = vperm.xlu0 %4501, %v4263_v26  }
0x1625   :  { %v4272_v57 = vpop.permute.xlu0 %4271 }
0x1626   :  { %v4274_v27 = vsel %vm4268_vm8, %v4272_v57, 0.0 }
0x1627   :  { %v4275_v13 = vadd.f32 %v4274_v27, %v4267_v29 }
0x1629   :  { %v4278_v59 = vadd.f32 %v4277_v44, %v4275_v13 }
0x162b   :  { %4279 = vst [vmem:[#allocation8] sm:$0xff] %v4278_v59 }
0x162c   :  { %4642 = shalt.err (!%p4639_p5)
}
0x162d   :  { %4289 = dma.vmem_to_hbm [thread:$0]  %s4287_s2, 128, %s5348_s3, [#allocation4]  }
0x162e   :  { %4655 = dma.done.wait [#allocation4], 128  }
0x162f   :  { %4656 = vsyncadd [#allocation4], 4294967168 }
0x1630   :  { %4293 = vsyncpa [#allocation3], 1 }
0x1631   :  { %4294 = vsyncpa [#allocation6], 1 }
0x1632   :  { %4295 = vsyncpa [#allocation4], 1 }

</bundles_post_ra>
